<compile_context>
chip_gen: v7x
topology: tpu7x:2x2x1
jax: 0.10.0
libtpu: 0.0.40
codegen_flags: <defaults>
</compile_context>

<pallas_src>
import numpy as np
import jax
import jax.numpy as jnp
from jax import lax
from jax.experimental import pallas as pl
from jax.experimental.pallas import tpu as pltpu


C_IN, C_OUT, KSIZE, STRIDE, PAD = 3, 5, 5, 4, 2
IMG = 128
POOL_HW = 16                       # pooled spatial extent (16x16)
POS = POOL_HW * POOL_HW            # 256 pooled positions per image
COLS_PER_IMG = 4 * POS             # 1024 columns per image (4 pool quads x 256 positions)
K_RAW = C_IN * KSIZE * KSIZE       # 75
K_PAD = 80                         # conv reduction dim padded to a multiple of 8 (was 128)
C_PAD = 8                          # conv out-channels padded to one sublane tile
FEATS = C_OUT * POS                # 1280 = PyTorch flatten size
N_CLASSES = 10
OUT_PAD = 128                      # class dim padded to one lane tile (dense stores)


# ----------------------------- fused Pallas kernel -----------------------------------------
def _fused_kernel(pT_ref, wcT_ref, bcT_ref, wfc_ref, bfc_ref, out_ref, feats_ref):
    # pT_ref  : (80, b_blk*1024) bf16  transposed K-padded im2col patches, columns ordered
    #                                  q*(b_blk*256) + b_local*256 + (ho*16 + wo)
    # wcT_ref : (8, 80)          bf16  conv weight (5 real out-channels + 3 zero rows)
    # bcT_ref : (8, 1)           f32   conv bias (padded)
    # wfc_ref : (1280, 128)      f32   FC weight, rows in PyTorch flatten order, cols padded
    # bfc_ref : (1, 128)         f32   FC bias (padded)
    # out_ref : (b_blk, 128)     f32   padded logits
    # feats_ref: (b_blk, 1280)   f32   VMEM scratch for the flattened pooled features
    b_blk = out_ref.shape[0]
    width = b_blk * POS

    # One tall transposed MXU matmul -> lane-dense (8, b_blk*1024) f32 conv map.
    conv_t = jnp.dot(wcT_ref[...], pT_ref[...], preferred_element_type=jnp.float32)

    # Block-wide 2x2 max-pool over the 4 quads: three 256-aligned full-width lane maxes.
    pooled = conv_t[:, 0:width]
    for q in range(1, 4):
        pooled = jnp.maximum(pooled, conv_t[:, q * width:(q + 1) * width])
    # Bias + ReLU once for the whole block (both commute with the max).  Rows 5..7 stay 0.
    pooled = jnp.maximum(pooled + bcT_ref[...], 0.0)          # (8, b_blk*256)

    # Flatten into PyTorch order c*256 + h*16 + w via direct (1, 256) row-segment stores
    # into VMEM scratch -- no python-list concat, live ranges bounded per segment.
    for b in range(b_blk):
        for c in range(C_OUT):
            feats_ref[b:b + 1, c * POS:(c + 1) * POS] = \
                pooled[c:c + 1, b * POS:(b + 1) * POS]

    # FC on the scratch; result is lane-dense (b_blk, 128).
    logits = jnp.dot(feats_ref[...], wfc_ref[...], preferred_element_type=jnp.float32)
    out_ref[...] = (logits + bfc_ref[...]).astype(out_ref.dtype)


# ----------------------------- glue: patch extraction + weight packing ---------------------
def _make_patches_t(x, b_blk):
    """x: (N, 3, 128, 128) f32, N % b_blk == 0 -> (80, N*1024) bf16 transposed im2col."""
    n = x.shape[0]
    # (N, 75, 32, 32); feature order = cin*25 + kh*5 + kw  (matches w_conv.reshape(5, 75)).
    patches = lax.conv_general_dilated_patches(
        x, (KSIZE, KSIZE), (STRIDE, STRIDE), ((PAD, PAD), (PAD, PAD)),
        precision=lax.Precision.HIGHEST)
    patches = jnp.pad(patches, ((0, 0), (0, K_PAD - K_RAW), (0, 0), (0, 0)))   # 75 -> 80
    # Conv position (oh, ow) = (2*ho + dy, 2*wo + dx).  Column order per block of b_blk
    # images:  (dy*2 + dx) * (b_blk*256) + b_local*256 + ho*16 + wo
    patches = patches.reshape(n // b_blk, b_blk, K_PAD, POOL_HW, 2, POOL_HW, 2)
    # dims: (nb, b, k, ho, dy, wo, dx) -> (k, nb, dy, dx, b, ho, wo)
    patches = jnp.transpose(patches, (2, 0, 4, 6, 1, 3, 5))
    return patches.reshape(K_PAD, n * COLS_PER_IMG).astype(jnp.bfloat16)


def classifier_cnn_forward(x, w_conv, b_conv, w_fc, b_fc):
    """x: (N, 3, 128, 128) float32.  Returns logits (N, 10); matches the PyTorch module."""
    n = x.shape[0]
    # Images per grid step: amortizes the ~0.35us/step overhead; batch is padded up to a
    # multiple of the block so a large odd N can never force one huge un-pipelined block.
    b_blk = 16 if n >= 16 else 8
    n_pad = ((n + b_blk - 1) // b_blk) * b_blk
    if n_pad != n:
        x = jnp.pad(x, ((0, n_pad - n), (0, 0), (0, 0), (0, 0)))
    # VMEM: pT block = 80 * b_blk*1024 * 2B (2.5 MiB at b_blk=16), x2 for double-buffering,
    # + 2 x 640 KiB for the padded FC weight + 80 KiB scratch  ->  ~6.5 MiB, well under the
    # 16/32 MiB scoped defaults on v5e/v6e/v7x.

    pT = _make_patches_t(x, b_blk)                                       # (80, n_pad*1024) bf16
    wcT = jnp.pad(w_conv.reshape(C_OUT, K_RAW),
                  ((0, C_PAD - C_OUT), (0, K_PAD - K_RAW))).astype(jnp.bfloat16)   # (8, 80)
    bcT = jnp.pad(b_conv.reshape(C_OUT, 1), ((0, C_PAD - C_OUT), (0, 0)))          # (8, 1)
    wfc = jnp.pad(jnp.transpose(w_fc, (1, 0)),
                  ((0, 0), (0, OUT_PAD - N_CLASSES)))                              # (1280, 128)
    bfc = jnp.pad(b_fc.reshape(1, N_CLASSES), ((0, 0), (0, OUT_PAD - N_CLASSES)))  # (1, 128)

    out = pl.pallas_call(
        _fused_kernel,
        out_shape=jax.ShapeDtypeStruct((n_pad, OUT_PAD), jnp.float32),
        grid_spec=pltpu.PrefetchScalarGridSpec(
            num_scalar_prefetch=0,
            grid=(n_pad // b_blk,),
            in_specs=[
                pl.BlockSpec((K_PAD, b_blk * COLS_PER_IMG), lambda i: (0, i)),
                pl.BlockSpec((C_PAD, K_PAD), lambda i: (0, 0)),
                pl.BlockSpec((C_PAD, 1), lambda i: (0, 0)),
                pl.BlockSpec((FEATS, OUT_PAD), lambda i: (0, 0)),
                pl.BlockSpec((1, OUT_PAD), lambda i: (0, 0)),
            ],
            out_specs=pl.BlockSpec((b_blk, OUT_PAD), lambda i: (i, 0)),
            scratch_shapes=[pltpu.VMEM((b_blk, FEATS), jnp.float32)],
        ),
        compiler_params=pltpu.CompilerParams(
            dimension_semantics=("parallel",),
            allow_input_fusion=[True, False, False, False, False],
        ),
    )(pT, wcT, bcT, wfc, bfc)
    return out[:n, :N_CLASSES]


# ----------------------------- pure-JAX reference (PyTorch semantics) ----------------------
def reference_forward(x, w_conv, b_conv, w_fc, b_fc):
    y = lax.conv_general_dilated(
        x, w_conv, window_strides=(STRIDE, STRIDE), padding=((PAD, PAD), (PAD, PAD)),
        dimension_numbers=("NCHW", "OIHW", "NCHW"), precision=lax.Precision.HIGHEST)
    y = jax.nn.relu(y + b_conv.reshape(1, C_OUT, 1, 1))
    y = lax.reduce_window(y, -jnp.inf, lax.max, (1, 1, 2, 2), (1, 1, 2, 2), "VALID")
    y = y.reshape(y.shape[0], -1)
    return jnp.dot(y, w_fc.T, precision=lax.Precision.HIGHEST) + b_fc


if __name__ == "__main__":
    key = jax.random.PRNGKey(0)
    k_x, k_wc, k_bc, k_wf, k_bf = jax.random.split(key, 5)

    N = 2
    x = jax.random.normal(k_x, (N, C_IN, IMG, IMG), dtype=jnp.float32)

    # Deterministic parameter init (PyTorch-style uniform fan-in bounds)
    fan_conv = C_IN * KSIZE * KSIZE
    bc_bound = 1.0 / np.sqrt(fan_conv)
    w_conv = jax.random.uniform(k_wc, (C_OUT, C_IN, KSIZE, KSIZE), jnp.float32,
                                -bc_bound, bc_bound)
    b_conv = jax.random.uniform(k_bc, (C_OUT,), jnp.float32, -bc_bound, bc_bound)
    bf_bound = 1.0 / np.sqrt(FEATS)
    w_fc = jax.random.uniform(k_wf, (N_CLASSES, FEATS), jnp.float32, -bf_bound, bf_bound)
    b_fc = jax.random.uniform(k_bf, (N_CLASSES,), jnp.float32, -bf_bound, bf_bound)

    out = jax.block_until_ready(jax.jit(classifier_cnn_forward)(x, w_conv, b_conv, w_fc, b_fc))
    ref = jax.block_until_ready(reference_forward(x, w_conv, b_conv, w_fc, b_fc))

    if not np.allclose(np.asarray(out), np.asarray(ref), atol=1e-2, rtol=1e-2):
        raise AssertionError("Pallas output does not match reference")
    print("KERNEL_OK")
</pallas_src>

<mosaic_0001>
module attributes {stable_mosaic.version = 11 : i64} {
  func.func @_fused_kernel(%arg0: i32, %arg1: memref<80x8192xbf16, #tpu.memory_space<vmem>>, %arg2: memref<8x80xbf16, #tpu.memory_space<vmem>>, %arg3: memref<8x1xf32, #tpu.memory_space<vmem>>, %arg4: memref<1280x128xf32, #tpu.memory_space<vmem>>, %arg5: memref<1x128xf32, #tpu.memory_space<vmem>>, %arg6: memref<8x128xf32, #tpu.memory_space<vmem>>, %arg7: memref<8x1280xf32, #tpu.memory_space<vmem>>) attributes {dimension_semantics = [#tpu.dimension_semantics<parallel>], iteration_bounds = array<i64: 1>, scalar_prefetch = 0 : i64, scratch_operands = 1 : i64, tpu.core_type = #tpu.core_type<tc>, window_params = [{transform_indices = @transform_0, window_bounds = array<i64: 80, 8192>}, {pipeline_mode = #tpu.pipeline_mode<synchronous>, transform_indices = @transform_1, window_bounds = array<i64: 8, 80>}, {pipeline_mode = #tpu.pipeline_mode<synchronous>, transform_indices = @transform_2, window_bounds = array<i64: 8, 1>}, {pipeline_mode = #tpu.pipeline_mode<synchronous>, transform_indices = @transform_3, window_bounds = array<i64: 1280, 128>}, {pipeline_mode = #tpu.pipeline_mode<synchronous>, transform_indices = @transform_4, window_bounds = array<i64: 1, 128>}, {transform_indices = @transform_5, window_bounds = array<i64: 8, 128>}]} {
    %c0 = arith.constant 0 : index
    %c0_0 = arith.constant 0 : index
    %0 = vector.load %arg2[%c0, %c0_0] : memref<8x80xbf16, #tpu.memory_space<vmem>>, vector<8x80xbf16>
    %c0_1 = arith.constant 0 : index
    %c0_2 = arith.constant 0 : index
    %1 = vector.load %arg1[%c0_1, %c0_2] : memref<80x8192xbf16, #tpu.memory_space<vmem>>, vector<80x8192xbf16>
    %cst = arith.constant dense<0.000000e+00> : vector<8x8192xf32>
    %2 = tpu.matmul %0, %1, %cst {dimension_numbers = #tpu.dot_dimension_numbers<[1], [0], [0], [1], [0, 0, 1, 1], [], []>} : vector<8x80xbf16>, vector<80x8192xbf16>, vector<8x8192xf32> -> vector<8x8192xf32>
    %3 = vector.extract_strided_slice %2 {offsets = [0, 0], sizes = [8, 2048], strides = [1, 1]} : vector<8x8192xf32> to vector<8x2048xf32>
    %4 = vector.extract_strided_slice %2 {offsets = [0, 2048], sizes = [8, 2048], strides = [1, 1]} : vector<8x8192xf32> to vector<8x2048xf32>
    %5 = arith.maximumf %3, %4 : vector<8x2048xf32>
    %6 = vector.extract_strided_slice %2 {offsets = [0, 4096], sizes = [8, 2048], strides = [1, 1]} : vector<8x8192xf32> to vector<8x2048xf32>
    %7 = arith.maximumf %5, %6 : vector<8x2048xf32>
    %8 = vector.extract_strided_slice %2 {offsets = [0, 6144], sizes = [8, 2048], strides = [1, 1]} : vector<8x8192xf32> to vector<8x2048xf32>
    %9 = arith.maximumf %7, %8 : vector<8x2048xf32>
    %c0_3 = arith.constant 0 : index
    %c0_4 = arith.constant 0 : index
    %10 = vector.load %arg3[%c0_3, %c0_4] : memref<8x1xf32, #tpu.memory_space<vmem>>, vector<8x1xf32>
    %11 = vector.broadcast %10 : vector<8x1xf32> to vector<8x2048xf32>
    %12 = arith.addf %9, %11 : vector<8x2048xf32>
    %cst_5 = arith.constant 0.000000e+00 : f32
    %13 = vector.broadcast %cst_5 : f32 to vector<8x2048xf32>
    %14 = arith.maximumf %12, %13 : vector<8x2048xf32>
    %15 = vector.extract_strided_slice %14 {offsets = [0, 0], sizes = [1, 256], strides = [1, 1]} : vector<8x2048xf32> to vector<1x256xf32>
    %c0_6 = arith.constant 0 : index
    %c0_7 = arith.constant 0 : index
    %16 = vector.load %arg7[%c0_6, %c0_7] : memref<8x1280xf32, #tpu.memory_space<vmem>>, vector<1x256xf32>
    tpu.vector_store %arg7[%c0_6, %c0_7], %15 {strides = array<i32>} : memref<8x1280xf32, #tpu.memory_space<vmem>>, vector<1x256xf32>,
    %17 = vector.extract_strided_slice %14 {offsets = [1, 0], sizes = [1, 256], strides = [1, 1]} : vector<8x2048xf32> to vector<1x256xf32>
    %c0_8 = arith.constant 0 : index
    %c256 = arith.constant 256 : index
    %18 = vector.load %arg7[%c0_8, %c256] : memref<8x1280xf32, #tpu.memory_space<vmem>>, vector<1x256xf32>
    tpu.vector_store %arg7[%c0_8, %c256], %17 {strides = array<i32>} : memref<8x1280xf32, #tpu.memory_space<vmem>>, vector<1x256xf32>,
    %19 = vector.extract_strided_slice %14 {offsets = [2, 0], sizes = [1, 256], strides = [1, 1]} : vector<8x2048xf32> to vector<1x256xf32>
    %c0_9 = arith.constant 0 : index
    %c512 = arith.constant 512 : index
    %20 = vector.load %arg7[%c0_9, %c512] : memref<8x1280xf32, #tpu.memory_space<vmem>>, vector<1x256xf32>
    tpu.vector_store %arg7[%c0_9, %c512], %19 {strides = array<i32>} : memref<8x1280xf32, #tpu.memory_space<vmem>>, vector<1x256xf32>,
    %21 = vector.extract_strided_slice %14 {offsets = [3, 0], sizes = [1, 256], strides = [1, 1]} : vector<8x2048xf32> to vector<1x256xf32>
    %c0_10 = arith.constant 0 : index
    %c768 = arith.constant 768 : index
    %22 = vector.load %arg7[%c0_10, %c768] : memref<8x1280xf32, #tpu.memory_space<vmem>>, vector<1x256xf32>
    tpu.vector_store %arg7[%c0_10, %c768], %21 {strides = array<i32>} : memref<8x1280xf32, #tpu.memory_space<vmem>>, vector<1x256xf32>,
    %23 = vector.extract_strided_slice %14 {offsets = [4, 0], sizes = [1, 256], strides = [1, 1]} : vector<8x2048xf32> to vector<1x256xf32>
    %c0_11 = arith.constant 0 : index
    %c1024 = arith.constant 1024 : index
    %24 = vector.load %arg7[%c0_11, %c1024] : memref<8x1280xf32, #tpu.memory_space<vmem>>, vector<1x256xf32>
    tpu.vector_store %arg7[%c0_11, %c1024], %23 {strides = array<i32>} : memref<8x1280xf32, #tpu.memory_space<vmem>>, vector<1x256xf32>,
    %25 = vector.extract_strided_slice %14 {offsets = [0, 256], sizes = [1, 256], strides = [1, 1]} : vector<8x2048xf32> to vector<1x256xf32>
    %c1 = arith.constant 1 : index
    %c0_12 = arith.constant 0 : index
    %26 = vector.load %arg7[%c1, %c0_12] : memref<8x1280xf32, #tpu.memory_space<vmem>>, vector<1x256xf32>
    tpu.vector_store %arg7[%c1, %c0_12], %25 {strides = array<i32>} : memref<8x1280xf32, #tpu.memory_space<vmem>>, vector<1x256xf32>,
    %27 = vector.extract_strided_slice %14 {offsets = [1, 256], sizes = [1, 256], strides = [1, 1]} : vector<8x2048xf32> to vector<1x256xf32>
    %c1_13 = arith.constant 1 : index
    %c256_14 = arith.constant 256 : index
    %28 = vector.load %arg7[%c1_13, %c256_14] : memref<8x1280xf32, #tpu.memory_space<vmem>>, vector<1x256xf32>
    tpu.vector_store %arg7[%c1_13, %c256_14], %27 {strides = array<i32>} : memref<8x1280xf32, #tpu.memory_space<vmem>>, vector<1x256xf32>,
    %29 = vector.extract_strided_slice %14 {offsets = [2, 256], sizes = [1, 256], strides = [1, 1]} : vector<8x2048xf32> to vector<1x256xf32>
    %c1_15 = arith.constant 1 : index
    %c512_16 = arith.constant 512 : index
    %30 = vector.load %arg7[%c1_15, %c512_16] : memref<8x1280xf32, #tpu.memory_space<vmem>>, vector<1x256xf32>
    tpu.vector_store %arg7[%c1_15, %c512_16], %29 {strides = array<i32>} : memref<8x1280xf32, #tpu.memory_space<vmem>>, vector<1x256xf32>,
    %31 = vector.extract_strided_slice %14 {offsets = [3, 256], sizes = [1, 256], strides = [1, 1]} : vector<8x2048xf32> to vector<1x256xf32>
    %c1_17 = arith.constant 1 : index
    %c768_18 = arith.constant 768 : index
    %32 = vector.load %arg7[%c1_17, %c768_18] : memref<8x1280xf32, #tpu.memory_space<vmem>>, vector<1x256xf32>
    tpu.vector_store %arg7[%c1_17, %c768_18], %31 {strides = array<i32>} : memref<8x1280xf32, #tpu.memory_space<vmem>>, vector<1x256xf32>,
    %33 = vector.extract_strided_slice %14 {offsets = [4, 256], sizes = [1, 256], strides = [1, 1]} : vector<8x2048xf32> to vector<1x256xf32>
    %c1_19 = arith.constant 1 : index
    %c1024_20 = arith.constant 1024 : index
    %34 = vector.load %arg7[%c1_19, %c1024_20] : memref<8x1280xf32, #tpu.memory_space<vmem>>, vector<1x256xf32>
    tpu.vector_store %arg7[%c1_19, %c1024_20], %33 {strides = array<i32>} : memref<8x1280xf32, #tpu.memory_space<vmem>>, vector<1x256xf32>,
    %35 = vector.extract_strided_slice %14 {offsets = [0, 512], sizes = [1, 256], strides = [1, 1]} : vector<8x2048xf32> to vector<1x256xf32>
    %c2 = arith.constant 2 : index
    %c0_21 = arith.constant 0 : index
    %36 = vector.load %arg7[%c2, %c0_21] : memref<8x1280xf32, #tpu.memory_space<vmem>>, vector<1x256xf32>
    tpu.vector_store %arg7[%c2, %c0_21], %35 {strides = array<i32>} : memref<8x1280xf32, #tpu.memory_space<vmem>>, vector<1x256xf32>,
    %37 = vector.extract_strided_slice %14 {offsets = [1, 512], sizes = [1, 256], strides = [1, 1]} : vector<8x2048xf32> to vector<1x256xf32>
    %c2_22 = arith.constant 2 : index
    %c256_23 = arith.constant 256 : index
    %38 = vector.load %arg7[%c2_22, %c256_23] : memref<8x1280xf32, #tpu.memory_space<vmem>>, vector<1x256xf32>
    tpu.vector_store %arg7[%c2_22, %c256_23], %37 {strides = array<i32>} : memref<8x1280xf32, #tpu.memory_space<vmem>>, vector<1x256xf32>,
    %39 = vector.extract_strided_slice %14 {offsets = [2, 512], sizes = [1, 256], strides = [1, 1]} : vector<8x2048xf32> to vector<1x256xf32>
    %c2_24 = arith.constant 2 : index
    %c512_25 = arith.constant 512 : index
    %40 = vector.load %arg7[%c2_24, %c512_25] : memref<8x1280xf32, #tpu.memory_space<vmem>>, vector<1x256xf32>
    tpu.vector_store %arg7[%c2_24, %c512_25], %39 {strides = array<i32>} : memref<8x1280xf32, #tpu.memory_space<vmem>>, vector<1x256xf32>,
    %41 = vector.extract_strided_slice %14 {offsets = [3, 512], sizes = [1, 256], strides = [1, 1]} : vector<8x2048xf32> to vector<1x256xf32>
    %c2_26 = arith.constant 2 : index
    %c768_27 = arith.constant 768 : index
    %42 = vector.load %arg7[%c2_26, %c768_27] : memref<8x1280xf32, #tpu.memory_space<vmem>>, vector<1x256xf32>
    tpu.vector_store %arg7[%c2_26, %c768_27], %41 {strides = array<i32>} : memref<8x1280xf32, #tpu.memory_space<vmem>>, vector<1x256xf32>,
    %43 = vector.extract_strided_slice %14 {offsets = [4, 512], sizes = [1, 256], strides = [1, 1]} : vector<8x2048xf32> to vector<1x256xf32>
    %c2_28 = arith.constant 2 : index
    %c1024_29 = arith.constant 1024 : index
    %44 = vector.load %arg7[%c2_28, %c1024_29] : memref<8x1280xf32, #tpu.memory_space<vmem>>, vector<1x256xf32>
    tpu.vector_store %arg7[%c2_28, %c1024_29], %43 {strides = array<i32>} : memref<8x1280xf32, #tpu.memory_space<vmem>>, vector<1x256xf32>,
    %45 = vector.extract_strided_slice %14 {offsets = [0, 768], sizes = [1, 256], strides = [1, 1]} : vector<8x2048xf32> to vector<1x256xf32>
    %c3 = arith.constant 3 : index
    %c0_30 = arith.constant 0 : index
    %46 = vector.load %arg7[%c3, %c0_30] : memref<8x1280xf32, #tpu.memory_space<vmem>>, vector<1x256xf32>
    tpu.vector_store %arg7[%c3, %c0_30], %45 {strides = array<i32>} : memref<8x1280xf32, #tpu.memory_space<vmem>>, vector<1x256xf32>,
    %47 = vector.extract_strided_slice %14 {offsets = [1, 768], sizes = [1, 256], strides = [1, 1]} : vector<8x2048xf32> to vector<1x256xf32>
    %c3_31 = arith.constant 3 : index
    %c256_32 = arith.constant 256 : index
    %48 = vector.load %arg7[%c3_31, %c256_32] : memref<8x1280xf32, #tpu.memory_space<vmem>>, vector<1x256xf32>
    tpu.vector_store %arg7[%c3_31, %c256_32], %47 {strides = array<i32>} : memref<8x1280xf32, #tpu.memory_space<vmem>>, vector<1x256xf32>,
    %49 = vector.extract_strided_slice %14 {offsets = [2, 768], sizes = [1, 256], strides = [1, 1]} : vector<8x2048xf32> to vector<1x256xf32>
    %c3_33 = arith.constant 3 : index
    %c512_34 = arith.constant 512 : index
    %50 = vector.load %arg7[%c3_33, %c512_34] : memref<8x1280xf32, #tpu.memory_space<vmem>>, vector<1x256xf32>
    tpu.vector_store %arg7[%c3_33, %c512_34], %49 {strides = array<i32>} : memref<8x1280xf32, #tpu.memory_space<vmem>>, vector<1x256xf32>,
    %51 = vector.extract_strided_slice %14 {offsets = [3, 768], sizes = [1, 256], strides = [1, 1]} : vector<8x2048xf32> to vector<1x256xf32>
    %c3_35 = arith.constant 3 : index
    %c768_36 = arith.constant 768 : index
    %52 = vector.load %arg7[%c3_35, %c768_36] : memref<8x1280xf32, #tpu.memory_space<vmem>>, vector<1x256xf32>
    tpu.vector_store %arg7[%c3_35, %c768_36], %51 {strides = array<i32>} : memref<8x1280xf32, #tpu.memory_space<vmem>>, vector<1x256xf32>,
    %53 = vector.extract_strided_slice %14 {offsets = [4, 768], sizes = [1, 256], strides = [1, 1]} : vector<8x2048xf32> to vector<1x256xf32>
    %c3_37 = arith.constant 3 : index
    %c1024_38 = arith.constant 1024 : index
    %54 = vector.load %arg7[%c3_37, %c1024_38] : memref<8x1280xf32, #tpu.memory_space<vmem>>, vector<1x256xf32>
    tpu.vector_store %arg7[%c3_37, %c1024_38], %53 {strides = array<i32>} : memref<8x1280xf32, #tpu.memory_space<vmem>>, vector<1x256xf32>,
    %55 = vector.extract_strided_slice %14 {offsets = [0, 1024], sizes = [1, 256], strides = [1, 1]} : vector<8x2048xf32> to vector<1x256xf32>
    %c4 = arith.constant 4 : index
    %c0_39 = arith.constant 0 : index
    %56 = vector.load %arg7[%c4, %c0_39] : memref<8x1280xf32, #tpu.memory_space<vmem>>, vector<1x256xf32>
    tpu.vector_store %arg7[%c4, %c0_39], %55 {strides = array<i32>} : memref<8x1280xf32, #tpu.memory_space<vmem>>, vector<1x256xf32>,
    %57 = vector.extract_strided_slice %14 {offsets = [1, 1024], sizes = [1, 256], strides = [1, 1]} : vector<8x2048xf32> to vector<1x256xf32>
    %c4_40 = arith.constant 4 : index
    %c256_41 = arith.constant 256 : index
    %58 = vector.load %arg7[%c4_40, %c256_41] : memref<8x1280xf32, #tpu.memory_space<vmem>>, vector<1x256xf32>
    tpu.vector_store %arg7[%c4_40, %c256_41], %57 {strides = array<i32>} : memref<8x1280xf32, #tpu.memory_space<vmem>>, vector<1x256xf32>,
    %59 = vector.extract_strided_slice %14 {offsets = [2, 1024], sizes = [1, 256], strides = [1, 1]} : vector<8x2048xf32> to vector<1x256xf32>
    %c4_42 = arith.constant 4 : index
    %c512_43 = arith.constant 512 : index
    %60 = vector.load %arg7[%c4_42, %c512_43] : memref<8x1280xf32, #tpu.memory_space<vmem>>, vector<1x256xf32>
    tpu.vector_store %arg7[%c4_42, %c512_43], %59 {strides = array<i32>} : memref<8x1280xf32, #tpu.memory_space<vmem>>, vector<1x256xf32>,
    %61 = vector.extract_strided_slice %14 {offsets = [3, 1024], sizes = [1, 256], strides = [1, 1]} : vector<8x2048xf32> to vector<1x256xf32>
    %c4_44 = arith.constant 4 : index
    %c768_45 = arith.constant 768 : index
    %62 = vector.load %arg7[%c4_44, %c768_45] : memref<8x1280xf32, #tpu.memory_space<vmem>>, vector<1x256xf32>
    tpu.vector_store %arg7[%c4_44, %c768_45], %61 {strides = array<i32>} : memref<8x1280xf32, #tpu.memory_space<vmem>>, vector<1x256xf32>,
    %63 = vector.extract_strided_slice %14 {offsets = [4, 1024], sizes = [1, 256], strides = [1, 1]} : vector<8x2048xf32> to vector<1x256xf32>
    %c4_46 = arith.constant 4 : index
    %c1024_47 = arith.constant 1024 : index
    %64 = vector.load %arg7[%c4_46, %c1024_47] : memref<8x1280xf32, #tpu.memory_space<vmem>>, vector<1x256xf32>
    tpu.vector_store %arg7[%c4_46, %c1024_47], %63 {strides = array<i32>} : memref<8x1280xf32, #tpu.memory_space<vmem>>, vector<1x256xf32>,
    %65 = vector.extract_strided_slice %14 {offsets = [0, 1280], sizes = [1, 256], strides = [1, 1]} : vector<8x2048xf32> to vector<1x256xf32>
    %c5 = arith.constant 5 : index
    %c0_48 = arith.constant 0 : index
    %66 = vector.load %arg7[%c5, %c0_48] : memref<8x1280xf32, #tpu.memory_space<vmem>>, vector<1x256xf32>
    tpu.vector_store %arg7[%c5, %c0_48], %65 {strides = array<i32>} : memref<8x1280xf32, #tpu.memory_space<vmem>>, vector<1x256xf32>,
    %67 = vector.extract_strided_slice %14 {offsets = [1, 1280], sizes = [1, 256], strides = [1, 1]} : vector<8x2048xf32> to vector<1x256xf32>
    %c5_49 = arith.constant 5 : index
    %c256_50 = arith.constant 256 : index
    %68 = vector.load %arg7[%c5_49, %c256_50] : memref<8x1280xf32, #tpu.memory_space<vmem>>, vector<1x256xf32>
    tpu.vector_store %arg7[%c5_49, %c256_50], %67 {strides = array<i32>} : memref<8x1280xf32, #tpu.memory_space<vmem>>, vector<1x256xf32>,
    %69 = vector.extract_strided_slice %14 {offsets = [2, 1280], sizes = [1, 256], strides = [1, 1]} : vector<8x2048xf32> to vector<1x256xf32>
    %c5_51 = arith.constant 5 : index
    %c512_52 = arith.constant 512 : index
    %70 = vector.load %arg7[%c5_51, %c512_52] : memref<8x1280xf32, #tpu.memory_space<vmem>>, vector<1x256xf32>
    tpu.vector_store %arg7[%c5_51, %c512_52], %69 {strides = array<i32>} : memref<8x1280xf32, #tpu.memory_space<vmem>>, vector<1x256xf32>,
    %71 = vector.extract_strided_slice %14 {offsets = [3, 1280], sizes = [1, 256], strides = [1, 1]} : vector<8x2048xf32> to vector<1x256xf32>
    %c5_53 = arith.constant 5 : index
    %c768_54 = arith.constant 768 : index
    %72 = vector.load %arg7[%c5_53, %c768_54] : memref<8x1280xf32, #tpu.memory_space<vmem>>, vector<1x256xf32>
    tpu.vector_store %arg7[%c5_53, %c768_54], %71 {strides = array<i32>} : memref<8x1280xf32, #tpu.memory_space<vmem>>, vector<1x256xf32>,
    %73 = vector.extract_strided_slice %14 {offsets = [4, 1280], sizes = [1, 256], strides = [1, 1]} : vector<8x2048xf32> to vector<1x256xf32>
    %c5_55 = arith.constant 5 : index
    %c1024_56 = arith.constant 1024 : index
    %74 = vector.load %arg7[%c5_55, %c1024_56] : memref<8x1280xf32, #tpu.memory_space<vmem>>, vector<1x256xf32>
    tpu.vector_store %arg7[%c5_55, %c1024_56], %73 {strides = array<i32>} : memref<8x1280xf32, #tpu.memory_space<vmem>>, vector<1x256xf32>,
    %75 = vector.extract_strided_slice %14 {offsets = [0, 1536], sizes = [1, 256], strides = [1, 1]} : vector<8x2048xf32> to vector<1x256xf32>
    %c6 = arith.constant 6 : index
    %c0_57 = arith.constant 0 : index
    %76 = vector.load %arg7[%c6, %c0_57] : memref<8x1280xf32, #tpu.memory_space<vmem>>, vector<1x256xf32>
    tpu.vector_store %arg7[%c6, %c0_57], %75 {strides = array<i32>} : memref<8x1280xf32, #tpu.memory_space<vmem>>, vector<1x256xf32>,
    %77 = vector.extract_strided_slice %14 {offsets = [1, 1536], sizes = [1, 256], strides = [1, 1]} : vector<8x2048xf32> to vector<1x256xf32>
    %c6_58 = arith.constant 6 : index
    %c256_59 = arith.constant 256 : index
    %78 = vector.load %arg7[%c6_58, %c256_59] : memref<8x1280xf32, #tpu.memory_space<vmem>>, vector<1x256xf32>
    tpu.vector_store %arg7[%c6_58, %c256_59], %77 {strides = array<i32>} : memref<8x1280xf32, #tpu.memory_space<vmem>>, vector<1x256xf32>,
    %79 = vector.extract_strided_slice %14 {offsets = [2, 1536], sizes = [1, 256], strides = [1, 1]} : vector<8x2048xf32> to vector<1x256xf32>
    %c6_60 = arith.constant 6 : index
    %c512_61 = arith.constant 512 : index
    %80 = vector.load %arg7[%c6_60, %c512_61] : memref<8x1280xf32, #tpu.memory_space<vmem>>, vector<1x256xf32>
    tpu.vector_store %arg7[%c6_60, %c512_61], %79 {strides = array<i32>} : memref<8x1280xf32, #tpu.memory_space<vmem>>, vector<1x256xf32>,
    %81 = vector.extract_strided_slice %14 {offsets = [3, 1536], sizes = [1, 256], strides = [1, 1]} : vector<8x2048xf32> to vector<1x256xf32>
    %c6_62 = arith.constant 6 : index
    %c768_63 = arith.constant 768 : index
    %82 = vector.load %arg7[%c6_62, %c768_63] : memref<8x1280xf32, #tpu.memory_space<vmem>>, vector<1x256xf32>
    tpu.vector_store %arg7[%c6_62, %c768_63], %81 {strides = array<i32>} : memref<8x1280xf32, #tpu.memory_space<vmem>>, vector<1x256xf32>,
    %83 = vector.extract_strided_slice %14 {offsets = [4, 1536], sizes = [1, 256], strides = [1, 1]} : vector<8x2048xf32> to vector<1x256xf32>
    %c6_64 = arith.constant 6 : index
    %c1024_65 = arith.constant 1024 : index
    %84 = vector.load %arg7[%c6_64, %c1024_65] : memref<8x1280xf32, #tpu.memory_space<vmem>>, vector<1x256xf32>
    tpu.vector_store %arg7[%c6_64, %c1024_65], %83 {strides = array<i32>} : memref<8x1280xf32, #tpu.memory_space<vmem>>, vector<1x256xf32>,
    %85 = vector.extract_strided_slice %14 {offsets = [0, 1792], sizes = [1, 256], strides = [1, 1]} : vector<8x2048xf32> to vector<1x256xf32>
    %c7 = arith.constant 7 : index
    %c0_66 = arith.constant 0 : index
    %86 = vector.load %arg7[%c7, %c0_66] : memref<8x1280xf32, #tpu.memory_space<vmem>>, vector<1x256xf32>
    tpu.vector_store %arg7[%c7, %c0_66], %85 {strides = array<i32>} : memref<8x1280xf32, #tpu.memory_space<vmem>>, vector<1x256xf32>,
    %87 = vector.extract_strided_slice %14 {offsets = [1, 1792], sizes = [1, 256], strides = [1, 1]} : vector<8x2048xf32> to vector<1x256xf32>
    %c7_67 = arith.constant 7 : index
    %c256_68 = arith.constant 256 : index
    %88 = vector.load %arg7[%c7_67, %c256_68] : memref<8x1280xf32, #tpu.memory_space<vmem>>, vector<1x256xf32>
    tpu.vector_store %arg7[%c7_67, %c256_68], %87 {strides = array<i32>} : memref<8x1280xf32, #tpu.memory_space<vmem>>, vector<1x256xf32>,
    %89 = vector.extract_strided_slice %14 {offsets = [2, 1792], sizes = [1, 256], strides = [1, 1]} : vector<8x2048xf32> to vector<1x256xf32>
    %c7_69 = arith.constant 7 : index
    %c512_70 = arith.constant 512 : index
    %90 = vector.load %arg7[%c7_69, %c512_70] : memref<8x1280xf32, #tpu.memory_space<vmem>>, vector<1x256xf32>
    tpu.vector_store %arg7[%c7_69, %c512_70], %89 {strides = array<i32>} : memref<8x1280xf32, #tpu.memory_space<vmem>>, vector<1x256xf32>,
    %91 = vector.extract_strided_slice %14 {offsets = [3, 1792], sizes = [1, 256], strides = [1, 1]} : vector<8x2048xf32> to vector<1x256xf32>
    %c7_71 = arith.constant 7 : index
    %c768_72 = arith.constant 768 : index
    %92 = vector.load %arg7[%c7_71, %c768_72] : memref<8x1280xf32, #tpu.memory_space<vmem>>, vector<1x256xf32>
    tpu.vector_store %arg7[%c7_71, %c768_72], %91 {strides = array<i32>} : memref<8x1280xf32, #tpu.memory_space<vmem>>, vector<1x256xf32>,
    %93 = vector.extract_strided_slice %14 {offsets = [4, 1792], sizes = [1, 256], strides = [1, 1]} : vector<8x2048xf32> to vector<1x256xf32>
    %c7_73 = arith.constant 7 : index
    %c1024_74 = arith.constant 1024 : index
    %94 = vector.load %arg7[%c7_73, %c1024_74] : memref<8x1280xf32, #tpu.memory_space<vmem>>, vector<1x256xf32>
    tpu.vector_store %arg7[%c7_73, %c1024_74], %93 {strides = array<i32>} : memref<8x1280xf32, #tpu.memory_space<vmem>>, vector<1x256xf32>,
    %c0_75 = arith.constant 0 : index
    %c0_76 = arith.constant 0 : index
    %95 = vector.load %arg7[%c0_75, %c0_76] : memref<8x1280xf32, #tpu.memory_space<vmem>>, vector<8x1280xf32>
    %c0_77 = arith.constant 0 : index
    %c0_78 = arith.constant 0 : index
    %96 = vector.load %arg4[%c0_77, %c0_78] : memref<1280x128xf32, #tpu.memory_space<vmem>>, vector<1280x128xf32>
    %cst_79 = arith.constant dense<0.000000e+00> : vector<8x128xf32>
    %97 = tpu.matmul %95, %96, %cst_79 {dimension_numbers = #tpu.dot_dimension_numbers<[1], [0], [0], [1], [0, 0, 1, 1], [], []>} : vector<8x1280xf32>, vector<1280x128xf32>, vector<8x128xf32> -> vector<8x128xf32>
    %c0_80 = arith.constant 0 : index
    %c0_81 = arith.constant 0 : index
    %98 = vector.load %arg5[%c0_80, %c0_81] : memref<1x128xf32, #tpu.memory_space<vmem>>, vector<1x128xf32>
    %99 = vector.broadcast %98 : vector<1x128xf32> to vector<8x128xf32>
    %100 = arith.addf %97, %99 : vector<8x128xf32>
    %c0_82 = arith.constant 0 : index
    %c0_83 = arith.constant 0 : index
    %101 = vector.load %arg6[%c0_82, %c0_83] : memref<8x128xf32, #tpu.memory_space<vmem>>, vector<8x128xf32>
    tpu.vector_store %arg6[%c0_82, %c0_83], %100 {strides = array<i32>} : memref<8x128xf32, #tpu.memory_space<vmem>>, vector<8x128xf32>,
    return
  }
  func.func @transform_0(%arg0: i32) -> (i32, i32) {
    %c0_i32 = arith.constant 0 : i32
    %c0_i32_0 = arith.constant 0 : i32
    return %c0_i32, %arg0 : i32, i32
  }
  func.func @transform_1(%arg0: i32) -> (i32, i32) {
    %c0_i32 = arith.constant 0 : i32
    %c0_i32_0 = arith.constant 0 : i32
    %c0_i32_1 = arith.constant 0 : i32
    return %c0_i32, %c0_i32_0 : i32, i32
  }
  func.func @transform_2(%arg0: i32) -> (i32, i32) {
    %c0_i32 = arith.constant 0 : i32
    %c0_i32_0 = arith.constant 0 : i32
    %c0_i32_1 = arith.constant 0 : i32
    return %c0_i32, %c0_i32_0 : i32, i32
  }
  func.func @transform_3(%arg0: i32) -> (i32, i32) {
    %c0_i32 = arith.constant 0 : i32
    %c0_i32_0 = arith.constant 0 : i32
    %c0_i32_1 = arith.constant 0 : i32
    return %c0_i32, %c0_i32_0 : i32, i32
  }
  func.func @transform_4(%arg0: i32) -> (i32, i32) {
    %c0_i32 = arith.constant 0 : i32
    %c0_i32_0 = arith.constant 0 : i32
    %c0_i32_1 = arith.constant 0 : i32
    return %c0_i32, %c0_i32_0 : i32, i32
  }
  func.func @transform_5(%arg0: i32) -> (i32, i32) {
    %c0_i32 = arith.constant 0 : i32
    %c0_i32_0 = arith.constant 0 : i32
    return %arg0, %c0_i32 : i32, i32
  }
}

</mosaic_0001>

<bundles_post_ra>
// kernel: classifier_cnn_forward.1
= control target key start
LH: loop header
LB: loop body
LE: loop exit
PB: predicated region body
PF: predicated region fallthrough
CT: control target
= control target key end

     0   :  { %v5067_v3 = vmov 0   ;;  %vm1942_vm0 = vcmask 654336   ;;  %s6970_s0 = inlined_call_operand.vmem [shape: bf16[80,8192], index: 0, kind: input, shape index: {}]   ;;  %s6971_s1 = inlined_call_operand.vmem [shape: bf16[8,80], index: 1, kind: input, shape index: {}]   ;;  %s6972_s2 = inlined_call_operand.vmem [shape: f32[8,1], index: 2, kind: input, shape index: {}]   ;;  %s6973_s3 = inlined_call_operand.vmem [shape: f32[1280,128], index: 3, kind: input, shape index: {}]   ;;  %s6974_s4 = inlined_call_operand.vmem [shape: f32[1,128], index: 4, kind: input, shape index: {}]   ;;  %s6975_s5 = inlined_call_operand.vmem [shape: f32[8,128], index: 5, kind: output, shape index: {}]  }
   0x1   :  { %v22_v0 = vld [vmem:[%s6970_s0] sm:$0xff]  ;;  %v24_v2 = vld [vmem:[%s6970_s0 + $0x10] sm:$0xff]  ;;  %1978 = vmatprep.mubr.bf16.mxu1 %v5067_v3  ;;  %2060 = vmatprep.mubr.bf16.mxu0 %v5067_v3  ;;  %v23_v39 = vld [vmem:[%s6970_s0 + $0x8] sm:$0xff] }
   0x2   :  { %v54_v1 = vld [vmem:[%s6970_s0 + $0x100] sm:$0xff]  ;;  %v56_v5 = vld [vmem:[%s6970_s0 + $0x110] sm:$0xff]  ;;  %5065 = vset.pattern.permute.xlu0 %v5067_v3  ;;  %v55_v40 = vld [vmem:[%s6970_s0 + $0x108] sm:$0xff] }
   0x3   :  { %v4376_v4 = vcombine.high %v22_v0, %v54_v1  ;;  %v4375_v6 = vcombine.low %v22_v0, %v54_v1  ;;  %v86_v7 = vld [vmem:[%s6970_s0 + $0x200] sm:$0xff]  ;;  %v4380_v9 = vcombine.high %v24_v2, %v56_v5  ;;  %v4379_v10 = vcombine.low %v24_v2, %v56_v5  ;;  %v88_v12 = vld [vmem:[%s6970_s0 + $0x210] sm:$0xff]  ;;  %v87_v47 = vld [vmem:[%s6970_s0 + $0x208] sm:$0xff] }
   0x4   :  { %v118_v8 = vld [vmem:[%s6970_s0 + $0x300] sm:$0xff]  ;;  %v120_v13 = vld [vmem:[%s6970_s0 + $0x310] sm:$0xff]  ;;  %v4378_v45 = vcombine.high %v23_v39, %v55_v40  ;;  %v119_v48 = vld [vmem:[%s6970_s0 + $0x308] sm:$0xff]  ;;  %v4377_v52 = vcombine.low %v23_v39, %v55_v40 }
   0x5   :  { %v4440_v11 = vcombine.high %v86_v7, %v118_v8  ;;  %v150_v14 = vld [vmem:[%s6970_s0 + $0x400] sm:$0xff]  ;;  %1946 = vmatprep.subr.bf16.mxu1 %v4376_v4  ;;  %v4444_v15 = vcombine.high %v88_v12, %v120_v13  ;;  %v152_v17 = vld [vmem:[%s6970_s0 + $0x410] sm:$0xff]  ;;  %2028 = vmatprep.subr.bf16.mxu0 %v4380_v9  ;;  %v4439_v19 = vcombine.low %v86_v7, %v118_v8  ;;  %v151_v56 = vld [vmem:[%s6970_s0 + $0x408] sm:$0xff] }
   0x6   :  { %v182_v16 = vld [vmem:[%s6970_s0 + $0x500] sm:$0xff]  ;;  %v184_v18 = vld [vmem:[%s6970_s0 + $0x510] sm:$0xff]  ;;  %1947 = vmatpush1.bf16.msra.mxu1 %v4375_v6  ;;  %2029 = vmatpush1.bf16.msra.mxu0 %v4379_v10  ;;  %v4443_v20 = vcombine.low %v88_v12, %v120_v13  ;;  %v4442_v54 = vcombine.high %v87_v47, %v119_v48  ;;  %v183_v57 = vld [vmem:[%s6970_s0 + $0x508] sm:$0xff]  ;;  %v4441_v60 = vcombine.low %v87_v47, %v119_v48 }
   0x7   :  { %1948 = vmatprep.subr.bf16.mxu1 %v4440_v11  ;;  %v4504_v21 = vcombine.high %v150_v14, %v182_v16  ;;  %2030 = vmatprep.subr.bf16.mxu0 %v4444_v15  ;;  %v4508_v22 = vcombine.high %v152_v17, %v184_v18  ;;  %v214_v23 = vld [vmem:[%s6970_s0 + $0x600] sm:$0xff]  ;;  %v216_v25 = vld [vmem:[%s6970_s0 + $0x610] sm:$0xff]  ;;  %v4503_v27 = vcombine.low %v150_v14, %v182_v16  ;;  %v215_v0 = vld [vmem:[%s6970_s0 + $0x608] sm:$0xff] }
   0x8   :  { %v246_v24 = vld [vmem:[%s6970_s0 + $0x700] sm:$0xff]  ;;  %v248_v26 = vld [vmem:[%s6970_s0 + $0x710] sm:$0xff]  ;;  %v4507_v28 = vcombine.low %v152_v17, %v184_v18  ;;  %v4506_v62 = vcombine.high %v151_v56, %v183_v57  ;;  %v247_v1 = vld [vmem:[%s6970_s0 + $0x708] sm:$0xff]  ;;  %v4505_v5 = vcombine.low %v151_v56, %v183_v57 }
   0x9   :  { %v4568_v29 = vcombine.high %v214_v23, %v246_v24  ;;  %v4572_v30 = vcombine.high %v216_v25, %v248_v26  ;;  %v278_v31 = vld [vmem:[%s6970_s0 + $0x800] sm:$0xff]  ;;  %v280_v33 = vld [vmem:[%s6970_s0 + $0x810] sm:$0xff]  ;;  %v4567_v35 = vcombine.low %v214_v23, %v246_v24  ;;  %v4571_v36 = vcombine.low %v216_v25, %v248_v26  ;;  %v279_v9 = vld [vmem:[%s6970_s0 + $0x808] sm:$0xff] }
   0xa   :  { %1949 = vmatpush1.bf16.msra.mxu1 %v4439_v19  ;;  %2031 = vmatpush1.bf16.msra.mxu0 %v4443_v20  ;;  %v310_v32 = vld [vmem:[%s6970_s0 + $0x900] sm:$0xff]  ;;  %v312_v34 = vld [vmem:[%s6970_s0 + $0x910] sm:$0xff]  ;;  %v4570_v7 = vcombine.high %v215_v0, %v247_v1  ;;  %v311_v10 = vld [vmem:[%s6970_s0 + $0x908] sm:$0xff]  ;;  %v4569_v13 = vcombine.low %v215_v0, %v247_v1 }
   0xb   :  { %1950 = vmatprep.subr.bf16.mxu1 %v4504_v21  ;;  %2032 = vmatprep.subr.bf16.mxu0 %v4508_v22  ;;  %v4632_v37 = vcombine.high %v278_v31, %v310_v32  ;;  %v4636_v38 = vcombine.high %v280_v33, %v312_v34  ;;  %v26_v41 = vld [vmem:[%s6970_s0 + $0x20] sm:$0xff]  ;;  %v4631_v43 = vcombine.low %v278_v31, %v310_v32  ;;  %v25_v17 = vld [vmem:[%s6970_s0 + $0x18] sm:$0xff]  ;;  %v28_v19 = vld [vmem:[%s6970_s0 + $0x30] sm:$0xff] }
   0xc   :  { %v58_v42 = vld [vmem:[%s6970_s0 + $0x120] sm:$0xff]  ;;  %v4635_v44 = vcombine.low %v280_v33, %v312_v34  ;;  %v4634_v15 = vcombine.high %v279_v9, %v311_v10  ;;  %v57_v18 = vld [vmem:[%s6970_s0 + $0x118] sm:$0xff]  ;;  %v60_v20 = vld [vmem:[%s6970_s0 + $0x130] sm:$0xff]  ;;  %v4633_v21 = vcombine.low %v279_v9, %v311_v10 }
   0xd   :  { %v4384_v46 = vcombine.high %v26_v41, %v58_v42  ;;  %v90_v49 = vld [vmem:[%s6970_s0 + $0x220] sm:$0xff]  ;;  %v4383_v53 = vcombine.low %v26_v41, %v58_v42  ;;  %v4382_v23 = vcombine.high %v25_v17, %v57_v18  ;;  %v4388_v24 = vcombine.high %v28_v19, %v60_v20  ;;  %v89_v25 = vld [vmem:[%s6970_s0 + $0x218] sm:$0xff] }
   0xe   :  { %1951 = vmatpush1.bf16.msra.mxu1 %v4503_v27  ;;  %2033 = vmatpush1.bf16.msra.mxu0 %v4507_v28  ;;  %v122_v50 = vld [vmem:[%s6970_s0 + $0x320] sm:$0xff]  ;;  %v121_v26 = vld [vmem:[%s6970_s0 + $0x318] sm:$0xff]  ;;  %v92_v27 = vld [vmem:[%s6970_s0 + $0x230] sm:$0xff] }
   0xf   :  { %1952 = vmatprep.subr.bf16.mxu1 %v4568_v29  ;;  %2034 = vmatprep.subr.bf16.mxu0 %v4572_v30  ;;  %v5189_v51 = vld [vmem:[%s6971_s1] sm:$0xf]  ;;  %v4448_v55 = vcombine.high %v90_v49, %v122_v50  ;;  %v4447_v61 = vcombine.low %v90_v49, %v122_v50  ;;  %v124_v28 = vld [vmem:[%s6970_s0 + $0x330] sm:$0xff]  ;;  %v4381_v29 = vcombine.low %v25_v17, %v57_v18  ;;  %v153_v33 = vld [vmem:[%s6970_s0 + $0x418] sm:$0xff] }
  0x10   :  { %v154_v58 = vld [vmem:[%s6970_s0 + $0x420] sm:$0xff]  ;;  %v4387_v30 = vcombine.low %v28_v19, %v60_v20  ;;  %v4446_v31 = vcombine.high %v89_v25, %v121_v26  ;;  %v4452_v32 = vcombine.high %v92_v27, %v124_v28  ;;  %v185_v34 = vld [vmem:[%s6970_s0 + $0x518] sm:$0xff]  ;;  %v219_v19 = vld [vmem:[%s6970_s0 + $0x628] sm:$0xff] }
  0x11   :  { %v186_v59 = vld [vmem:[%s6970_s0 + $0x520] sm:$0xff]  ;;  %v4510_v39 = vcombine.high %v153_v33, %v185_v34  ;;  %v217_v41 = vld [vmem:[%s6970_s0 + $0x618] sm:$0xff]  ;;  %v251_v20 = vld [vmem:[%s6970_s0 + $0x728] sm:$0xff] }
  0x12   :  { %1953 = vmatpush1.bf16.msra.mxu1 %v4567_v35  ;;  %2035 = vmatpush1.bf16.msra.mxu0 %v4571_v36  ;;  %v4512_v63 = vcombine.high %v154_v58, %v186_v59  ;;  %v218_v2 = vld [vmem:[%s6970_s0 + $0x620] sm:$0xff]  ;;  %v4511_v6 = vcombine.low %v154_v58, %v186_v59  ;;  %v156_v35 = vld [vmem:[%s6970_s0 + $0x430] sm:$0xff]  ;;  %v249_v42 = vld [vmem:[%s6970_s0 + $0x718] sm:$0xff] }
  0x13   :  { %1954 = vmatprep.subr.bf16.mxu1 %v4632_v37  ;;  %2036 = vmatprep.subr.bf16.mxu0 %v4636_v38  ;;  %v250_v4 = vld [vmem:[%s6970_s0 + $0x720] sm:$0xff]  ;;  %v188_v36 = vld [vmem:[%s6970_s0 + $0x530] sm:$0xff]  ;;  %v4445_v37 = vcombine.low %v89_v25, %v121_v26  ;;  %v4451_v38 = vcombine.low %v92_v27, %v124_v28  ;;  %v4574_v47 = vcombine.high %v217_v41, %v249_v42  ;;  %v281_v49 = vld [vmem:[%s6970_s0 + $0x818] sm:$0xff] }
  0x14   :  { %v4576_v8 = vcombine.high %v218_v2, %v250_v4  ;;  %v282_v11 = vld [vmem:[%s6970_s0 + $0x820] sm:$0xff]  ;;  %v4575_v14 = vcombine.low %v218_v2, %v250_v4  ;;  %v4516_v40 = vcombine.high %v156_v35, %v188_v36  ;;  %v313_v50 = vld [vmem:[%s6970_s0 + $0x918] sm:$0xff]  ;;  %v27_v58 = vld [vmem:[%s6970_s0 + $0x28] sm:$0xff]  ;;  %v4578_v25 = vcombine.high %v219_v19, %v251_v20 }
  0x15   :  { %v314_v12 = vld [vmem:[%s6970_s0 + $0x920] sm:$0xff]  ;;  %v4638_v56 = vcombine.high %v281_v49, %v313_v50  ;;  %v59_v59 = vld [vmem:[%s6970_s0 + $0x128] sm:$0xff] }
  0x16   :  { %1955 = vmatpush1.bf16.msra.mxu1 %v4631_v43  ;;  %2037 = vmatpush1.bf16.msra.mxu0 %v4635_v44  ;;  %v4640_v16 = vcombine.high %v282_v11, %v314_v12  ;;  %v4639_v22 = vcombine.low %v282_v11, %v314_v12  ;;  %v220_v43 = vld [vmem:[%s6970_s0 + $0x630] sm:$0xff]  ;;  %v4386_v0 = vcombine.high %v27_v58, %v59_v59  ;;  %v91_v2 = vld [vmem:[%s6970_s0 + $0x228] sm:$0xff] }
  0x17   :  { %1987 = vmatprep.subr.bf16.mxu1 %v4378_v45  ;;  %2110 = vmatprep.subr.bf16.mxu0 %v4384_v46  ;;  %v252_v44 = vld [vmem:[%s6970_s0 + $0x730] sm:$0xff]  ;;  %v4509_v45 = vcombine.low %v153_v33, %v185_v34  ;;  %v4515_v46 = vcombine.low %v156_v35, %v188_v36  ;;  %v123_v4 = vld [vmem:[%s6970_s0 + $0x328] sm:$0xff]  ;;  %v29_v35 = vld [vmem:[%s6970_s0 + $0x38] sm:$0xff] }
  0x18   :  { %v4580_v48 = vcombine.high %v220_v43, %v252_v44  ;;  %v4450_v9 = vcombine.high %v91_v2, %v123_v4  ;;  %v155_v11 = vld [vmem:[%s6970_s0 + $0x428] sm:$0xff]  ;;  %v61_v36 = vld [vmem:[%s6970_s0 + $0x138] sm:$0xff] }
  0x19   :  { %4695 = vmatmul.mubr.msk.bf16.vlgmr.msra.gmra.mrb[0].mxu1 %vm1942_vm0, %v5189_v51  ;;  %4697 = vmatmul.mubr.msk.bf16.vlgmr.msra.gmra.mrb[0].mxu0 %vm1942_vm0, %v5189_v51  ;;  %v187_v12 = vld [vmem:[%s6970_s0 + $0x528] sm:$0xff] }
  0x1a   :  { %1988 = vmatpush1.bf16.msra.mxu1 %v4377_v52  ;;  %2111 = vmatpush1.bf16.msra.mxu0 %v4383_v53  ;;  %v284_v52 = vld [vmem:[%s6970_s0 + $0x830] sm:$0xff]  ;;  %v4514_v17 = vcombine.high %v155_v11, %v187_v12  ;;  %v283_v27 = vld [vmem:[%s6970_s0 + $0x828] sm:$0xff] }
  0x1b   :  { %1989 = vmatprep.subr.bf16.mxu1 %v4442_v54  ;;  %2112 = vmatprep.subr.bf16.mxu0 %v4448_v55  ;;  %v316_v53 = vld [vmem:[%s6970_s0 + $0x930] sm:$0xff]  ;;  %v4573_v54 = vcombine.low %v217_v41, %v249_v42  ;;  %v4579_v55 = vcombine.low %v220_v43, %v252_v44  ;;  %v315_v28 = vld [vmem:[%s6970_s0 + $0x928] sm:$0xff]  ;;  %v4390_v41 = vcombine.high %v29_v35, %v61_v36  ;;  %v93_v43 = vld [vmem:[%s6970_s0 + $0x238] sm:$0xff] }
  0x1c   :  { %2019 = vmatprep.mubr.bf16.mxu1 %v5067_v3  ;;  %2142 = vmatprep.mubr.bf16.mxu0 %v5067_v3  ;;  %v4644_v57 = vcombine.high %v284_v52, %v316_v53  ;;  %v4642_v33 = vcombine.high %v283_v27, %v315_v28  ;;  %v125_v44 = vld [vmem:[%s6970_s0 + $0x338] sm:$0xff] }
  0x1e   :  { %1990 = vmatpush1.bf16.msra.mxu1 %v4441_v60  ;;  %2113 = vmatpush1.bf16.msra.mxu0 %v4447_v61  ;;  %v30_v60 = vld [vmem:[%s6970_s0 + $0x40] sm:$0xff] }
  0x1f   :  { %1991 = vmatprep.subr.bf16.mxu1 %v4506_v62  ;;  %2114 = vmatprep.subr.bf16.mxu0 %v4512_v63  ;;  %v62_v61 = vld [vmem:[%s6970_s0 + $0x140] sm:$0xff]  ;;  %v4637_v62 = vcombine.low %v281_v49, %v313_v50  ;;  %v4643_v63 = vcombine.low %v284_v52, %v316_v53  ;;  %v4454_v49 = vcombine.high %v93_v43, %v125_v44  ;;  %v157_v52 = vld [vmem:[%s6970_s0 + $0x438] sm:$0xff] }
  0x20   :  { %v4392_v1 = vcombine.high %v30_v60, %v62_v61  ;;  %v189_v53 = vld [vmem:[%s6970_s0 + $0x538] sm:$0xff] }
  0x22   :  { %1992 = vmatpush1.bf16.msra.mxu1 %v4505_v5  ;;  %2115 = vmatpush1.bf16.msra.mxu0 %v4511_v6  ;;  %v94_v5 = vld [vmem:[%s6970_s0 + $0x240] sm:$0xff] }
  0x23   :  { %1993 = vmatprep.subr.bf16.mxu1 %v4570_v7  ;;  %2116 = vmatprep.subr.bf16.mxu0 %v4576_v8  ;;  %v126_v6 = vld [vmem:[%s6970_s0 + $0x340] sm:$0xff]  ;;  %v4385_v7 = vcombine.low %v27_v58, %v59_v59  ;;  %v4391_v8 = vcombine.low %v30_v60, %v62_v61  ;;  %v4518_v58 = vcombine.high %v157_v52, %v189_v53  ;;  %v221_v60 = vld [vmem:[%s6970_s0 + $0x638] sm:$0xff] }
  0x24   :  { %v4456_v10 = vcombine.high %v94_v5, %v126_v6  ;;  %v253_v61 = vld [vmem:[%s6970_s0 + $0x738] sm:$0xff] }
  0x26   :  { %1994 = vmatpush1.bf16.msra.mxu1 %v4569_v13  ;;  %2117 = vmatpush1.bf16.msra.mxu0 %v4575_v14  ;;  %v158_v13 = vld [vmem:[%s6970_s0 + $0x440] sm:$0xff] }
  0x27   :  { %1995 = vmatprep.subr.bf16.mxu1 %v4634_v15  ;;  %2118 = vmatprep.subr.bf16.mxu0 %v4640_v16  ;;  %v190_v14 = vld [vmem:[%s6970_s0 + $0x540] sm:$0xff]  ;;  %v4449_v15 = vcombine.low %v91_v2, %v123_v4  ;;  %v4455_v16 = vcombine.low %v94_v5, %v126_v6  ;;  %v4582_v2 = vcombine.high %v221_v60, %v253_v61  ;;  %v285_v5 = vld [vmem:[%s6970_s0 + $0x838] sm:$0xff] }
  0x28   :  { %v4520_v18 = vcombine.high %v158_v13, %v190_v14  ;;  %v317_v6 = vld [vmem:[%s6970_s0 + $0x938] sm:$0xff] }
  0x2a   :  { %1996 = vmatpush1.bf16.msra.mxu1 %v4633_v21  ;;  %2119 = vmatpush1.bf16.msra.mxu0 %v4639_v22  ;;  %v222_v21 = vld [vmem:[%s6970_s0 + $0x640] sm:$0xff] }
  0x2b   :  { %2069 = vmatprep.subr.bf16.mxu1 %v4382_v23  ;;  %2192 = vmatprep.subr.bf16.mxu0 %v4388_v24  ;;  %v254_v22 = vld [vmem:[%s6970_s0 + $0x740] sm:$0xff]  ;;  %v4513_v23 = vcombine.low %v155_v11, %v187_v12  ;;  %v4519_v24 = vcombine.low %v158_v13, %v190_v14  ;;  %v4646_v11 = vcombine.high %v285_v5, %v317_v6  ;;  %v31_v13 = vld [vmem:[%s6970_s0 + $0x48] sm:$0xff] }
  0x2c   :  { %v4584_v26 = vcombine.high %v222_v21, %v254_v22  ;;  %v63_v14 = vld [vmem:[%s6970_s0 + $0x148] sm:$0xff] }
  0x2d   :  { %4696 = vmatmul.mubr.msk.bf16.vlgmr.msra.gmra.mrb[4].mxu1 %vm1942_vm0, %v5189_v51  ;;  %4699 = vmatmul.mubr.msk.bf16.vlgmr.msra.gmra.mrb[4].mxu0 %vm1942_vm0, %v5189_v51 }
  0x2e   :  { %2070 = vmatpush1.bf16.msra.mxu1 %v4381_v29  ;;  %2193 = vmatpush1.bf16.msra.mxu0 %v4387_v30  ;;  %v286_v29 = vld [vmem:[%s6970_s0 + $0x840] sm:$0xff] }
  0x2f   :  { %2071 = vmatprep.subr.bf16.mxu1 %v4446_v31  ;;  %2194 = vmatprep.subr.bf16.mxu0 %v4452_v32  ;;  %v318_v30 = vld [vmem:[%s6970_s0 + $0x940] sm:$0xff]  ;;  %v4577_v31 = vcombine.low %v219_v19, %v251_v20  ;;  %v4583_v32 = vcombine.low %v222_v21, %v254_v22  ;;  %v4394_v19 = vcombine.high %v31_v13, %v63_v14  ;;  %v95_v21 = vld [vmem:[%s6970_s0 + $0x248] sm:$0xff] }
  0x30   :  { %2101 = vmatprep.mubr.bf16.mxu1 %v5067_v3  ;;  %2224 = vmatprep.mubr.bf16.mxu0 %v5067_v3  ;;  %v4648_v34 = vcombine.high %v286_v29, %v318_v30  ;;  %v127_v22 = vld [vmem:[%s6970_s0 + $0x348] sm:$0xff] }
  0x32   :  { %2072 = vmatpush1.bf16.msra.mxu1 %v4445_v37  ;;  %2195 = vmatpush1.bf16.msra.mxu0 %v4451_v38  ;;  %v32_v37 = vld [vmem:[%s6970_s0 + $0x50] sm:$0xff] }
  0x33   :  { %2073 = vmatprep.subr.bf16.mxu1 %v4510_v39  ;;  %2196 = vmatprep.subr.bf16.mxu0 %v4516_v40  ;;  %v64_v38 = vld [vmem:[%s6970_s0 + $0x150] sm:$0xff]  ;;  %v4641_v39 = vcombine.low %v283_v27, %v315_v28  ;;  %v4647_v40 = vcombine.low %v286_v29, %v318_v30  ;;  %v4458_v27 = vcombine.high %v95_v21, %v127_v22  ;;  %v159_v29 = vld [vmem:[%s6970_s0 + $0x448] sm:$0xff] }
  0x34   :  { %v4396_v42 = vcombine.high %v32_v37, %v64_v38  ;;  %v191_v30 = vld [vmem:[%s6970_s0 + $0x548] sm:$0xff] }
  0x36   :  { %2074 = vmatpush1.bf16.msra.mxu1 %v4509_v45  ;;  %2197 = vmatpush1.bf16.msra.mxu0 %v4515_v46  ;;  %v96_v45 = vld [vmem:[%s6970_s0 + $0x250] sm:$0xff] }
  0x37   :  { %2075 = vmatprep.subr.bf16.mxu1 %v4574_v47  ;;  %2198 = vmatprep.subr.bf16.mxu0 %v4580_v48  ;;  %v128_v46 = vld [vmem:[%s6970_s0 + $0x350] sm:$0xff]  ;;  %v4389_v47 = vcombine.low %v29_v35, %v61_v36  ;;  %v4395_v48 = vcombine.low %v32_v37, %v64_v38  ;;  %v4522_v35 = vcombine.high %v159_v29, %v191_v30  ;;  %v223_v37 = vld [vmem:[%s6970_s0 + $0x648] sm:$0xff] }
  0x38   :  { %v4460_v50 = vcombine.high %v96_v45, %v128_v46  ;;  %v255_v38 = vld [vmem:[%s6970_s0 + $0x748] sm:$0xff] }
  0x3a   :  { %2076 = vmatpush1.bf16.msra.mxu1 %v4573_v54  ;;  %2199 = vmatpush1.bf16.msra.mxu0 %v4579_v55  ;;  %v160_v54 = vld [vmem:[%s6970_s0 + $0x450] sm:$0xff] }
  0x3b   :  { %2077 = vmatprep.subr.bf16.mxu1 %v4638_v56  ;;  %2200 = vmatprep.subr.bf16.mxu0 %v4644_v57  ;;  %v192_v55 = vld [vmem:[%s6970_s0 + $0x550] sm:$0xff]  ;;  %v4453_v56 = vcombine.low %v93_v43, %v125_v44  ;;  %v4459_v57 = vcombine.low %v96_v45, %v128_v46  ;;  %v4586_v43 = vcombine.high %v223_v37, %v255_v38  ;;  %v287_v45 = vld [vmem:[%s6970_s0 + $0x848] sm:$0xff] }
  0x3c   :  { %v4524_v59 = vcombine.high %v160_v54, %v192_v55  ;;  %v319_v46 = vld [vmem:[%s6970_s0 + $0x948] sm:$0xff] }
  0x3e   :  { %2078 = vmatpush1.bf16.msra.mxu1 %v4637_v62  ;;  %2201 = vmatpush1.bf16.msra.mxu0 %v4643_v63  ;;  %v224_v62 = vld [vmem:[%s6970_s0 + $0x650] sm:$0xff] }
  0x3f   :  { %2151 = vmatprep.subr.bf16.mxu1 %v4386_v0  ;;  %2274 = vmatprep.subr.bf16.mxu0 %v4392_v1  ;;  %v256_v63 = vld [vmem:[%s6970_s0 + $0x750] sm:$0xff]  ;;  %v4517_v0 = vcombine.low %v157_v52, %v189_v53  ;;  %v4523_v1 = vcombine.low %v160_v54, %v192_v55  ;;  %v4650_v52 = vcombine.high %v287_v45, %v319_v46  ;;  %v33_v54 = vld [vmem:[%s6970_s0 + $0x58] sm:$0xff] }
  0x40   :  { %v4588_v4 = vcombine.high %v224_v62, %v256_v63  ;;  %v65_v55 = vld [vmem:[%s6970_s0 + $0x158] sm:$0xff] }
  0x41   :  { %4698 = vmatmul.mubr.msk.bf16.vlgmr.msra.gmra.mrb[8].mxu1 %vm1942_vm0, %v5189_v51  ;;  %4701 = vmatmul.mubr.msk.bf16.vlgmr.msra.gmra.mrb[8].mxu0 %vm1942_vm0, %v5189_v51 }
  0x42   :  { %2152 = vmatpush1.bf16.msra.mxu1 %v4385_v7  ;;  %2275 = vmatpush1.bf16.msra.mxu0 %v4391_v8  ;;  %v288_v7 = vld [vmem:[%s6970_s0 + $0x850] sm:$0xff] }
  0x43   :  { %2153 = vmatprep.subr.bf16.mxu1 %v4450_v9  ;;  %2276 = vmatprep.subr.bf16.mxu0 %v4456_v10  ;;  %v320_v8 = vld [vmem:[%s6970_s0 + $0x950] sm:$0xff]  ;;  %v4581_v9 = vcombine.low %v221_v60, %v253_v61  ;;  %v4587_v10 = vcombine.low %v224_v62, %v256_v63  ;;  %v4398_v60 = vcombine.high %v33_v54, %v65_v55  ;;  %v97_v62 = vld [vmem:[%s6970_s0 + $0x258] sm:$0xff] }
  0x44   :  { %2183 = vmatprep.mubr.bf16.mxu1 %v5067_v3  ;;  %2306 = vmatprep.mubr.bf16.mxu0 %v5067_v3  ;;  %v4652_v12 = vcombine.high %v288_v7, %v320_v8  ;;  %v129_v63 = vld [vmem:[%s6970_s0 + $0x358] sm:$0xff] }
  0x46   :  { %2154 = vmatpush1.bf16.msra.mxu1 %v4449_v15  ;;  %2277 = vmatpush1.bf16.msra.mxu0 %v4455_v16  ;;  %v34_v15 = vld [vmem:[%s6970_s0 + $0x60] sm:$0xff] }
  0x47   :  { %2155 = vmatprep.subr.bf16.mxu1 %v4514_v17  ;;  %2278 = vmatprep.subr.bf16.mxu0 %v4520_v18  ;;  %v66_v16 = vld [vmem:[%s6970_s0 + $0x160] sm:$0xff]  ;;  %v4645_v17 = vcombine.low %v285_v5, %v317_v6  ;;  %v4651_v18 = vcombine.low %v288_v7, %v320_v8  ;;  %v4462_v5 = vcombine.high %v97_v62, %v129_v63  ;;  %v161_v7 = vld [vmem:[%s6970_s0 + $0x458] sm:$0xff] }
  0x48   :  { %v4400_v20 = vcombine.high %v34_v15, %v66_v16  ;;  %v193_v8 = vld [vmem:[%s6970_s0 + $0x558] sm:$0xff] }
  0x4a   :  { %2156 = vmatpush1.bf16.msra.mxu1 %v4513_v23  ;;  %2279 = vmatpush1.bf16.msra.mxu0 %v4519_v24  ;;  %v98_v23 = vld [vmem:[%s6970_s0 + $0x260] sm:$0xff] }
  0x4b   :  { %2157 = vmatprep.subr.bf16.mxu1 %v4578_v25  ;;  %2280 = vmatprep.subr.bf16.mxu0 %v4584_v26  ;;  %v130_v24 = vld [vmem:[%s6970_s0 + $0x360] sm:$0xff]  ;;  %v4393_v25 = vcombine.low %v31_v13, %v63_v14  ;;  %v4399_v26 = vcombine.low %v34_v15, %v66_v16  ;;  %v4526_v13 = vcombine.high %v161_v7, %v193_v8  ;;  %v225_v15 = vld [vmem:[%s6970_s0 + $0x658] sm:$0xff] }
  0x4c   :  { %v4464_v28 = vcombine.high %v98_v23, %v130_v24  ;;  %v257_v16 = vld [vmem:[%s6970_s0 + $0x758] sm:$0xff] }
  0x4e   :  { %2158 = vmatpush1.bf16.msra.mxu1 %v4577_v31  ;;  %2281 = vmatpush1.bf16.msra.mxu0 %v4583_v32  ;;  %v162_v31 = vld [vmem:[%s6970_s0 + $0x460] sm:$0xff] }
  0x4f   :  { %2159 = vmatprep.subr.bf16.mxu1 %v4642_v33  ;;  %2282 = vmatprep.subr.bf16.mxu0 %v4648_v34  ;;  %v194_v32 = vld [vmem:[%s6970_s0 + $0x560] sm:$0xff]  ;;  %v4457_v33 = vcombine.low %v95_v21, %v127_v22  ;;  %v4463_v34 = vcombine.low %v98_v23, %v130_v24  ;;  %v4590_v21 = vcombine.high %v225_v15, %v257_v16  ;;  %v289_v23 = vld [vmem:[%s6970_s0 + $0x858] sm:$0xff] }
  0x50   :  { %v4528_v36 = vcombine.high %v162_v31, %v194_v32  ;;  %v321_v24 = vld [vmem:[%s6970_s0 + $0x958] sm:$0xff] }
  0x52   :  { %2160 = vmatpush1.bf16.msra.mxu1 %v4641_v39  ;;  %2283 = vmatpush1.bf16.msra.mxu0 %v4647_v40  ;;  %v226_v39 = vld [vmem:[%s6970_s0 + $0x660] sm:$0xff] }
  0x53   :  { %2233 = vmatprep.subr.bf16.mxu1 %v4390_v41  ;;  %2356 = vmatprep.subr.bf16.mxu0 %v4396_v42  ;;  %v258_v40 = vld [vmem:[%s6970_s0 + $0x760] sm:$0xff]  ;;  %v4521_v41 = vcombine.low %v159_v29, %v191_v30  ;;  %v4527_v42 = vcombine.low %v162_v31, %v194_v32  ;;  %v4654_v29 = vcombine.high %v289_v23, %v321_v24  ;;  %v35_v31 = vld [vmem:[%s6970_s0 + $0x68] sm:$0xff] }
  0x54   :  { %v4592_v44 = vcombine.high %v226_v39, %v258_v40  ;;  %v67_v32 = vld [vmem:[%s6970_s0 + $0x168] sm:$0xff] }
  0x55   :  { %4700 = vmatmul.mubr.msk.bf16.vlgmr.msra.gmra.mrb[12].mxu1 %vm1942_vm0, %v5189_v51  ;;  %4703 = vmatmul.mubr.msk.bf16.vlgmr.msra.gmra.mrb[12].mxu0 %vm1942_vm0, %v5189_v51 }
  0x56   :  { %2234 = vmatpush1.bf16.msra.mxu1 %v4389_v47  ;;  %2357 = vmatpush1.bf16.msra.mxu0 %v4395_v48  ;;  %v290_v47 = vld [vmem:[%s6970_s0 + $0x860] sm:$0xff] }
  0x57   :  { %2235 = vmatprep.subr.bf16.mxu1 %v4454_v49  ;;  %2358 = vmatprep.subr.bf16.mxu0 %v4460_v50  ;;  %v322_v48 = vld [vmem:[%s6970_s0 + $0x960] sm:$0xff]  ;;  %v4585_v49 = vcombine.low %v223_v37, %v255_v38  ;;  %v4591_v50 = vcombine.low %v226_v39, %v258_v40  ;;  %v4402_v37 = vcombine.high %v35_v31, %v67_v32  ;;  %v99_v39 = vld [vmem:[%s6970_s0 + $0x268] sm:$0xff] }
  0x58   :  { %2265 = vmatprep.mubr.bf16.mxu1 %v5067_v3  ;;  %2388 = vmatprep.mubr.bf16.mxu0 %v5067_v3  ;;  %v4656_v53 = vcombine.high %v290_v47, %v322_v48  ;;  %v131_v40 = vld [vmem:[%s6970_s0 + $0x368] sm:$0xff] }
  0x5a   :  { %2236 = vmatpush1.bf16.msra.mxu1 %v4453_v56  ;;  %2359 = vmatpush1.bf16.msra.mxu0 %v4459_v57  ;;  %v36_v56 = vld [vmem:[%s6970_s0 + $0x70] sm:$0xff] }
  0x5b   :  { %2237 = vmatprep.subr.bf16.mxu1 %v4518_v58  ;;  %2360 = vmatprep.subr.bf16.mxu0 %v4524_v59  ;;  %v68_v57 = vld [vmem:[%s6970_s0 + $0x170] sm:$0xff]  ;;  %v4649_v58 = vcombine.low %v287_v45, %v319_v46  ;;  %v4655_v59 = vcombine.low %v290_v47, %v322_v48  ;;  %v4466_v45 = vcombine.high %v99_v39, %v131_v40  ;;  %v163_v47 = vld [vmem:[%s6970_s0 + $0x468] sm:$0xff] }
  0x5c   :  { %v4404_v61 = vcombine.high %v36_v56, %v68_v57  ;;  %v195_v48 = vld [vmem:[%s6970_s0 + $0x568] sm:$0xff] }
  0x5e   :  { %2238 = vmatpush1.bf16.msra.mxu1 %v4517_v0  ;;  %2361 = vmatpush1.bf16.msra.mxu0 %v4523_v1  ;;  %v100_v0 = vld [vmem:[%s6970_s0 + $0x270] sm:$0xff] }
  0x5f   :  { %2239 = vmatprep.subr.bf16.mxu1 %v4582_v2  ;;  %2362 = vmatprep.subr.bf16.mxu0 %v4588_v4  ;;  %v132_v1 = vld [vmem:[%s6970_s0 + $0x370] sm:$0xff]  ;;  %v4397_v2 = vcombine.low %v33_v54, %v65_v55  ;;  %v4403_v4 = vcombine.low %v36_v56, %v68_v57  ;;  %v4530_v54 = vcombine.high %v163_v47, %v195_v48  ;;  %v227_v56 = vld [vmem:[%s6970_s0 + $0x668] sm:$0xff] }
  0x60   :  { %v4468_v6 = vcombine.high %v100_v0, %v132_v1  ;;  %v259_v57 = vld [vmem:[%s6970_s0 + $0x768] sm:$0xff] }
  0x62   :  { %2240 = vmatpush1.bf16.msra.mxu1 %v4581_v9  ;;  %2363 = vmatpush1.bf16.msra.mxu0 %v4587_v10  ;;  %v164_v9 = vld [vmem:[%s6970_s0 + $0x470] sm:$0xff] }
  0x63   :  { %2241 = vmatprep.subr.bf16.mxu1 %v4646_v11  ;;  %2364 = vmatprep.subr.bf16.mxu0 %v4652_v12  ;;  %v196_v10 = vld [vmem:[%s6970_s0 + $0x570] sm:$0xff]  ;;  %v4461_v11 = vcombine.low %v97_v62, %v129_v63  ;;  %v4467_v12 = vcombine.low %v100_v0, %v132_v1  ;;  %v4594_v62 = vcombine.high %v227_v56, %v259_v57  ;;  %v291_v0 = vld [vmem:[%s6970_s0 + $0x868] sm:$0xff] }
  0x64   :  { %v4532_v14 = vcombine.high %v164_v9, %v196_v10  ;;  %v323_v1 = vld [vmem:[%s6970_s0 + $0x968] sm:$0xff] }
  0x66   :  { %2242 = vmatpush1.bf16.msra.mxu1 %v4645_v17  ;;  %2365 = vmatpush1.bf16.msra.mxu0 %v4651_v18  ;;  %v228_v17 = vld [vmem:[%s6970_s0 + $0x670] sm:$0xff] }
  0x67   :  { %2315 = vmatprep.subr.bf16.mxu1 %v4394_v19  ;;  %2438 = vmatprep.subr.bf16.mxu0 %v4400_v20  ;;  %v260_v18 = vld [vmem:[%s6970_s0 + $0x770] sm:$0xff]  ;;  %v4525_v19 = vcombine.low %v161_v7, %v193_v8  ;;  %v4531_v20 = vcombine.low %v164_v9, %v196_v10  ;;  %v4658_v7 = vcombine.high %v291_v0, %v323_v1  ;;  %v37_v9 = vld [vmem:[%s6970_s0 + $0x78] sm:$0xff] }
  0x68   :  { %v4596_v22 = vcombine.high %v228_v17, %v260_v18  ;;  %v69_v10 = vld [vmem:[%s6970_s0 + $0x178] sm:$0xff] }
  0x69   :  { %4702 = vmatmul.mubr.msk.bf16.vlgmr.msra.gmra.mrb[16].mxu1 %vm1942_vm0, %v5189_v51  ;;  %4705 = vmatmul.mubr.msk.bf16.vlgmr.msra.gmra.mrb[16].mxu0 %vm1942_vm0, %v5189_v51 }
  0x6a   :  { %2316 = vmatpush1.bf16.msra.mxu1 %v4393_v25  ;;  %2439 = vmatpush1.bf16.msra.mxu0 %v4399_v26  ;;  %v292_v25 = vld [vmem:[%s6970_s0 + $0x870] sm:$0xff] }
  0x6b   :  { %2317 = vmatprep.subr.bf16.mxu1 %v4458_v27  ;;  %2440 = vmatprep.subr.bf16.mxu0 %v4464_v28  ;;  %v324_v26 = vld [vmem:[%s6970_s0 + $0x970] sm:$0xff]  ;;  %v4589_v27 = vcombine.low %v225_v15, %v257_v16  ;;  %v4595_v28 = vcombine.low %v228_v17, %v260_v18  ;;  %v4406_v15 = vcombine.high %v37_v9, %v69_v10  ;;  %v101_v17 = vld [vmem:[%s6970_s0 + $0x278] sm:$0xff] }
  0x6c   :  { %2347 = vmatprep.mubr.bf16.mxu1 %v5067_v3  ;;  %2470 = vmatprep.mubr.bf16.mxu0 %v5067_v3  ;;  %v4660_v30 = vcombine.high %v292_v25, %v324_v26  ;;  %v133_v18 = vld [vmem:[%s6970_s0 + $0x378] sm:$0xff] }
  0x6e   :  { %2318 = vmatpush1.bf16.msra.mxu1 %v4457_v33  ;;  %2441 = vmatpush1.bf16.msra.mxu0 %v4463_v34  ;;  %v38_v33 = vld [vmem:[%s6970_s0 + $0x80] sm:$0xff] }
  0x6f   :  { %2319 = vmatprep.subr.bf16.mxu1 %v4522_v35  ;;  %2442 = vmatprep.subr.bf16.mxu0 %v4528_v36  ;;  %v70_v34 = vld [vmem:[%s6970_s0 + $0x180] sm:$0xff]  ;;  %v4653_v35 = vcombine.low %v289_v23, %v321_v24  ;;  %v4659_v36 = vcombine.low %v292_v25, %v324_v26  ;;  %v4470_v23 = vcombine.high %v101_v17, %v133_v18  ;;  %v165_v25 = vld [vmem:[%s6970_s0 + $0x478] sm:$0xff] }
  0x70   :  { %v4408_v38 = vcombine.high %v38_v33, %v70_v34  ;;  %v197_v26 = vld [vmem:[%s6970_s0 + $0x578] sm:$0xff] }
  0x72   :  { %2320 = vmatpush1.bf16.msra.mxu1 %v4521_v41  ;;  %2443 = vmatpush1.bf16.msra.mxu0 %v4527_v42  ;;  %v102_v41 = vld [vmem:[%s6970_s0 + $0x280] sm:$0xff] }
  0x73   :  { %2321 = vmatprep.subr.bf16.mxu1 %v4586_v43  ;;  %2444 = vmatprep.subr.bf16.mxu0 %v4592_v44  ;;  %v134_v42 = vld [vmem:[%s6970_s0 + $0x380] sm:$0xff]  ;;  %v4401_v43 = vcombine.low %v35_v31, %v67_v32  ;;  %v4407_v44 = vcombine.low %v38_v33, %v70_v34  ;;  %v4534_v31 = vcombine.high %v165_v25, %v197_v26  ;;  %v229_v33 = vld [vmem:[%s6970_s0 + $0x678] sm:$0xff] }
  0x74   :  { %v4472_v46 = vcombine.high %v102_v41, %v134_v42  ;;  %v261_v34 = vld [vmem:[%s6970_s0 + $0x778] sm:$0xff] }
  0x76   :  { %2322 = vmatpush1.bf16.msra.mxu1 %v4585_v49  ;;  %2445 = vmatpush1.bf16.msra.mxu0 %v4591_v50  ;;  %v166_v49 = vld [vmem:[%s6970_s0 + $0x480] sm:$0xff] }
  0x77   :  { %2323 = vmatprep.subr.bf16.mxu1 %v4650_v52  ;;  %2446 = vmatprep.subr.bf16.mxu0 %v4656_v53  ;;  %v198_v50 = vld [vmem:[%s6970_s0 + $0x580] sm:$0xff]  ;;  %v4465_v52 = vcombine.low %v99_v39, %v131_v40  ;;  %v4471_v53 = vcombine.low %v102_v41, %v134_v42  ;;  %v293_v40 = vld [vmem:[%s6970_s0 + $0x878] sm:$0xff]  ;;  %v296_v42 = vld [vmem:[%s6970_s0 + $0x890] sm:$0xff] }
  0x78   :  { %v4536_v55 = vcombine.high %v166_v49, %v198_v50  ;;  %v325_v41 = vld [vmem:[%s6970_s0 + $0x978] sm:$0xff] }
  0x7a   :  { %2324 = vmatpush1.bf16.msra.mxu1 %v4649_v58  ;;  %2447 = vmatpush1.bf16.msra.mxu0 %v4655_v59  ;;  %v230_v58 = vld [vmem:[%s6970_s0 + $0x680] sm:$0xff] }
  0x7b   :  { %2397 = vmatprep.subr.bf16.mxu1 %v4398_v60  ;;  %2520 = vmatprep.subr.bf16.mxu0 %v4404_v61  ;;  %v262_v59 = vld [vmem:[%s6970_s0 + $0x780] sm:$0xff]  ;;  %v4529_v60 = vcombine.low %v163_v47, %v195_v48  ;;  %v4535_v61 = vcombine.low %v166_v49, %v198_v50  ;;  %v39_v48 = vld [vmem:[%s6970_s0 + $0x88] sm:$0xff] }
  0x7c   :  { %v4600_v63 = vcombine.high %v230_v58, %v262_v59  ;;  %v71_v49 = vld [vmem:[%s6970_s0 + $0x188] sm:$0xff]  ;;  %v42_v50 = vld [vmem:[%s6970_s0 + $0xa0] sm:$0xff] }
  0x7d   :  { %4704 = vmatmul.mubr.msk.bf16.vlgmr.msra.gmra.mrb[20].mxu1 %vm1942_vm0, %v5189_v51  ;;  %4707 = vmatmul.mubr.msk.bf16.vlgmr.msra.gmra.mrb[20].mxu0 %vm1942_vm0, %v5189_v51 }
  0x7e   :  { %2398 = vmatpush1.bf16.msra.mxu1 %v4397_v2  ;;  %2521 = vmatpush1.bf16.msra.mxu0 %v4403_v4  ;;  %v294_v2 = vld [vmem:[%s6970_s0 + $0x880] sm:$0xff] }
  0x7f   :  { %2399 = vmatprep.subr.bf16.mxu1 %v4462_v5  ;;  %2522 = vmatprep.subr.bf16.mxu0 %v4468_v6  ;;  %v326_v4 = vld [vmem:[%s6970_s0 + $0x980] sm:$0xff]  ;;  %v4593_v5 = vcombine.low %v227_v56, %v259_v57  ;;  %v4599_v6 = vcombine.low %v230_v58, %v262_v59  ;;  %v103_v57 = vld [vmem:[%s6970_s0 + $0x288] sm:$0xff] }
  0x80   :  { %2429 = vmatprep.mubr.bf16.mxu1 %v5067_v3  ;;  %2552 = vmatprep.mubr.bf16.mxu0 %v5067_v3  ;;  %v4664_v8 = vcombine.high %v294_v2, %v326_v4  ;;  %v135_v58 = vld [vmem:[%s6970_s0 + $0x388] sm:$0xff]  ;;  %v106_v59 = vld [vmem:[%s6970_s0 + $0x2a0] sm:$0xff] }
  0x82   :  { %2400 = vmatpush1.bf16.msra.mxu1 %v4461_v11  ;;  %2523 = vmatpush1.bf16.msra.mxu0 %v4467_v12  ;;  %v40_v11 = vld [vmem:[%s6970_s0 + $0x90] sm:$0xff] }
  0x83   :  { %2401 = vmatprep.subr.bf16.mxu1 %v4526_v13  ;;  %2524 = vmatprep.subr.bf16.mxu0 %v4532_v14  ;;  %v72_v12 = vld [vmem:[%s6970_s0 + $0x190] sm:$0xff]  ;;  %v4657_v13 = vcombine.low %v291_v0, %v323_v1  ;;  %v4663_v14 = vcombine.low %v294_v2, %v326_v4  ;;  %v167_v1 = vld [vmem:[%s6970_s0 + $0x488] sm:$0xff]  ;;  %v5728_v4 = vld [vmem:[%s6971_s1] sm:$0xf] }
  0x84   :  { %v4412_v16 = vcombine.high %v40_v11, %v72_v12  ;;  %v199_v2 = vld [vmem:[%s6970_s0 + $0x588] sm:$0xff] }
  0x86   :  { %2402 = vmatpush1.bf16.msra.mxu1 %v4525_v19  ;;  %2525 = vmatpush1.bf16.msra.mxu0 %v4531_v20  ;;  %v104_v19 = vld [vmem:[%s6970_s0 + $0x290] sm:$0xff] }
  0x87   :  { %2403 = vmatprep.subr.bf16.mxu1 %v4590_v21  ;;  %2526 = vmatprep.subr.bf16.mxu0 %v4596_v22  ;;  %v136_v20 = vld [vmem:[%s6970_s0 + $0x390] sm:$0xff]  ;;  %v4405_v21 = vcombine.low %v37_v9, %v69_v10  ;;  %v4411_v22 = vcombine.low %v40_v11, %v72_v12  ;;  %v4538_v9 = vcombine.high %v167_v1, %v199_v2  ;;  %v231_v11 = vld [vmem:[%s6970_s0 + $0x688] sm:$0xff] }
  0x88   :  { %v4476_v24 = vcombine.high %v104_v19, %v136_v20  ;;  %v263_v12 = vld [vmem:[%s6970_s0 + $0x788] sm:$0xff] }
  0x8a   :  { %2404 = vmatpush1.bf16.msra.mxu1 %v4589_v27  ;;  %2527 = vmatpush1.bf16.msra.mxu0 %v4595_v28  ;;  %v168_v27 = vld [vmem:[%s6970_s0 + $0x490] sm:$0xff] }
  0x8b   :  { %2405 = vmatprep.subr.bf16.mxu1 %v4654_v29  ;;  %2528 = vmatprep.subr.bf16.mxu0 %v4660_v30  ;;  %v200_v28 = vld [vmem:[%s6970_s0 + $0x590] sm:$0xff]  ;;  %v4469_v29 = vcombine.low %v101_v17, %v133_v18  ;;  %v4475_v30 = vcombine.low %v104_v19, %v136_v20  ;;  %v4602_v17 = vcombine.high %v231_v11, %v263_v12  ;;  %v295_v19 = vld [vmem:[%s6970_s0 + $0x888] sm:$0xff] }
  0x8c   :  { %v4540_v32 = vcombine.high %v168_v27, %v200_v28  ;;  %v327_v20 = vld [vmem:[%s6970_s0 + $0x988] sm:$0xff] }
  0x8e   :  { %2406 = vmatpush1.bf16.msra.mxu1 %v4653_v35  ;;  %2529 = vmatpush1.bf16.msra.mxu0 %v4659_v36  ;;  %v264_v35 = vld [vmem:[%s6970_s0 + $0x790] sm:$0xff]  ;;  %v4533_v36 = vcombine.low %v165_v25, %v197_v26  ;;  %v4666_v25 = vcombine.high %v295_v19, %v327_v20 }
  0x8f   :  { %2479 = vmatprep.subr.bf16.mxu1 %v4402_v37  ;;  %2602 = vmatprep.subr.bf16.mxu0 %v4408_v38  ;;  %v4539_v37 = vcombine.low %v168_v27, %v200_v28  ;;  %v4598_v38 = vcombine.high %v229_v33, %v261_v34  ;;  %v41_v27 = vld [vmem:[%s6970_s0 + $0x98] sm:$0xff] }
  0x90   :  { %v73_v28 = vld [vmem:[%s6970_s0 + $0x198] sm:$0xff] }
  0x91   :  { %4706 = vmatmul.mubr.msk.bf16.vlgmr.msra.gmra.mrb[24].mxu1 %vm1942_vm0, %v5189_v51  ;;  %4709 = vmatmul.mubr.msk.bf16.vlgmr.msra.gmra.mrb[24].mxu0 %vm1942_vm0, %v5189_v51 }
  0x92   :  { %2480 = vmatpush1.bf16.msra.mxu1 %v4401_v43  ;;  %2603 = vmatpush1.bf16.msra.mxu0 %v4407_v44  ;;  %v328_v43 = vld [vmem:[%s6970_s0 + $0x990] sm:$0xff]  ;;  %v4597_v44 = vcombine.low %v229_v33, %v261_v34  ;;  %v4414_v33 = vcombine.high %v41_v27, %v73_v28 }
  0x93   :  { %2481 = vmatprep.subr.bf16.mxu1 %v4466_v45  ;;  %2604 = vmatprep.subr.bf16.mxu0 %v4472_v46  ;;  %v4662_v46 = vcombine.high %v293_v40, %v325_v41  ;;  %v4668_v47 = vcombine.high %v296_v42, %v328_v43 }
  0x94   :  { %2511 = vmatprep.mubr.bf16.mxu1 %v5067_v3  ;;  %2634 = vmatprep.mubr.bf16.mxu0 %v5067_v3 }
  0x96   :  { %2482 = vmatpush1.bf16.msra.mxu1 %v4465_v52  ;;  %2605 = vmatpush1.bf16.msra.mxu0 %v4471_v53  ;;  %v74_v52 = vld [vmem:[%s6970_s0 + $0x1a0] sm:$0xff]  ;;  %v4661_v53 = vcombine.low %v293_v40, %v325_v41 }
  0x97   :  { %2483 = vmatprep.subr.bf16.mxu1 %v4530_v54  ;;  %2606 = vmatprep.subr.bf16.mxu0 %v4536_v55  ;;  %v4667_v54 = vcombine.low %v296_v42, %v328_v43  ;;  %v4410_v55 = vcombine.high %v39_v48, %v71_v49  ;;  %v4416_v56 = vcombine.high %v42_v50, %v74_v52  ;;  %v3306_v41 = vld [vmem:[%s6972_s2] sm:$0xff]  ;;  %v169_v43 = vld [vmem:[%s6970_s0 + $0x498] sm:$0xff] }
  0x98   :  { %3309 = vperm.xlu0 %5065, %v3306_v41  }
  0x9a   :  { %2484 = vmatpush1.bf16.msra.mxu1 %v4529_v60  ;;  %2607 = vmatpush1.bf16.msra.mxu0 %v4535_v61  ;;  %v138_v60 = vld [vmem:[%s6970_s0 + $0x3a0] sm:$0xff]  ;;  %v4409_v61 = vcombine.low %v39_v48, %v71_v49 }
  0x9b   :  { %2485 = vmatprep.subr.bf16.mxu1 %v4594_v62  ;;  %2608 = vmatprep.subr.bf16.mxu0 %v4600_v63  ;;  %v4415_v62 = vcombine.low %v42_v50, %v74_v52  ;;  %v4474_v63 = vcombine.high %v103_v57, %v135_v58  ;;  %v4480_v0 = vcombine.high %v106_v59, %v138_v60  ;;  %v233_v52 = vld [vmem:[%s6970_s0 + $0x698] sm:$0xff] }
  0x9e   :  { %2486 = vmatpush1.bf16.msra.mxu1 %v4593_v5  ;;  %2609 = vmatpush1.bf16.msra.mxu0 %v4599_v6  ;;  %v170_v5 = vld [vmem:[%s6970_s0 + $0x4a0] sm:$0xff] }
  0x9f   :  { %2487 = vmatprep.subr.bf16.mxu1 %v4658_v7  ;;  %2610 = vmatprep.subr.bf16.mxu0 %v4664_v8  ;;  %v202_v6 = vld [vmem:[%s6970_s0 + $0x5a0] sm:$0xff]  ;;  %v4473_v7 = vcombine.low %v103_v57, %v135_v58  ;;  %v4479_v8 = vcombine.low %v106_v59, %v138_v60  ;;  %v297_v60 = vld [vmem:[%s6970_s0 + $0x898] sm:$0xff] }
  0xa0   :  { %v4544_v10 = vcombine.high %v170_v5, %v202_v6 }
  0xa2   :  { %2488 = vmatpush1.bf16.msra.mxu1 %v4657_v13  ;;  %2611 = vmatpush1.bf16.msra.mxu0 %v4663_v14  ;;  %v234_v13 = vld [vmem:[%s6970_s0 + $0x6a0] sm:$0xff] }
  0xa3   :  { %2561 = vmatprep.subr.bf16.mxu1 %v4406_v15  ;;  %2684 = vmatprep.subr.bf16.mxu0 %v4412_v16  ;;  %v266_v14 = vld [vmem:[%s6970_s0 + $0x7a0] sm:$0xff]  ;;  %v4537_v15 = vcombine.low %v167_v1, %v199_v2  ;;  %v4543_v16 = vcombine.low %v170_v5, %v202_v6  ;;  %v43_v6 = vld [vmem:[%s6970_s0 + $0xa8] sm:$0xff] }
  0xa4   :  { %v4608_v18 = vcombine.high %v234_v13, %v266_v14 }
  0xa5   :  { %4708 = vmatmul.mubr.msk.bf16.vlgmr.msra.gmra.mrb[28].mxu1 %vm1942_vm0, %v5189_v51  ;;  %4711 = vmatmul.mubr.msk.bf16.vlgmr.msra.gmra.mrb[28].mxu0 %vm1942_vm0, %v5189_v51  ;;  %v232_v51 = vld [vmem:[%s6970_s0 + $0x690] sm:$0xff] }
  0xa6   :  { %2562 = vmatpush1.bf16.msra.mxu1 %v4405_v21  ;;  %2685 = vmatpush1.bf16.msra.mxu0 %v4411_v22  ;;  %v4604_v39 = vcombine.high %v232_v51, %v264_v35  ;;  %v4603_v45 = vcombine.low %v232_v51, %v264_v35  ;;  %v298_v21 = vld [vmem:[%s6970_s0 + $0x8a0] sm:$0xff]  ;;  %v105_v51 = vld [vmem:[%s6970_s0 + $0x298] sm:$0xff] }
  0xa7   :  { %2563 = vmatprep.subr.bf16.mxu1 %v4470_v23  ;;  %2686 = vmatprep.subr.bf16.mxu0 %v4476_v24  ;;  %v330_v22 = vld [vmem:[%s6970_s0 + $0x9a0] sm:$0xff]  ;;  %v4601_v23 = vcombine.low %v231_v11, %v263_v12  ;;  %v4607_v24 = vcombine.low %v234_v13, %v266_v14  ;;  %v137_v35 = vld [vmem:[%s6970_s0 + $0x398] sm:$0xff]  ;;  %v107_v14 = vld [vmem:[%s6970_s0 + $0x2a8] sm:$0xff] }
  0xa8   :  { %2593 = vmatprep.mubr.bf16.mxu1 %v5067_v3  ;;  %2716 = vmatprep.mubr.bf16.mxu0 %v5067_v3  ;;  %v4672_v26 = vcombine.high %v298_v21, %v330_v22  ;;  %v4478_v40 = vcombine.high %v105_v51, %v137_v35 }
  0xaa   :  { %2564 = vmatpush1.bf16.msra.mxu1 %v4469_v29  ;;  %2687 = vmatpush1.bf16.msra.mxu0 %v4475_v30  ;;  %v44_v29 = vld [vmem:[%s6970_s0 + $0xb0] sm:$0xff] }
  0xab   :  { %2565 = vmatprep.subr.bf16.mxu1 %v4534_v31  ;;  %2688 = vmatprep.subr.bf16.mxu0 %v4540_v32  ;;  %v76_v30 = vld [vmem:[%s6970_s0 + $0x1b0] sm:$0xff]  ;;  %v4665_v31 = vcombine.low %v295_v19, %v327_v20  ;;  %v4671_v32 = vcombine.low %v298_v21, %v330_v22  ;;  %v171_v22 = vld [vmem:[%s6970_s0 + $0x4a8] sm:$0xff] }
  0xac   :  { %v4420_v34 = vcombine.high %v44_v29, %v76_v30 }
  0xae   :  { %2566 = vmatpush1.bf16.msra.mxu1 %v4533_v36  ;;  %2689 = vmatpush1.bf16.msra.mxu0 %v4539_v37  ;;  %v108_v36 = vld [vmem:[%s6970_s0 + $0x2b0] sm:$0xff] }
  0xaf   :  { %2567 = vmatprep.subr.bf16.mxu1 %v4598_v38  ;;  %2690 = vmatprep.subr.bf16.mxu0 %v4604_v39  ;;  %v140_v37 = vld [vmem:[%s6970_s0 + $0x3b0] sm:$0xff]  ;;  %v4413_v38 = vcombine.low %v41_v27, %v73_v28  ;;  %v4419_v39 = vcombine.low %v44_v29, %v76_v30  ;;  %v235_v30 = vld [vmem:[%s6970_s0 + $0x6a8] sm:$0xff] }
  0xb0   :  { %v4484_v42 = vcombine.high %v108_v36, %v140_v37  ;;  %v4483_v48 = vcombine.low %v108_v36, %v140_v37  ;;  %v299_v37 = vld [vmem:[%s6970_s0 + $0x8a8] sm:$0xff] }
  0xb2   :  { %2568 = vmatpush1.bf16.msra.mxu1 %v4597_v44  ;;  %2691 = vmatpush1.bf16.msra.mxu0 %v4603_v45  ;;  %v201_v44 = vld [vmem:[%s6970_s0 + $0x598] sm:$0xff]  ;;  %v172_v45 = vld [vmem:[%s6970_s0 + $0x4b0] sm:$0xff] }
  0xb3   :  { %2569 = vmatprep.subr.bf16.mxu1 %v4662_v46  ;;  %2692 = vmatprep.subr.bf16.mxu0 %v4668_v47  ;;  %v204_v46 = vld [vmem:[%s6970_s0 + $0x5b0] sm:$0xff]  ;;  %v4477_v47 = vcombine.low %v105_v51, %v137_v35  ;;  %v4542_v49 = vcombine.high %v169_v43, %v201_v44 }
  0xb4   :  { %v4548_v50 = vcombine.high %v172_v45, %v204_v46  ;;  %v4547_v57 = vcombine.low %v172_v45, %v204_v46  ;;  %v45_v46 = vld [vmem:[%s6970_s0 + $0xb8] sm:$0xff] }
  0xb6   :  { %2570 = vmatpush1.bf16.msra.mxu1 %v4661_v53  ;;  %2693 = vmatpush1.bf16.msra.mxu0 %v4667_v54  ;;  %v265_v53 = vld [vmem:[%s6970_s0 + $0x798] sm:$0xff]  ;;  %v236_v54 = vld [vmem:[%s6970_s0 + $0x6b0] sm:$0xff] }
  0xb7   :  { %2643 = vmatprep.subr.bf16.mxu1 %v4410_v55  ;;  %2766 = vmatprep.subr.bf16.mxu0 %v4416_v56  ;;  %v268_v55 = vld [vmem:[%s6970_s0 + $0x7b0] sm:$0xff]  ;;  %v4541_v56 = vcombine.low %v169_v43, %v201_v44  ;;  %v4606_v58 = vcombine.high %v233_v52, %v265_v53 }
  0xb8   :  { %v4612_v59 = vcombine.high %v236_v54, %v268_v55  ;;  %v4611_v1 = vcombine.low %v236_v54, %v268_v55 }
  0xb9   :  { %4710 = vmatmul.mubr.msk.bf16.vlgmr.msra.gmra.mrb[32].mxu1 %vm1942_vm0, %v5728_v4  ;;  %4713 = vmatmul.mubr.msk.bf16.vlgmr.msra.gmra.mrb[32].mxu0 %vm1942_vm0, %v5728_v4 }
  0xba   :  { %2644 = vmatpush1.bf16.msra.mxu1 %v4409_v61  ;;  %2767 = vmatpush1.bf16.msra.mxu0 %v4415_v62  ;;  %v329_v61 = vld [vmem:[%s6970_s0 + $0x998] sm:$0xff]  ;;  %v300_v62 = vld [vmem:[%s6970_s0 + $0x8b0] sm:$0xff] }
  0xbb   :  { %2645 = vmatprep.subr.bf16.mxu1 %v4474_v63  ;;  %2768 = vmatprep.subr.bf16.mxu0 %v4480_v0  ;;  %v332_v63 = vld [vmem:[%s6970_s0 + $0x9b0] sm:$0xff]  ;;  %v4605_v0 = vcombine.low %v233_v52, %v265_v53  ;;  %v4670_v2 = vcombine.high %v297_v60, %v329_v61 }
  0xbc   :  { %2675 = vmatprep.mubr.bf16.mxu1 %v5067_v3  ;;  %2798 = vmatprep.mubr.bf16.mxu0 %v5067_v3  ;;  %v4676_v5 = vcombine.high %v300_v62, %v332_v63  ;;  %v4675_v11 = vcombine.low %v300_v62, %v332_v63  ;;  %v141_v62 = vld [vmem:[%s6970_s0 + $0x3b8] sm:$0xff] }
  0xbe   :  { %2646 = vmatpush1.bf16.msra.mxu1 %v4473_v7  ;;  %2769 = vmatpush1.bf16.msra.mxu0 %v4479_v8  ;;  %v75_v7 = vld [vmem:[%s6970_s0 + $0x1a8] sm:$0xff]  ;;  %v46_v8 = vld [vmem:[%s6970_s0 + $0xc0] sm:$0xff] }
  0xbf   :  { %2647 = vmatprep.subr.bf16.mxu1 %v4538_v9  ;;  %2770 = vmatprep.subr.bf16.mxu0 %v4544_v10  ;;  %v78_v9 = vld [vmem:[%s6970_s0 + $0x1c0] sm:$0xff]  ;;  %v4669_v10 = vcombine.low %v297_v60, %v329_v61  ;;  %v4418_v12 = vcombine.high %v43_v6, %v75_v7  ;;  %v109_v61 = vld [vmem:[%s6970_s0 + $0x2b8] sm:$0xff] }
  0xc0   :  { %v4424_v13 = vcombine.high %v46_v8, %v78_v9  ;;  %v4423_v19 = vcombine.low %v46_v8, %v78_v9  ;;  %v173_v8 = vld [vmem:[%s6970_s0 + $0x4b8] sm:$0xff] }
  0xc1   :  { %v205_v9 = vld [vmem:[%s6970_s0 + $0x5b8] sm:$0xff] }
  0xc2   :  { %2648 = vmatpush1.bf16.msra.mxu1 %v4537_v15  ;;  %2771 = vmatpush1.bf16.msra.mxu0 %v4543_v16  ;;  %v139_v15 = vld [vmem:[%s6970_s0 + $0x3a8] sm:$0xff]  ;;  %v110_v16 = vld [vmem:[%s6970_s0 + $0x2c0] sm:$0xff] }
  0xc3   :  { %2649 = vmatprep.subr.bf16.mxu1 %v4602_v17  ;;  %2772 = vmatprep.subr.bf16.mxu0 %v4608_v18  ;;  %v142_v17 = vld [vmem:[%s6970_s0 + $0x3c0] sm:$0xff]  ;;  %v4417_v18 = vcombine.low %v43_v6, %v75_v7  ;;  %v4482_v20 = vcombine.high %v107_v14, %v139_v15  ;;  %v4486_v6 = vcombine.high %v109_v61, %v141_v62 }
  0xc4   :  { %v4488_v21 = vcombine.high %v110_v16, %v142_v17  ;;  %v4487_v27 = vcombine.low %v110_v16, %v142_v17  ;;  %v237_v16 = vld [vmem:[%s6970_s0 + $0x6b8] sm:$0xff] }
  0xc5   :  { %v269_v17 = vld [vmem:[%s6970_s0 + $0x7b8] sm:$0xff] }
  0xc6   :  { %2650 = vmatpush1.bf16.msra.mxu1 %v4601_v23  ;;  %2773 = vmatpush1.bf16.msra.mxu0 %v4607_v24  ;;  %v203_v23 = vld [vmem:[%s6970_s0 + $0x5a8] sm:$0xff]  ;;  %v174_v24 = vld [vmem:[%s6970_s0 + $0x4c0] sm:$0xff] }
  0xc7   :  { %2651 = vmatprep.subr.bf16.mxu1 %v4666_v25  ;;  %2774 = vmatprep.subr.bf16.mxu0 %v4672_v26  ;;  %v206_v25 = vld [vmem:[%s6970_s0 + $0x5c0] sm:$0xff]  ;;  %v4481_v26 = vcombine.low %v107_v14, %v139_v15  ;;  %v4546_v28 = vcombine.high %v171_v22, %v203_v23  ;;  %v4550_v14 = vcombine.high %v173_v8, %v205_v9 }
  0xc8   :  { %v4552_v29 = vcombine.high %v174_v24, %v206_v25  ;;  %v4551_v51 = vcombine.low %v174_v24, %v206_v25  ;;  %v301_v24 = vld [vmem:[%s6970_s0 + $0x8b8] sm:$0xff] }
  0xc9   :  { %v333_v25 = vld [vmem:[%s6970_s0 + $0x9b8] sm:$0xff] }
  0xca   :  { %2652 = vmatpush1.bf16.msra.mxu1 %v4665_v31  ;;  %2775 = vmatpush1.bf16.msra.mxu0 %v4671_v32  ;;  %v267_v31 = vld [vmem:[%s6970_s0 + $0x7a8] sm:$0xff]  ;;  %v238_v32 = vld [vmem:[%s6970_s0 + $0x6c0] sm:$0xff] }
  0xcb   :  { %2725 = vmatprep.subr.bf16.mxu1 %v4414_v33  ;;  %2848 = vmatprep.subr.bf16.mxu0 %v4420_v34  ;;  %v270_v33 = vld [vmem:[%s6970_s0 + $0x7c0] sm:$0xff]  ;;  %v4545_v34 = vcombine.low %v171_v22, %v203_v23  ;;  %v4610_v35 = vcombine.high %v235_v30, %v267_v31  ;;  %v4609_v41 = vcombine.low %v235_v30, %v267_v31 }
  0xcc   :  { %v4616_v36 = vcombine.high %v238_v32, %v270_v33  ;;  %v4614_v22 = vcombine.high %v237_v16, %v269_v17  ;;  %v4678_v30 = vcombine.high %v301_v24, %v333_v25 }
  0xcd   :  { %4712 = vmatmul.mubr.msk.bf16.vlgmr.msra.gmra.mrb[36].mxu1 %vm1942_vm0, %v5728_v4  ;;  %4715 = vmatmul.mubr.msk.bf16.vlgmr.msra.gmra.mrb[36].mxu0 %vm1942_vm0, %v5728_v4 }
  0xce   :  { %2726 = vmatpush1.bf16.msra.mxu1 %v4413_v38  ;;  %2849 = vmatpush1.bf16.msra.mxu0 %v4419_v39  ;;  %v331_v38 = vld [vmem:[%s6970_s0 + $0x9a8] sm:$0xff]  ;;  %v302_v39 = vld [vmem:[%s6970_s0 + $0x8c0] sm:$0xff] }
  0xcf   :  { %2727 = vmatprep.subr.bf16.mxu1 %v4478_v40  ;;  %2850 = vmatprep.subr.bf16.mxu0 %v4484_v42  ;;  %v334_v40 = vld [vmem:[%s6970_s0 + $0x9c0] sm:$0xff]  ;;  %v4615_v42 = vcombine.low %v238_v32, %v270_v33  ;;  %v4674_v43 = vcombine.high %v299_v37, %v331_v38  ;;  %v4673_v54 = vcombine.low %v299_v37, %v331_v38  ;;  %v47_v33 = vld [vmem:[%s6970_s0 + $0xc8] sm:$0xff] }
  0xd0   :  { %2757 = vmatprep.mubr.bf16.mxu1 %v5067_v3  ;;  %2880 = vmatprep.mubr.bf16.mxu0 %v5067_v3  ;;  %v4680_v45 = vcombine.high %v302_v39, %v334_v40 }
  0xd2   :  { %2728 = vmatpush1.bf16.msra.mxu1 %v4477_v47  ;;  %2851 = vmatpush1.bf16.msra.mxu0 %v4483_v48  ;;  %v77_v47 = vld [vmem:[%s6970_s0 + $0x1b8] sm:$0xff] }
  0xd3   :  { %2729 = vmatprep.subr.bf16.mxu1 %v4542_v49  ;;  %2852 = vmatprep.subr.bf16.mxu0 %v4548_v50  ;;  %v48_v49 = vld [vmem:[%s6970_s0 + $0xd0] sm:$0xff] }
  0xd4   :  { %v80_v50 = vld [vmem:[%s6970_s0 + $0x1d0] sm:$0xff] }
  0xd5   :  { %v4428_v60 = vcombine.high %v48_v49, %v80_v50 }
  0xd6   :  { %2730 = vmatpush1.bf16.msra.mxu1 %v4541_v56  ;;  %2853 = vmatpush1.bf16.msra.mxu0 %v4547_v57  ;;  %v4679_v57 = vcombine.low %v302_v39, %v334_v40  ;;  %v4677_v39 = vcombine.low %v301_v24, %v333_v25  ;;  %v81_v24 = vld [vmem:[%s6970_s0 + $0x1d8] sm:$0xff] }
  0xd7   :  { %2731 = vmatprep.subr.bf16.mxu1 %v4606_v58  ;;  %2854 = vmatprep.subr.bf16.mxu0 %v4612_v59  ;;  %v4422_v58 = vcombine.high %v45_v46, %v77_v47 }
  0xda   :  { %2732 = vmatpush1.bf16.msra.mxu1 %v4605_v0  ;;  %2855 = vmatpush1.bf16.msra.mxu0 %v4611_v1  ;;  %v112_v0 = vld [vmem:[%s6970_s0 + $0x2d0] sm:$0xff] }
  0xdb   :  { %2733 = vmatprep.subr.bf16.mxu1 %v4670_v2  ;;  %2856 = vmatprep.subr.bf16.mxu0 %v4676_v5  ;;  %v144_v1 = vld [vmem:[%s6970_s0 + $0x3d0] sm:$0xff]  ;;  %v4421_v2 = vcombine.low %v45_v46, %v77_v47  ;;  %v4427_v5 = vcombine.low %v48_v49, %v80_v50  ;;  %v111_v47 = vld [vmem:[%s6970_s0 + $0x2c8] sm:$0xff] }
  0xdc   :  { %v4492_v7 = vcombine.high %v112_v0, %v144_v1  ;;  %v143_v49 = vld [vmem:[%s6970_s0 + $0x3c8] sm:$0xff] }
  0xde   :  { %2734 = vmatpush1.bf16.msra.mxu1 %v4669_v10  ;;  %2857 = vmatpush1.bf16.msra.mxu0 %v4675_v11  ;;  %v176_v10 = vld [vmem:[%s6970_s0 + $0x4d0] sm:$0xff] }
  0xdf   :  { %2807 = vmatprep.subr.bf16.mxu1 %v4418_v12  ;;  %2930 = vmatprep.subr.bf16.mxu0 %v4424_v13  ;;  %v208_v11 = vld [vmem:[%s6970_s0 + $0x5d0] sm:$0xff]  ;;  %v4485_v12 = vcombine.low %v109_v61, %v141_v62  ;;  %v4491_v13 = vcombine.low %v112_v0, %v144_v1  ;;  %v207_v61 = vld [vmem:[%s6970_s0 + $0x5c8] sm:$0xff]  ;;  %v178_v62 = vld [vmem:[%s6970_s0 + $0x4e0] sm:$0xff]  ;;  %v4489_v0 = vcombine.low %v111_v47, %v143_v49 }
  0xe0   :  { %v4556_v15 = vcombine.high %v176_v10, %v208_v11 }
  0xe1   :  { %4714 = vmatmul.mubr.msk.bf16.vlgmr.msra.gmra.mrb[40].mxu1 %vm1942_vm0, %v5728_v4  ;;  %4717 = vmatmul.mubr.msk.bf16.vlgmr.msra.gmra.mrb[40].mxu0 %vm1942_vm0, %v5728_v4 }
  0xe2   :  { %2808 = vmatpush1.bf16.msra.mxu1 %v4417_v18  ;;  %2931 = vmatpush1.bf16.msra.mxu0 %v4423_v19  ;;  %v240_v18 = vld [vmem:[%s6970_s0 + $0x6d0] sm:$0xff] }
  0xe3   :  { %2809 = vmatprep.subr.bf16.mxu1 %v4482_v20  ;;  %2932 = vmatprep.subr.bf16.mxu0 %v4488_v21  ;;  %v272_v19 = vld [vmem:[%s6970_s0 + $0x7d0] sm:$0xff]  ;;  %v4549_v20 = vcombine.low %v173_v8, %v205_v9  ;;  %v4555_v21 = vcombine.low %v176_v10, %v208_v11  ;;  %v242_v8 = vld [vmem:[%s6970_s0 + $0x6e0] sm:$0xff] }
  0xe4   :  { %2839 = vmatprep.mubr.bf16.mxu1 %v5067_v3  ;;  %2962 = vmatprep.mubr.bf16.mxu0 %v5067_v3  ;;  %v4620_v23 = vcombine.high %v240_v18, %v272_v19  ;;  %v274_v9 = vld [vmem:[%s6970_s0 + $0x7e0] sm:$0xff] }
  0xe6   :  { %2810 = vmatpush1.bf16.msra.mxu1 %v4481_v26  ;;  %2933 = vmatpush1.bf16.msra.mxu0 %v4487_v27  ;;  %v304_v26 = vld [vmem:[%s6970_s0 + $0x8d0] sm:$0xff] }
  0xe7   :  { %2811 = vmatprep.subr.bf16.mxu1 %v4546_v28  ;;  %2934 = vmatprep.subr.bf16.mxu0 %v4552_v29  ;;  %v336_v27 = vld [vmem:[%s6970_s0 + $0x9d0] sm:$0xff]  ;;  %v4613_v28 = vcombine.low %v237_v16, %v269_v17  ;;  %v4619_v29 = vcombine.low %v240_v18, %v272_v19  ;;  %v306_v16 = vld [vmem:[%s6970_s0 + $0x8e0] sm:$0xff]  ;;  %v4623_v19 = vcombine.low %v242_v8, %v274_v9 }
  0xe8   :  { %v4684_v32 = vcombine.high %v304_v26, %v336_v27  ;;  %v338_v17 = vld [vmem:[%s6970_s0 + $0x9e0] sm:$0xff] }
  0xea   :  { %2812 = vmatpush1.bf16.msra.mxu1 %v4545_v34  ;;  %2935 = vmatpush1.bf16.msra.mxu0 %v4551_v51  ;;  %v79_v34 = vld [vmem:[%s6970_s0 + $0x1c8] sm:$0xff] }
  0xeb   :  { %2813 = vmatprep.subr.bf16.mxu1 %v4610_v35  ;;  %2936 = vmatprep.subr.bf16.mxu0 %v4616_v36  ;;  %v50_v35 = vld [vmem:[%s6970_s0 + $0xe0] sm:$0xff] }
  0xec   :  { %v5901_v44 = vpop.f32.mrb[0].mxu1  ;;  %v5917_v52 = vpop.f32.mrb[0].mxu0  ;;  %v82_v36 = vld [vmem:[%s6970_s0 + $0x1e0] sm:$0xff] }
  0xed   :  { %v5909_v48 = vpop.f32.mrb[1].mxu1  ;;  %v5919_v55 = vpop.f32.mrb[1].mxu0  ;;  %v4432_v46 = vcombine.high %v50_v35, %v82_v36 }
  0xee   :  { %v1984_v53 = vpop.f32.mrb[2].mxu1  ;;  %2814 = vmatpush1.bf16.msra.mxu1 %v4609_v41  ;;  %2937 = vmatpush1.bf16.msra.mxu0 %v4615_v42  ;;  %v2066_v59 = vpop.f32.mrb[2].mxu0  ;;  %v4683_v42 = vcombine.low %v304_v26, %v336_v27  ;;  %v52_v26 = vld [vmem:[%s6970_s0 + $0xf0] sm:$0xff] }
  0xef   :  { %v1985_v56 = vpop.f32.mrb[3].mxu1  ;;  %2815 = vmatprep.subr.bf16.mxu1 %v4674_v43  ;;  %2938 = vmatprep.subr.bf16.mxu0 %v4680_v45  ;;  %v2067_v63 = vpop.f32.mrb[3].mxu0  ;;  %v4426_v43 = vcombine.high %v47_v33, %v79_v34  ;;  %v114_v53 = vld [vmem:[%s6970_s0 + $0x2e0] sm:$0xff]  ;;  %v84_v27 = vld [vmem:[%s6970_s0 + $0x1f0] sm:$0xff] }
  0xf0   :  { %v4425_v56 = vcombine.low %v47_v33, %v79_v34  ;;  %v210_v63 = vld [vmem:[%s6970_s0 + $0x5e0] sm:$0xff]  ;;  %v4687_v34 = vcombine.low %v306_v16, %v338_v17 }
  0xf1   :  { %v4559_v11 = vcombine.low %v178_v62, %v210_v63 }
  0xf2   :  { %2816 = vmatpush1.bf16.msra.mxu1 %v4673_v54  ;;  %2939 = vmatpush1.bf16.msra.mxu0 %v4679_v57  ;;  %v146_v54 = vld [vmem:[%s6970_s0 + $0x3e0] sm:$0xff]  ;;  %v4431_v57 = vcombine.low %v50_v35, %v82_v36 }
  0xf3   :  { %2889 = vmatprep.subr.bf16.mxu1 %v4422_v58  ;;  %3012 = vmatprep.subr.bf16.mxu0 %v4428_v60  ;;  %v4490_v58 = vcombine.high %v111_v47, %v143_v49  ;;  %v4496_v59 = vcombine.high %v114_v53, %v146_v54  ;;  %v175_v60 = vld [vmem:[%s6970_s0 + $0x4c8] sm:$0xff]  ;;  %v4495_v1 = vcombine.low %v114_v53, %v146_v54  ;;  %v177_v53 = vld [vmem:[%s6970_s0 + $0x4d8] sm:$0xff] }
  0xf4   :  { %v4553_v10 = vcombine.low %v175_v60, %v207_v61  ;;  %v4435_v47 = vcombine.low %v52_v26, %v84_v27  ;;  %v209_v54 = vld [vmem:[%s6970_s0 + $0x5d8] sm:$0xff] }
  0xf5   :  { %4716 = vmatmul.mubr.msk.bf16.vlgmr.msra.gmra.mrb[44].mxu1 %vm1942_vm0, %v5728_v4  ;;  %4719 = vmatmul.mubr.msk.bf16.vlgmr.msra.gmra.mrb[44].mxu0 %vm1942_vm0, %v5728_v4 }
  0xf6   :  { %2890 = vmatpush1.bf16.msra.mxu1 %v4421_v2  ;;  %3013 = vmatpush1.bf16.msra.mxu0 %v4427_v5  ;;  %v4554_v2 = vcombine.high %v175_v60, %v207_v61  ;;  %v4560_v5 = vcombine.high %v178_v62, %v210_v63  ;;  %v4558_v60 = vcombine.high %v177_v53, %v209_v54  ;;  %v241_v62 = vld [vmem:[%s6970_s0 + $0x6d8] sm:$0xff] }
  0xf7   :  { %2891 = vmatprep.subr.bf16.mxu1 %v4486_v6  ;;  %3014 = vmatprep.subr.bf16.mxu0 %v4492_v7  ;;  %v239_v6 = vld [vmem:[%s6970_s0 + $0x6c8] sm:$0xff]  ;;  %v273_v63 = vld [vmem:[%s6970_s0 + $0x7d8] sm:$0xff] }
  0xf8   :  { %2921 = vmatprep.mubr.bf16.mxu1 %v5067_v3  ;;  %3044 = vmatprep.mubr.bf16.mxu0 %v5067_v3  ;;  %v271_v7 = vld [vmem:[%s6970_s0 + $0x7c8] sm:$0xff] }
  0xf9   :  { %v4617_v18 = vcombine.low %v239_v6, %v271_v7 }
  0xfa   :  { %2892 = vmatpush1.bf16.msra.mxu1 %v4485_v12  ;;  %3015 = vmatpush1.bf16.msra.mxu0 %v4491_v13  ;;  %v4618_v12 = vcombine.high %v239_v6, %v271_v7  ;;  %v4624_v13 = vcombine.high %v242_v8, %v274_v9  ;;  %v4622_v6 = vcombine.high %v241_v62, %v273_v63  ;;  %v305_v8 = vld [vmem:[%s6970_s0 + $0x8d8] sm:$0xff] }
  0xfb   :  { %2893 = vmatprep.subr.bf16.mxu1 %v4550_v14  ;;  %3016 = vmatprep.subr.bf16.mxu0 %v4556_v15  ;;  %v303_v14 = vld [vmem:[%s6970_s0 + $0x8c8] sm:$0xff]  ;;  %v337_v9 = vld [vmem:[%s6970_s0 + $0x9d8] sm:$0xff] }
  0xfc   :  { %v335_v15 = vld [vmem:[%s6970_s0 + $0x9c8] sm:$0xff] }
  0xfe   :  { %2894 = vmatpush1.bf16.msra.mxu1 %v4549_v20  ;;  %3017 = vmatpush1.bf16.msra.mxu0 %v4555_v21  ;;  %v4682_v20 = vcombine.high %v303_v14, %v335_v15 }
  0xff   :  { %2895 = vmatprep.subr.bf16.mxu1 %v4614_v22  ;;  %3018 = vmatprep.subr.bf16.mxu0 %v4620_v23  ;;  %v4688_v22 = vcombine.high %v306_v16, %v338_v17  ;;  %v49_v23 = vld [vmem:[%s6970_s0 + $0xd8] sm:$0xff]  ;;  %v51_v17 = vld [vmem:[%s6970_s0 + $0xe8] sm:$0xff] }
 0x100   :  { %v5975_v31 = vpop.f32.mrb[4].mxu1  ;;  %v5991_v37 = vpop.f32.mrb[4].mxu0  ;;  %v4430_v35 = vcombine.high %v49_v23, %v81_v24 }
 0x101   :  { %v5983_v51 = vpop.f32.mrb[5].mxu1  ;;  %v5993_v40 = vpop.f32.mrb[5].mxu0 }
 0x102   :  { %v2025_v38 = vpop.f32.mrb[6].mxu1  ;;  %2896 = vmatpush1.bf16.msra.mxu1 %v4613_v28  ;;  %3019 = vmatpush1.bf16.msra.mxu0 %v4619_v29  ;;  %v2148_v45 = vpop.f32.mrb[6].mxu0 }
 0x103   :  { %v2026_v41 = vpop.f32.mrb[7].mxu1  ;;  %2897 = vmatprep.subr.bf16.mxu1 %v4678_v30  ;;  %3020 = vmatprep.subr.bf16.mxu0 %v4684_v32  ;;  %v2149_v50 = vpop.f32.mrb[7].mxu0  ;;  %v4681_v30 = vcombine.low %v303_v14, %v335_v15  ;;  %v4436_v38 = vcombine.high %v52_v26, %v84_v27  ;;  %v148_v45 = vld [vmem:[%s6970_s0 + $0x3f0] sm:$0xff]  ;;  %v4686_v14 = vcombine.high %v305_v8, %v337_v9 }
 0x104   :  { %v145_v41 = vld [vmem:[%s6970_s0 + $0x3d8] sm:$0xff]  ;;  %v4685_v26 = vcombine.low %v305_v8, %v337_v9 }
 0x106   :  { %2898 = vmatpush1.bf16.msra.mxu1 %v4677_v39  ;;  %3021 = vmatpush1.bf16.msra.mxu0 %v4683_v42  ;;  %v113_v39 = vld [vmem:[%s6970_s0 + $0x2d8] sm:$0xff] }
 0x107   :  { %2971 = vmatprep.subr.bf16.mxu1 %v4426_v43  ;;  %3094 = vmatprep.subr.bf16.mxu0 %v4432_v46  ;;  %v116_v43 = vld [vmem:[%s6970_s0 + $0x2f0] sm:$0xff]  ;;  %v4429_v46 = vcombine.low %v49_v23, %v81_v24  ;;  %v4494_v49 = vcombine.high %v113_v39, %v145_v41 }
 0x108   :  { %v4500_v50 = vcombine.high %v116_v43, %v148_v45 }
 0x109   :  { %4718 = vmatmul.mubr.msk.bf16.vlgmr.msra.gmra.mrb[48].mxu1 %vm1942_vm0, %v5728_v4  ;;  %4721 = vmatmul.mubr.msk.bf16.vlgmr.msra.gmra.mrb[48].mxu0 %vm1942_vm0, %v5728_v4 }
 0x10a   :  { %2972 = vmatpush1.bf16.msra.mxu1 %v4425_v56  ;;  %3095 = vmatpush1.bf16.msra.mxu0 %v4431_v57  ;;  %v180_v56 = vld [vmem:[%s6970_s0 + $0x4f0] sm:$0xff] }
 0x10b   :  { %2973 = vmatprep.subr.bf16.mxu1 %v4490_v58  ;;  %3096 = vmatprep.subr.bf16.mxu0 %v4496_v59  ;;  %v212_v57 = vld [vmem:[%s6970_s0 + $0x5f0] sm:$0xff]  ;;  %v4493_v58 = vcombine.low %v113_v39, %v145_v41  ;;  %v4499_v59 = vcombine.low %v116_v43, %v148_v45  ;;  %v211_v43 = vld [vmem:[%s6970_s0 + $0x5e8] sm:$0xff] }
 0x10c   :  { %3003 = vmatprep.mubr.bf16.mxu1 %v5067_v3  ;;  %3126 = vmatprep.mubr.bf16.mxu0 %v5067_v3  ;;  %v4564_v61 = vcombine.high %v180_v56, %v212_v57 }
 0x10e   :  { %2974 = vmatpush1.bf16.msra.mxu1 %v4489_v0  ;;  %3097 = vmatpush1.bf16.msra.mxu0 %v4495_v1  ;;  %v244_v0 = vld [vmem:[%s6970_s0 + $0x6f0] sm:$0xff] }
 0x10f   :  { %2975 = vmatprep.subr.bf16.mxu1 %v4554_v2  ;;  %3098 = vmatprep.subr.bf16.mxu0 %v4560_v5  ;;  %v276_v1 = vld [vmem:[%s6970_s0 + $0x7f0] sm:$0xff]  ;;  %v4557_v2 = vcombine.low %v177_v53, %v209_v54  ;;  %v4563_v5 = vcombine.low %v180_v56, %v212_v57  ;;  %v307_v54 = vld [vmem:[%s6970_s0 + $0x8e8] sm:$0xff] }
 0x110   :  { %v4628_v7 = vcombine.high %v244_v0, %v276_v1  ;;  %v339_v56 = vld [vmem:[%s6970_s0 + $0x9e8] sm:$0xff] }
 0x112   :  { %2976 = vmatpush1.bf16.msra.mxu1 %v4553_v10  ;;  %3099 = vmatpush1.bf16.msra.mxu0 %v4559_v11  ;;  %v308_v10 = vld [vmem:[%s6970_s0 + $0x8f0] sm:$0xff] }
 0x113   :  { %2977 = vmatprep.subr.bf16.mxu1 %v4618_v12  ;;  %3100 = vmatprep.subr.bf16.mxu0 %v4624_v13  ;;  %v340_v11 = vld [vmem:[%s6970_s0 + $0x9f0] sm:$0xff]  ;;  %v4621_v12 = vcombine.low %v241_v62, %v273_v63  ;;  %v4627_v13 = vcombine.low %v244_v0, %v276_v1 }
 0x114   :  { %v6049_v21 = vpop.f32.mrb[8].mxu1  ;;  %v6065_v28 = vpop.f32.mrb[8].mxu0  ;;  %v4692_v16 = vcombine.high %v308_v10, %v340_v11 }
 0x115   :  { %v6057_v25 = vpop.f32.mrb[9].mxu1  ;;  %v6067_v32 = vpop.f32.mrb[9].mxu0 }
 0x116   :  { %v2107_v29 = vpop.f32.mrb[10].mxu1  ;;  %2978 = vmatpush1.bf16.msra.mxu1 %v4617_v18  ;;  %3101 = vmatpush1.bf16.msra.mxu0 %v4623_v19  ;;  %v2230_v36 = vpop.f32.mrb[10].mxu0  ;;  %v83_v18 = vld [vmem:[%s6970_s0 + $0x1e8] sm:$0xff] }
 0x117   :  { %v2108_v33 = vpop.f32.mrb[11].mxu1  ;;  %2979 = vmatprep.subr.bf16.mxu1 %v4682_v20  ;;  %3102 = vmatprep.subr.bf16.mxu0 %v4688_v22  ;;  %v2231_v42 = vpop.f32.mrb[11].mxu0  ;;  %v147_v36 = vld [vmem:[%s6970_s0 + $0x3e8] sm:$0xff]  ;;  %v4433_v39 = vcombine.low %v51_v17, %v83_v18 }
 0x118   :  { %v4434_v33 = vcombine.high %v51_v17, %v83_v18  ;;  %v179_v42 = vld [vmem:[%s6970_s0 + $0x4e8] sm:$0xff]  ;;  %v213_v17 = vld [vmem:[%s6970_s0 + $0x5f8] sm:$0xff] }
 0x11a   :  { %2980 = vmatpush1.bf16.msra.mxu1 %v4681_v30  ;;  %3103 = vmatpush1.bf16.msra.mxu0 %v4687_v34  ;;  %v4691_v30 = vcombine.low %v308_v10, %v340_v11  ;;  %v117_v10 = vld [vmem:[%s6970_s0 + $0x2f8] sm:$0xff] }
 0x11b   :  { %3053 = vmatprep.subr.bf16.mxu1 %v4430_v35  ;;  %3176 = vmatprep.subr.bf16.mxu0 %v4436_v38  ;;  %v115_v35 = vld [vmem:[%s6970_s0 + $0x2e8] sm:$0xff]  ;;  %v149_v11 = vld [vmem:[%s6970_s0 + $0x3f8] sm:$0xff] }
 0x11c   :  { %v4498_v41 = vcombine.high %v115_v35, %v147_v36  ;;  %v4497_v45 = vcombine.low %v115_v35, %v147_v36  ;;  %v4501_v18 = vcombine.low %v117_v10, %v149_v11 }
 0x11d   :  { %4720 = vmatmul.mubr.msk.bf16.vlgmr.msra.gmra.mrb[52].mxu1 %vm1942_vm0, %v5728_v4  ;;  %4723 = vmatmul.mubr.msk.bf16.vlgmr.msra.gmra.mrb[52].mxu0 %vm1942_vm0, %v5728_v4 }
 0x11e   :  { %3054 = vmatpush1.bf16.msra.mxu1 %v4429_v46  ;;  %3177 = vmatpush1.bf16.msra.mxu0 %v4435_v47  ;;  %v4562_v46 = vcombine.high %v179_v42, %v211_v43  ;;  %v243_v47 = vld [vmem:[%s6970_s0 + $0x6e8] sm:$0xff] }
 0x11f   :  { %3055 = vmatprep.subr.bf16.mxu1 %v4494_v49  ;;  %3178 = vmatprep.subr.bf16.mxu0 %v4500_v50  ;;  %v275_v49 = vld [vmem:[%s6970_s0 + $0x7e8] sm:$0xff]  ;;  %v4561_v50 = vcombine.low %v179_v42, %v211_v43 }
 0x120   :  { %3085 = vmatprep.mubr.bf16.mxu1 %v5067_v3  ;;  %3208 = vmatprep.mubr.bf16.mxu0 %v5067_v3  ;;  %v4626_v53 = vcombine.high %v243_v47, %v275_v49  ;;  %v4625_v57 = vcombine.low %v243_v47, %v275_v49 }
 0x122   :  { %3056 = vmatpush1.bf16.msra.mxu1 %v4493_v58  ;;  %3179 = vmatpush1.bf16.msra.mxu0 %v4499_v59  ;;  %v4690_v58 = vcombine.high %v307_v54, %v339_v56 }
 0x123   :  { %3057 = vmatprep.subr.bf16.mxu1 %v4558_v60  ;;  %3180 = vmatprep.subr.bf16.mxu0 %v4564_v61  ;;  %v53_v60 = vld [vmem:[%s6970_s0 + $0xf8] sm:$0xff] }
 0x124   :  { %v85_v61 = vld [vmem:[%s6970_s0 + $0x1f8] sm:$0xff] }
 0x125   :  { %v4438_v8 = vcombine.high %v53_v60, %v85_v61 }
 0x126   :  { %3058 = vmatpush1.bf16.msra.mxu1 %v4557_v2  ;;  %3181 = vmatpush1.bf16.msra.mxu0 %v4563_v5  ;;  %v4689_v5 = vcombine.low %v307_v54, %v339_v56 }
 0x127   :  { %3059 = vmatprep.subr.bf16.mxu1 %v4622_v6  ;;  %3182 = vmatprep.subr.bf16.mxu0 %v4628_v7 }
 0x128   :  { %v6123_v15 = vpop.f32.mrb[12].mxu1  ;;  %v6131_v19 = vpop.f32.mrb[12].mxu0 }
 0x129   :  { %v6133_v20 = vpop.f32.mrb[13].mxu1  ;;  %v3258_v22 = vmax.f32 %v5901_v44, %v6131_v19  ;;  %v6137_v23 = vpop.f32.mrb[13].mxu0 }
 0x12a   :  { %v2189_v24 = vpop.f32.mrb[14].mxu1  ;;  %3060 = vmatpush1.bf16.msra.mxu1 %v4621_v12  ;;  %v3259_v27 = vmax.f32 %v5909_v48, %v6137_v23  ;;  %3183 = vmatpush1.bf16.msra.mxu0 %v4627_v13  ;;  %v2312_v34 = vpop.f32.mrb[14].mxu0  ;;  %v4437_v13 = vcombine.low %v53_v60, %v85_v61 }
 0x12b   :  { %v2190_v29 = vpop.f32.mrb[15].mxu1  ;;  %3061 = vmatprep.subr.bf16.mxu1 %v4686_v14  ;;  %3184 = vmatprep.subr.bf16.mxu0 %v4692_v16  ;;  %v2313_v38 = vpop.f32.mrb[15].mxu0  ;;  %v4502_v14 = vcombine.high %v117_v10, %v149_v11  ;;  %v181_v16 = vld [vmem:[%s6970_s0 + $0x4f8] sm:$0xff] }
 0x12c   :  { %v4566_v24 = vcombine.high %v181_v16, %v213_v17  ;;  %v277_v29 = vld [vmem:[%s6970_s0 + $0x7f8] sm:$0xff] }
 0x12d   :  { %v309_v34 = vld [vmem:[%s6970_s0 + $0x8f8] sm:$0xff] }
 0x12e   :  { %3062 = vmatpush1.bf16.msra.mxu1 %v4685_v26  ;;  %3185 = vmatpush1.bf16.msra.mxu0 %v4691_v30  ;;  %v245_v26 = vld [vmem:[%s6970_s0 + $0x6f8] sm:$0xff]  ;;  %v4565_v30 = vcombine.low %v181_v16, %v213_v17 }
 0x12f   :  { %3135 = vmatprep.subr.bf16.mxu1 %v4434_v33  ;;  %v4630_v33 = vcombine.high %v245_v26, %v277_v29  ;;  %v4629_v35 = vcombine.low %v245_v26, %v277_v29 }
 0x131   :  { %4722 = vmatmul.mubr.msk.bf16.vlgmr.msra.gmra.mrb[56].mxu1 %vm1942_vm0, %v5728_v4  ;;  %4725 = vmatmul.mubr.msk.bf16.vlgmr.msra.gmra.mrb[56].mxu0 %vm1942_vm0, %v5728_v4 }
 0x132   :  { %3136 = vmatpush1.bf16.msra.mxu1 %v4433_v39  ;;  %3167 = vmatprep.mubr.bf16.mxu1 %v5067_v3 }
 0x133   :  { %3137 = vmatprep.subr.bf16.mxu1 %v4498_v41 }
 0x136   :  { %3138 = vmatpush1.bf16.msra.mxu1 %v4497_v45 }
 0x137   :  { %3139 = vmatprep.subr.bf16.mxu1 %v4562_v46 }
 0x13a   :  { %3140 = vmatpush1.bf16.msra.mxu1 %v4561_v50 }
 0x13b   :  { %3141 = vmatprep.subr.bf16.mxu1 %v4626_v53 }
 0x13c   :  { %v6170_v59 = vpop.f32.mrb[16].mxu1  ;;  %v6178_v62 = vpop.f32.mrb[16].mxu0 }
 0x13d   :  { %v6180_v63 = vpop.f32.mrb[17].mxu1  ;;  %v3262_v0 = vmax.f32 %v5917_v52, %v6178_v62  ;;  %v6184_v1 = vpop.f32.mrb[17].mxu0  ;;  %v3869_v52 = vld [vmem:[%s6973_s3 + $0x80] sm:$0xff]  ;;  %v3870_v62 = vld [vmem:[%s6973_s3 + $0x88] sm:$0xff] }
 0x13e   :  { %v2271_v2 = vpop.f32.mrb[18].mxu1  ;;  %3142 = vmatpush1.bf16.msra.mxu1 %v4625_v57  ;;  %v3263_v6 = vmax.f32 %v5919_v55, %v6184_v1  ;;  %v2394_v9 = vpop.f32.mrb[18].mxu0  ;;  %v3853_v55 = vld [vmem:[%s6973_s3] sm:$0xff]  ;;  %v3854_v1 = vld [vmem:[%s6973_s3 + $0x8] sm:$0xff] }
 0x13f   :  { %v2272_v7 = vpop.f32.mrb[19].mxu1  ;;  %3143 = vmatprep.subr.bf16.mxu1 %v4690_v58  ;;  %v2395_v12 = vpop.f32.mrb[19].mxu0 }
 0x142   :  { %3144 = vmatpush1.bf16.msra.mxu1 %v4689_v5 }
 0x143   :  { %3217 = vmatprep.subr.bf16.mxu1 %v4438_v8 }
 0x145   :  { %4724 = vmatmul.mubr.msk.bf16.vlgmr.msra.gmra.mrb[60].mxu1 %vm1942_vm0, %v5728_v4 }
 0x146   :  { %3218 = vmatpush1.bf16.msra.mxu1 %v4437_v13  ;;  %3249 = vmatprep.mubr.bf16.mxu1 %v5067_v3  ;;  %v341_v3 = vld [vmem:[%s6970_s0 + $0x9f8] sm:$0xff] }
 0x147   :  { %3219 = vmatprep.subr.bf16.mxu1 %v4502_v14  ;;  %v4694_v36 = vcombine.high %v309_v34, %v341_v3  ;;  %v4693_v49 = vcombine.low %v309_v34, %v341_v3 }
 0x14a   :  { %3220 = vmatpush1.bf16.msra.mxu1 %v4501_v18 }
 0x14b   :  { %3221 = vmatprep.subr.bf16.mxu1 %v4566_v24 }
 0x14e   :  { %3222 = vmatpush1.bf16.msra.mxu1 %v4565_v30 }
 0x14f   :  { %3223 = vmatprep.subr.bf16.mxu1 %v4630_v33 }
 0x150   :  { %v2349_v38 = vpop.f32.mrb[20].mxu1  ;;  %v2472_v41 = vpop.f32.mrb[20].mxu0 }
 0x151   :  { %v3260_v39 = vmax.f32 %v5975_v31, %v2349_v38  ;;  %v2351_v42 = vpop.f32.mrb[21].mxu1  ;;  %v3266_v43 = vmax.f32 %v5991_v37, %v2472_v41  ;;  %v6218_v46 = vpop.f32.mrb[21].mxu0 }
 0x152   :  { %v3261_v45 = vmax.f32 %v5983_v51, %v2351_v42  ;;  %v2353_v47 = vpop.f32.mrb[22].mxu1  ;;  %3224 = vmatpush1.bf16.msra.mxu1 %v4629_v35  ;;  %v3267_v50 = vmax.f32 %v5993_v40, %v6218_v46  ;;  %v2476_v54 = vpop.f32.mrb[22].mxu0  ;;  %v4903_v42 = vpack.c.bf16 %v3870_v62, %v3869_v52  ;;  %v3874_v52 = vld [vmem:[%s6973_s3 + $0xa8] sm:$0xff] }
 0x153   :  { %v2354_v53 = vpop.f32.mrb[23].mxu1  ;;  %3225 = vmatprep.subr.bf16.mxu1 %v4694_v36  ;;  %v2477_v56 = vpop.f32.mrb[23].mxu0  ;;  %v3902_v54 = vld [vmem:[%s6973_s3 + $0x188] sm:$0xff] }
 0x154   :  { %v4905_v53 = vpack.c.bf16 %v3854_v1, %v3853_v55  ;;  %4904 = vmatprep.subr.bf16.mxu0 %v4903_v42  ;;  %v3905_v55 = vld [vmem:[%s6973_s3 + $0x1a0] sm:$0xff]  ;;  %v3906_v1 = vld [vmem:[%s6973_s3 + $0x1a8] sm:$0xff] }
 0x156   :  { %3226 = vmatpush1.bf16.msra.mxu1 %v4693_v49  ;;  %4906 = vmatpush3.bf16.msra.mxu0 %v4905_v53  ;;  %v3890_v53 = vld [vmem:[%s6973_s3 + $0x128] sm:$0xff] }
 0x159   :  { %4726 = vmatmul.mubr.msk.bf16.vlgmr.msra.gmra.mrb[64].mxu1 %vm1942_vm0, %v5728_v4 }
 0x164   :  { %v6224_v31 = vpop.f32.mrb[24].mxu1  ;;  %v6228_v37 = vpop.f32.mrb[24].mxu0 }
 0x165   :  { %v3264_v51 = vmax.f32 %v6049_v21, %v6224_v31  ;;  %v6230_v57 = vpop.f32.mrb[25].mxu1  ;;  %v3270_v40 = vmax.f32 %v6065_v28, %v6228_v37  ;;  %v6236_v60 = vpop.f32.mrb[25].mxu0 }
 0x166   :  { %v3265_v58 = vmax.f32 %v6057_v25, %v6230_v57  ;;  %v2435_v61 = vpop.f32.mrb[26].mxu1  ;;  %v3271_v4 = vmax.f32 %v6067_v32, %v6236_v60  ;;  %v2558_v5 = vpop.f32.mrb[26].mxu0  ;;  %v3881_v32 = vld [vmem:[%s6973_s3 + $0xe0] sm:$0xff]  ;;  %v3882_v60 = vld [vmem:[%s6973_s3 + $0xe8] sm:$0xff] }
 0x167   :  { %v2436_v2 = vpop.f32.mrb[27].mxu1  ;;  %v2559_v7 = vpop.f32.mrb[27].mxu0  ;;  %v3886_v5 = vld [vmem:[%s6973_s3 + $0x108] sm:$0xff] }
 0x178   :  { %v6240_v8 = vpop.f32.mrb[28].mxu1  ;;  %v2636_v10 = vpop.f32.mrb[28].mxu0 }
 0x179   :  { %v3268_v9 = vmax.f32 %v6123_v15, %v6240_v8  ;;  %v6244_v11 = vpop.f32.mrb[29].mxu1  ;;  %v6249_v12 = vmax.f32 %v3258_v22, %v2636_v10  ;;  %v2638_v14 = vpop.f32.mrb[29].mxu0 }
 0x17a   :  { %v3269_v13 = vmax.f32 %v6133_v20, %v6244_v11  ;;  %v2517_v16 = vpop.f32.mrb[30].mxu1  ;;  %v6256_v17 = vmax.f32 %v3259_v27, %v2638_v14  ;;  %v2640_v24 = vpop.f32.mrb[30].mxu0  ;;  %v3872_v14 = vld [vmem:[%s6973_s3 + $0x98] sm:$0xff] }
 0x17b   :  { %v2518_v18 = vpop.f32.mrb[31].mxu1  ;;  %v2641_v26 = vpop.f32.mrb[31].mxu0  ;;  %v3856_v24 = vld [vmem:[%s6973_s3 + $0x18] sm:$0xff] }
 0x17c   :  { %v3855_v18 = vld [vmem:[%s6973_s3 + $0x10] sm:$0xff] }
 0x17d   :  { %v4909_v26 = vpack.c.bf16 %v3856_v24, %v3855_v18  ;;  %v3877_v24 = vld [vmem:[%s6973_s3 + $0xc0] sm:$0xff] }
 0x18c   :  { %v6258_v29 = vpop.f32.mrb[32].mxu1  ;;  %v2718_v19 = vpop.f32.mrb[32].mxu0 }
 0x18d   :  { %v3272_v44 = vmax.f32 %v6170_v59, %v6258_v29  ;;  %v6262_v22 = vpop.f32.mrb[33].mxu1  ;;  %v6267_v30 = vmax.f32 %v3262_v0, %v2718_v19  ;;  %v2720_v23 = vpop.f32.mrb[33].mxu0  ;;  %v3903_v19 = vld [vmem:[%s6973_s3 + $0x190] sm:$0xff] }
 0x18e   :  { %v3273_v48 = vmax.f32 %v6180_v63, %v6262_v22  ;;  %v2599_v27 = vpop.f32.mrb[34].mxu1  ;;  %v6274_v33 = vmax.f32 %v3263_v6, %v2720_v23  ;;  %v2722_v3 = vpop.f32.mrb[34].mxu0  ;;  %v3904_v23 = vld [vmem:[%s6973_s3 + $0x198] sm:$0xff] }
 0x18f   :  { %v2600_v34 = vpop.f32.mrb[35].mxu1  ;;  %v2723_v35 = vpop.f32.mrb[35].mxu0  ;;  %v4939_v27 = vpack.c.bf16 %v3904_v23, %v3903_v19  ;;  %v3888_v3 = vld [vmem:[%s6973_s3 + $0x118] sm:$0xff]  ;;  %v3861_v23 = vld [vmem:[%s6973_s3 + $0x40] sm:$0xff] }
 0x190   :  { %v3887_v34 = vld [vmem:[%s6973_s3 + $0x110] sm:$0xff] }
 0x191   :  { %v4941_v35 = vpack.c.bf16 %v3888_v3, %v3887_v34  ;;  %v3909_v3 = vld [vmem:[%s6973_s3 + $0x1c0] sm:$0xff] }
 0x1a0   :  { %v2677_v36 = vpop.f32.mrb[36].mxu1  ;;  %v2800_v38 = vpop.f32.mrb[36].mxu0 }
 0x1a1   :  { %v6282_v0 = vmax.f32 %v3260_v39, %v2677_v36  ;;  %v2679_v41 = vpop.f32.mrb[37].mxu1  ;;  %v6290_v6 = vmax.f32 %v3266_v43, %v2800_v38  ;;  %v2802_v47 = vpop.f32.mrb[37].mxu0  ;;  %v3901_v39 = vld [vmem:[%s6973_s3 + $0x180] sm:$0xff] }
 0x1a2   :  { %v6292_v46 = vmax.f32 %v3261_v45, %v2679_v41  ;;  %v2681_v49 = vpop.f32.mrb[38].mxu1  ;;  %v6300_v56 = vmax.f32 %v3267_v50, %v2802_v47  ;;  %v2804_v2 = vpop.f32.mrb[38].mxu0  ;;  %v4935_v43 = vpack.c.bf16 %v3902_v54, %v3901_v39  ;;  %v3885_v45 = vld [vmem:[%s6973_s3 + $0x100] sm:$0xff]  ;;  %v3871_v50 = vld [vmem:[%s6973_s3 + $0x90] sm:$0xff]  ;;  %v3858_v41 = vld [vmem:[%s6973_s3 + $0x28] sm:$0xff]  ;;  %v4943_v47 = vpack.c.bf16 %v3906_v1, %v3905_v55 }
 0x1a3   :  { %v2682_v61 = vpop.f32.mrb[39].mxu1  ;;  %v2805_v7 = vpop.f32.mrb[39].mxu0  ;;  %v4937_v10 = vpack.c.bf16 %v3886_v5, %v3885_v45  ;;  %v4907_v16 = vpack.c.bf16 %v3872_v14, %v3871_v50  ;;  %v3873_v36 = vld [vmem:[%s6973_s3 + $0xa0] sm:$0xff]  ;;  %v3875_v54 = vld [vmem:[%s6973_s3 + $0xb0] sm:$0xff]  ;;  %v3860_v45 = vld [vmem:[%s6973_s3 + $0x38] sm:$0xff] }
 0x1a4   :  { %4936 = vmatprep.subr.bf16.mxu1 %v4935_v43  ;;  %v4911_v62 = vpack.c.bf16 %v3874_v52, %v3873_v36  ;;  %v3857_v38 = vld [vmem:[%s6973_s3 + $0x20] sm:$0xff]  ;;  %v3876_v61 = vld [vmem:[%s6973_s3 + $0xb8] sm:$0xff]  ;;  %v3859_v43 = vld [vmem:[%s6973_s3 + $0x30] sm:$0xff] }
 0x1a5   :  { %4938 = vmatpush3.bf16.msra.mxu1 %v4937_v10  ;;  %4908 = vmatprep.subr.bf16.mxu0 %v4907_v16  ;;  %v4913_v42 = vpack.c.bf16 %v3858_v41, %v3857_v38  ;;  %v3889_v49 = vld [vmem:[%s6973_s3 + $0x120] sm:$0xff]  ;;  %v4915_v2 = vpack.c.bf16 %v3876_v61, %v3875_v54  ;;  %v4917_v5 = vpack.c.bf16 %v3860_v45, %v3859_v43  ;;  %v3907_v7 = vld [vmem:[%s6973_s3 + $0x1b0] sm:$0xff]  ;;  %v3908_v10 = vld [vmem:[%s6973_s3 + $0x1b8] sm:$0xff] }
 0x1a6   :  { %4910 = vmatpush3.bf16.msra.mxu0 %v4909_v26  ;;  %4940 = vmatprep.subr.bf16.mxu1 %v4939_v27  ;;  %v4945_v39 = vpack.c.bf16 %v3890_v53, %v3889_v49  ;;  %v4947_v50 = vpack.c.bf16 %v3908_v10, %v3907_v7  ;;  %v3891_v14 = vld [vmem:[%s6973_s3 + $0x130] sm:$0xff]  ;;  %v3892_v16 = vld [vmem:[%s6973_s3 + $0x138] sm:$0xff]  ;;  %v3878_v26 = vld [vmem:[%s6973_s3 + $0xc8] sm:$0xff] }
 0x1a7   :  { %4912 = vmatprep.subr.bf16.mxu0 %v4911_v62  ;;  %v4949_v18 = vpack.c.bf16 %v3892_v16, %v3891_v14  ;;  %v4919_v19 = vpack.c.bf16 %v3878_v26, %v3877_v24  ;;  %v3862_v27 = vld [vmem:[%s6973_s3 + $0x48] sm:$0xff]  ;;  %v3893_v52 = vld [vmem:[%s6973_s3 + $0x140] sm:$0xff]  ;;  %v3880_v55 = vld [vmem:[%s6973_s3 + $0xd8] sm:$0xff] }
 0x1a8   :  { %v4921_v34 = vpack.c.bf16 %v3862_v27, %v3861_v23  ;;  %v3894_v62 = vld [vmem:[%s6973_s3 + $0x148] sm:$0xff]  ;;  %v3864_v54 = vld [vmem:[%s6973_s3 + $0x58] sm:$0xff]  ;;  %v3911_v43 = vld [vmem:[%s6973_s3 + $0x1d0] sm:$0xff] }
 0x1a9   :  { %4942 = vmatpush3.bf16.msra.mxu1 %v4941_v35  ;;  %v3910_v35 = vld [vmem:[%s6973_s3 + $0x1c8] sm:$0xff]  ;;  %v4953_v41 = vpack.c.bf16 %v3894_v62, %v3893_v52  ;;  %v3912_v45 = vld [vmem:[%s6973_s3 + $0x1d8] sm:$0xff]  ;;  %v3865_v10 = vld [vmem:[%s6973_s3 + $0x60] sm:$0xff] }
 0x1aa   :  { %4914 = vmatpush3.bf16.msra.mxu0 %v4913_v42  ;;  %4944 = vmatprep.subr.bf16.mxu1 %v4943_v47  ;;  %v4951_v36 = vpack.c.bf16 %v3910_v35, %v3909_v3  ;;  %v3879_v42 = vld [vmem:[%s6973_s3 + $0xd0] sm:$0xff]  ;;  %v4955_v57 = vpack.c.bf16 %v3912_v45, %v3911_v43  ;;  %v3913_v16 = vld [vmem:[%s6973_s3 + $0x1e0] sm:$0xff]  ;;  %v3350_v45 = vlaneseq }
 0x1ab   :  { %4916 = vmatprep.subr.bf16.mxu0 %v4915_v2  ;;  %v4923_v53 = vpack.c.bf16 %v3880_v55, %v3879_v42  ;;  %v3897_v26 = vld [vmem:[%s6973_s3 + $0x160] sm:$0xff]  ;;  %v3883_v27 = vld [vmem:[%s6973_s3 + $0xf0] sm:$0xff]  ;;  %v3900_v55 = vld [vmem:[%s6973_s3 + $0x178] sm:$0xff] }
 0x1ac   :  { %v3867_v35 = vld [vmem:[%s6973_s3 + $0x70] sm:$0xff]  ;;  %vm6528_vm1 = vcmp.lt.s32.totalorder %v3350_v45, 256 }
 0x1ad   :  { %4946 = vmatpush3.bf16.msra.mxu1 %v4945_v39  ;;  %v3863_v39 = vld [vmem:[%s6973_s3 + $0x50] sm:$0xff] }
 0x1ae   :  { %4918 = vmatpush3.bf16.msra.mxu0 %v4917_v5  ;;  %4948 = vmatprep.subr.bf16.mxu1 %v4947_v50  ;;  %v4925_v2 = vpack.c.bf16 %v3864_v54, %v3863_v39  ;;  %v3866_v50 = vld [vmem:[%s6973_s3 + $0x68] sm:$0xff]  ;;  %v3915_v62 = vld [vmem:[%s6973_s3 + $0x1f0] sm:$0xff]  ;;  %v3965_v54 = vld [vmem:[%s6973_s3 + $0x380] sm:$0xff] }
 0x1af   :  { %4920 = vmatprep.subr.bf16.mxu0 %v4919_v19  ;;  %v4929_v14 = vpack.c.bf16 %v3866_v50, %v3865_v10  ;;  %v3898_v19 = vld [vmem:[%s6973_s3 + $0x168] sm:$0xff] }
 0x1b0   :  { %v4961_v23 = vpack.c.bf16 %v3898_v19, %v3897_v26 }
 0x1b1   :  { %4950 = vmatpush3.bf16.msra.mxu1 %v4949_v18  ;;  %v3914_v18 = vld [vmem:[%s6973_s3 + $0x1e8] sm:$0xff] }
 0x1b2   :  { %4922 = vmatpush3.bf16.msra.mxu0 %v4921_v34  ;;  %4952 = vmatprep.subr.bf16.mxu1 %v4951_v36  ;;  %v4959_v24 = vpack.c.bf16 %v3914_v18, %v3913_v16  ;;  %v3884_v34 = vld [vmem:[%s6973_s3 + $0xf8] sm:$0xff]  ;;  %v3351_v16 = vshrl.u32 %v3350_v45, 7 }
 0x1b3   :  { %4924 = vmatprep.subr.bf16.mxu0 %v4923_v53  ;;  %v4931_v3 = vpack.c.bf16 %v3884_v34, %v3883_v27  ;;  %v3868_v36 = vld [vmem:[%s6973_s3 + $0x78] sm:$0xff]  ;;  %v3934_v53 = vld [vmem:[%s6973_s3 + $0x288] sm:$0xff] }
 0x1b4   :  { %v2759_v38 = vpop.f32.mrb[40].mxu1  ;;  %v2882_v47 = vpop.f32.mrb[40].mxu0  ;;  %v4933_v52 = vpack.c.bf16 %v3868_v36, %v3867_v35 }
 0x1b5   :  { %v6413_v1 = vmax.f32 %v3264_v51, %v2759_v38  ;;  %v2761_v49 = vpop.f32.mrb[41].mxu1  ;;  %v6424_v61 = vmax.f32 %v3270_v40, %v2882_v47  ;;  %v2884_v31 = vpop.f32.mrb[41].mxu0  ;;  %4954 = vmatpush3.bf16.msra.mxu1 %v4953_v41  ;;  %v3895_v40 = vld [vmem:[%s6973_s3 + $0x150] sm:$0xff]  ;;  %v3916_v38 = vld [vmem:[%s6973_s3 + $0x1f8] sm:$0xff] }
 0x1b6   :  { %v6429_v21 = vmax.f32 %v3265_v58, %v2761_v49  ;;  %v2763_v51 = vpop.f32.mrb[42].mxu1  ;;  %v6440_v28 = vmax.f32 %v3271_v4, %v2884_v31  ;;  %v2886_v37 = vpop.f32.mrb[42].mxu0  ;;  %v3896_v58 = vld [vmem:[%s6973_s3 + $0x158] sm:$0xff]  ;;  %4926 = vmatpush3.bf16.msra.mxu0 %v4925_v2  ;;  %4956 = vmatprep.subr.bf16.mxu1 %v4955_v57  ;;  %v4927_v4 = vpack.c.bf16 %v3882_v60, %v3881_v32  ;;  %v3899_v41 = vld [vmem:[%s6973_s3 + $0x170] sm:$0xff]  ;;  %v3933_v49 = vld [vmem:[%s6973_s3 + $0x280] sm:$0xff] }
 0x1b7   :  { %v2764_v25 = vpop.f32.mrb[43].mxu1  ;;  %v2887_v5 = vpop.f32.mrb[43].mxu0  ;;  %v4957_v7 = vpack.c.bf16 %v3896_v58, %v3895_v40  ;;  %v4963_v42 = vpack.c.bf16 %v3916_v38, %v3915_v62  ;;  %v4965_v47 = vpack.c.bf16 %v3900_v55, %v3899_v41  ;;  %v4967_v39 = vpack.c.bf16 %v3934_v53, %v3933_v49  ;;  %v3966_v31 = vld [vmem:[%s6973_s3 + $0x388] sm:$0xff] }
 0x1b8   :  { %4928 = vmatprep.subr.bf16.mxu0 %v4927_v4  ;;  %v4999_v51 = vpack.c.bf16 %v3966_v31, %v3965_v54  ;;  %v5068_v2 = vmov 1966171168   ;;  %v6508_v37 = vpop.permute.xlu0 %3309 }
 0x1b9   :  { %4958 = vmatpush3.bf16.msra.mxu1 %v4957_v7  ;;  %v3348_v43 = vunpack.c.l.s4 %v5068_v2 }
 0x1ba   :  { %4930 = vmatpush3.bf16.msra.mxu0 %v4929_v14  ;;  %4960 = vmatprep.subr.bf16.mxu1 %v4959_v24 }
 0x1bb   :  { %4932 = vmatprep.subr.bf16.mxu0 %v4931_v3  ;;  %v3349_v14 = vunpack.c.0.s8 %v3348_v43 }
 0x1bd   :  { %4962 = vmatpush3.bf16.msra.mxu1 %v4961_v23 }
 0x1be   :  { %4934 = vmatpush3.bf16.msra.mxu0 %v4933_v52  ;;  %4964 = vmatprep.subr.bf16.mxu1 %v4963_v42 }
 0x1bf   :  { %4968 = vmatprep.subr.bf16.mxu0 %v4967_v39 }
 0x1c1   :  { %4966 = vmatpush3.bf16.msra.mxu1 %v4965_v47 }
 0x1c2   :  { %5000 = vmatprep.subr.bf16.mxu1 %v4999_v51 }
 0x1c8   :  { %v2841_v25 = vpop.f32.mrb[44].mxu1  ;;  %v2964_v40 = vpop.f32.mrb[44].mxu0 }
 0x1c9   :  { %v6513_v57 = vmax.f32 %v3268_v9, %v2841_v25  ;;  %v2843_v58 = vpop.f32.mrb[45].mxu1  ;;  %v3290_v5 = vmax.f32 %v6249_v12, %v2964_v40  ;;  %v2966_v32 = vpop.f32.mrb[45].mxu0  ;;  %v6524_v12 = vsub.s32 %v3349_v14, %v3351_v16 }
 0x1ca   :  { %v6519_v7 = vmax.f32 %v3269_v13, %v2843_v58  ;;  %v2845_v60 = vpop.f32.mrb[46].mxu1  ;;  %v3291_v4 = vmax.f32 %v6256_v17, %v2966_v32  ;;  %v2968_v50 = vpop.f32.mrb[46].mxu0  ;;  %v3919_v17 = vld [vmem:[%s6973_s3 + $0x210] sm:$0xff] }
 0x1cb   :  { %v2846_v10 = vpop.f32.mrb[47].mxu1  ;;  %v2969_v15 = vpop.f32.mrb[47].mxu0  ;;  %v3312_v8 = vadd.f32 %v6508_v37, %v3290_v5 }
 0x1cc   :  { %v3313_v9 = vadd.f32 %v6508_v37, %v3291_v4 }
 0x1cd   :  { %v3328_v18 = vmax.f32 %v3312_v8, 0.0 }
 0x1ce   :  { %v3329_v24 = vmax.f32 %v3313_v9, 0.0 }
 0x1d0   :  { %v3346_v20 = vcombine.low %v3328_v18, %v3329_v24  ;;  %v3390_v11 = vcombine.high %v3328_v18, %v3329_v24 }
 0x1d2   :  { %v3353_v13 = vrot.slane %v3346_v20, %v6524_v12  ;;  %v3397_v26 = vrot.slane %v3390_v11, %v6524_v12 }
 0x1d4   :  { %v3360_v19 = vrot.slane %v3353_v13, %v6524_v12  ;;  %v3368_v23 = vcombine.high %v3353_v13, %v3353_v13  ;;  %v3404_v27 = vrot.slane %v3397_v26, %v6524_v12 }
 0x1d6   :  { %3366 = vst.msk [vmem:[#allocation2] ss:$8 sm:$0x3] %vm6528_vm1, %v3360_v19  ;;  %v3375_v34 = vrot.slane %v3368_v23, %v6524_v12  ;;  %v3380_v3 = vcombine.high %v3360_v19, %v3360_v19  ;;  %3407 = vst.msk [vmem:[#allocation2 + $0x40] ss:$8 sm:$0x3] %vm6528_vm1, %v3404_v27 }
 0x1d8   :  { %3378 = vst.msk [vmem:[#allocation2 + $0x10] ss:$8 sm:$0x3] %vm6528_vm1, %v3375_v34  ;;  %3383 = vst.msk [vmem:[#allocation2 + $0x20] ss:$8 sm:$0x3] %vm6528_vm1, %v3380_v3  ;;  %v3385_v35 = vcombine.high %v3375_v34, %v3375_v34 }
 0x1da   :  { %3388 = vst.msk [vmem:[#allocation2 + $0x30] ss:$8 sm:$0x3] %vm6528_vm1, %v3385_v35 }
 0x1dc   :  { %v2923_v36 = vpop.f32.mrb[48].mxu1  ;;  %v3046_v62 = vpop.f32.mrb[48].mxu0 }
 0x1dd   :  { %v6548_v52 = vmax.f32 %v3272_v44, %v2923_v36  ;;  %v2925_v38 = vpop.f32.mrb[49].mxu1  ;;  %v3294_v41 = vmax.f32 %v6267_v30, %v3046_v62  ;;  %v3048_v55 = vpop.f32.mrb[49].mxu0 }
 0x1de   :  { %v6554_v42 = vmax.f32 %v3273_v48, %v2925_v38  ;;  %v2927_v47 = vpop.f32.mrb[50].mxu1  ;;  %v3295_v49 = vmax.f32 %v6274_v33, %v3048_v55  ;;  %v3050_v39 = vpop.f32.mrb[50].mxu0 }
 0x1df   :  { %v2928_v53 = vpop.f32.mrb[51].mxu1  ;;  %v3316_v54 = vadd.f32 %v6508_v37, %v3294_v41  ;;  %v3051_v59 = vpop.f32.mrb[51].mxu0 }
 0x1e0   :  { %v3317_v29 = vadd.f32 %v6508_v37, %v3295_v49 }
 0x1e1   :  { %v3332_v44 = vmax.f32 %v3316_v54, 0.0 }
 0x1e2   :  { %v3333_v31 = vmax.f32 %v3317_v29, 0.0 }
 0x1e4   :  { %v3473_v51 = vcombine.low %v3332_v44, %v3333_v31  ;;  %v3514_v30 = vcombine.high %v3332_v44, %v3333_v31 }
 0x1e6   :  { %v3480_v2 = vrot.slane %v3473_v51, %v6524_v12  ;;  %v3521_v63 = vrot.slane %v3514_v30, %v6524_v12 }
 0x1e8   :  { %v3487_v22 = vrot.slane %v3480_v2, %v6524_v12  ;;  %v3492_v48 = vcombine.high %v3480_v2, %v3480_v2  ;;  %v3528_v33 = vrot.slane %v3521_v63, %v6524_v12 }
 0x1ea   :  { %3490 = vst.msk [vmem:[#allocation2 + $0x2] ss:$8 sm:$0x3] %vm6528_vm1, %v3487_v22  ;;  %v3499_v43 = vrot.slane %v3492_v48, %v6524_v12  ;;  %v3504_v45 = vcombine.high %v3487_v22, %v3487_v22  ;;  %3531 = vst.msk [vmem:[#allocation2 + $0x42] ss:$8 sm:$0x3] %vm6528_vm1, %v3528_v33 }
 0x1ec   :  { %3502 = vst.msk [vmem:[#allocation2 + $0x12] ss:$8 sm:$0x3] %vm6528_vm1, %v3499_v43  ;;  %3507 = vst.msk [vmem:[#allocation2 + $0x22] ss:$8 sm:$0x3] %vm6528_vm1, %v3504_v45  ;;  %v3509_v25 = vcombine.high %v3499_v43, %v3499_v43 }
 0x1ee   :  { %3512 = vst.msk [vmem:[#allocation2 + $0x32] ss:$8 sm:$0x3] %vm6528_vm1, %v3509_v25 }
 0x1f0   :  { %v3005_v40 = vpop.f32.mrb[52].mxu1  ;;  %v3128_v5 = vpop.f32.mrb[52].mxu0 }
 0x1f1   :  { %v3292_v58 = vmax.f32 %v6282_v0, %v3005_v40  ;;  %v3007_v32 = vpop.f32.mrb[53].mxu1  ;;  %v3298_v60 = vmax.f32 %v6290_v6, %v3128_v5  ;;  %v3130_v10 = vpop.f32.mrb[53].mxu0 }
 0x1f2   :  { %v3293_v4 = vmax.f32 %v6292_v46, %v3007_v32  ;;  %v3009_v50 = vpop.f32.mrb[54].mxu1  ;;  %v3299_v16 = vmax.f32 %v6300_v56, %v3130_v10  ;;  %v3132_v8 = vpop.f32.mrb[54].mxu0 }
 0x1f3   :  { %v3314_v14 = vadd.f32 %v6508_v37, %v3292_v58  ;;  %v3010_v15 = vpop.f32.mrb[55].mxu1  ;;  %v3320_v9 = vadd.f32 %v6508_v37, %v3298_v60  ;;  %v3133_v24 = vpop.f32.mrb[55].mxu0 }
 0x1f4   :  { %v3315_v18 = vadd.f32 %v6508_v37, %v3293_v4  ;;  %v3321_v20 = vadd.f32 %v6508_v37, %v3299_v16 }
 0x1f5   :  { %v3330_v0 = vmax.f32 %v3314_v14, 0.0  ;;  %v3336_v11 = vmax.f32 %v3320_v9, 0.0 }
 0x1f6   :  { %v3331_v6 = vmax.f32 %v3315_v18, 0.0  ;;  %v3337_v13 = vmax.f32 %v3321_v20, 0.0 }
 0x1f8   :  { %v3411_v46 = vcombine.low %v3330_v0, %v3331_v6  ;;  %v3452_v26 = vcombine.high %v3330_v0, %v3331_v6  ;;  %v3597_v19 = vcombine.low %v3336_v11, %v3337_v13  ;;  %v3638_v23 = vcombine.high %v3336_v11, %v3337_v13 }
 0x1fa   :  { %v3418_v27 = vrot.slane %v3411_v46, %v6524_v12  ;;  %v3459_v56 = vrot.slane %v3452_v26, %v6524_v12  ;;  %v3604_v34 = vrot.slane %v3597_v19, %v6524_v12  ;;  %v3645_v3 = vrot.slane %v3638_v23, %v6524_v12 }
 0x1fc   :  { %v3425_v35 = vrot.slane %v3418_v27, %v6524_v12  ;;  %v3430_v36 = vcombine.high %v3418_v27, %v3418_v27  ;;  %v3466_v62 = vrot.slane %v3459_v56, %v6524_v12  ;;  %v3611_v38 = vrot.slane %v3604_v34, %v6524_v12 }
 0x1fd   :  { %v3616_v41 = vcombine.high %v3604_v34, %v3604_v34  ;;  %v3652_v55 = vrot.slane %v3645_v3, %v6524_v12 }
 0x1fe   :  { %3428 = vst.msk [vmem:[#allocation2 + $0x1] ss:$8 sm:$0x3] %vm6528_vm1, %v3425_v35  ;;  %v3437_v47 = vrot.slane %v3430_v36, %v6524_v12  ;;  %v3442_v49 = vcombine.high %v3425_v35, %v3425_v35  ;;  %3469 = vst.msk [vmem:[#allocation2 + $0x41] ss:$8 sm:$0x3] %vm6528_vm1, %v3466_v62  ;;  %v3628_v39 = vcombine.high %v3611_v38, %v3611_v38 }
 0x1ff   :  { %3614 = vst.msk [vmem:[#allocation2 + $0x4] ss:$8 sm:$0x3] %vm6528_vm1, %v3611_v38  ;;  %v3623_v53 = vrot.slane %v3616_v41, %v6524_v12  ;;  %3655 = vst.msk [vmem:[#allocation2 + $0x44] ss:$8 sm:$0x3] %vm6528_vm1, %v3652_v55 }
 0x200   :  { %3440 = vst.msk [vmem:[#allocation2 + $0x11] ss:$8 sm:$0x3] %vm6528_vm1, %v3437_v47  ;;  %3445 = vst.msk [vmem:[#allocation2 + $0x21] ss:$8 sm:$0x3] %vm6528_vm1, %v3442_v49  ;;  %v3447_v54 = vcombine.high %v3437_v47, %v3437_v47 }
 0x201   :  { %3626 = vst.msk [vmem:[#allocation2 + $0x14] ss:$8 sm:$0x3] %vm6528_vm1, %v3623_v53  ;;  %3631 = vst.msk [vmem:[#allocation2 + $0x24] ss:$8 sm:$0x3] %vm6528_vm1, %v3628_v39  ;;  %v3633_v59 = vcombine.high %v3623_v53, %v3623_v53 }
 0x202   :  { %3450 = vst.msk [vmem:[#allocation2 + $0x31] ss:$8 sm:$0x3] %vm6528_vm1, %v3447_v54 }
 0x203   :  { %3636 = vst.msk [vmem:[#allocation2 + $0x34] ss:$8 sm:$0x3] %vm6528_vm1, %v3633_v59 }
 0x204   :  { %v3087_v29 = vpop.f32.mrb[56].mxu1  ;;  %v3210_v31 = vpop.f32.mrb[56].mxu0 }
 0x205   :  { %v3296_v44 = vmax.f32 %v6413_v1, %v3087_v29  ;;  %v3089_v51 = vpop.f32.mrb[57].mxu1  ;;  %v3302_v30 = vmax.f32 %v6424_v61, %v3210_v31  ;;  %v3212_v63 = vpop.f32.mrb[57].mxu0 }
 0x206   :  { %v3297_v2 = vmax.f32 %v6429_v21, %v3089_v51  ;;  %v3091_v22 = vpop.f32.mrb[58].mxu1  ;;  %v3303_v33 = vmax.f32 %v6440_v28, %v3212_v63  ;;  %v3214_v45 = vpop.f32.mrb[58].mxu0 }
 0x207   :  { %v3318_v48 = vadd.f32 %v6508_v37, %v3296_v44  ;;  %v3092_v43 = vpop.f32.mrb[59].mxu1  ;;  %v3324_v25 = vadd.f32 %v6508_v37, %v3302_v30  ;;  %v3215_v58 = vpop.f32.mrb[59].mxu0 }
 0x208   :  { %v3319_v40 = vadd.f32 %v6508_v37, %v3297_v2  ;;  %v3325_v5 = vadd.f32 %v6508_v37, %v3303_v33 }
 0x209   :  { %v3334_v1 = vmax.f32 %v3318_v48, 0.0  ;;  %v3340_v32 = vmax.f32 %v3324_v25, 0.0 }
 0x20a   :  { %v3335_v61 = vmax.f32 %v3319_v40, 0.0  ;;  %v3341_v60 = vmax.f32 %v3325_v5, 0.0 }
 0x20c   :  { %v3535_v21 = vcombine.low %v3334_v1, %v3335_v61  ;;  %v3576_v4 = vcombine.high %v3334_v1, %v3335_v61  ;;  %v3721_v10 = vcombine.low %v3340_v32, %v3341_v60  ;;  %v3762_v50 = vcombine.high %v3340_v32, %v3341_v60  ;;  %v3917_v61 = vld [vmem:[%s6973_s3 + $0x200] sm:$0xff]  ;;  %v3918_v60 = vld [vmem:[%s6973_s3 + $0x208] sm:$0xff] }
 0x20e   :  { %v3542_v14 = vrot.slane %v3535_v21, %v6524_v12  ;;  %v3583_v28 = vrot.slane %v3576_v4, %v6524_v12  ;;  %v3728_v16 = vrot.slane %v3721_v10, %v6524_v12  ;;  %v3769_v15 = vrot.slane %v3762_v50, %v6524_v12  ;;  %v3950_v21 = vld [vmem:[%s6973_s3 + $0x308] sm:$0xff]  ;;  %v3935_v4 = vld [vmem:[%s6973_s3 + $0x290] sm:$0xff]  ;;  %v3936_v10 = vld [vmem:[%s6973_s3 + $0x298] sm:$0xff] }
 0x20f   :  { %v4969_v50 = vpack.c.bf16 %v3918_v60, %v3917_v61  ;;  %v3927_v61 = vld [vmem:[%s6973_s3 + $0x250] sm:$0xff]  ;;  %v3928_v60 = vld [vmem:[%s6973_s3 + $0x258] sm:$0xff] }
 0x210   :  { %v3549_v8 = vrot.slane %v3542_v14, %v6524_v12  ;;  %v3554_v9 = vcombine.high %v3542_v14, %v3542_v14  ;;  %v3590_v18 = vrot.slane %v3583_v28, %v6524_v12  ;;  %v3735_v24 = vrot.slane %v3728_v16, %v6524_v12  ;;  %v3920_v14 = vld [vmem:[%s6973_s3 + $0x218] sm:$0xff]  ;;  %v3967_v28 = vld [vmem:[%s6973_s3 + $0x390] sm:$0xff] }
 0x211   :  { %v3740_v0 = vcombine.high %v3728_v16, %v3728_v16  ;;  %v3776_v20 = vrot.slane %v3769_v15, %v6524_v12  ;;  %v3968_v16 = vld [vmem:[%s6973_s3 + $0x398] sm:$0xff] }
 0x212   :  { %3552 = vst.msk [vmem:[#allocation2 + $0x3] ss:$8 sm:$0x3] %vm6528_vm1, %v3549_v8  ;;  %v3561_v11 = vrot.slane %v3554_v9, %v6524_v12  ;;  %v3566_v6 = vcombine.high %v3549_v8, %v3549_v8  ;;  %3593 = vst.msk [vmem:[#allocation2 + $0x43] ss:$8 sm:$0x3] %vm6528_vm1, %v3590_v18  ;;  %v3752_v46 = vcombine.high %v3735_v24, %v3735_v24 }
 0x213   :  { %3738 = vst.msk [vmem:[#allocation2 + $0x6] ss:$8 sm:$0x3] %vm6528_vm1, %v3735_v24  ;;  %v3747_v13 = vrot.slane %v3740_v0, %v6524_v12  ;;  %3779 = vst.msk [vmem:[#allocation2 + $0x46] ss:$8 sm:$0x3] %vm6528_vm1, %v3776_v20  ;;  %v4971_v24 = vpack.c.bf16 %v3936_v10, %v3935_v4 }
 0x214   :  { %3564 = vst.msk [vmem:[#allocation2 + $0x13] ss:$8 sm:$0x3] %vm6528_vm1, %v3561_v11  ;;  %3569 = vst.msk [vmem:[#allocation2 + $0x23] ss:$8 sm:$0x3] %vm6528_vm1, %v3566_v6  ;;  %v3571_v26 = vcombine.high %v3561_v11, %v3561_v11 }
 0x215   :  { %3750 = vst.msk [vmem:[#allocation2 + $0x16] ss:$8 sm:$0x3] %vm6528_vm1, %v3747_v13  ;;  %3755 = vst.msk [vmem:[#allocation2 + $0x26] ss:$8 sm:$0x3] %vm6528_vm1, %v3752_v46  ;;  %v3757_v19 = vcombine.high %v3747_v13, %v3747_v13 }
 0x216   :  { %3574 = vst.msk [vmem:[#allocation2 + $0x33] ss:$8 sm:$0x3] %vm6528_vm1, %v3571_v26  ;;  %v3951_v9 = vld [vmem:[%s6973_s3 + $0x310] sm:$0xff]  ;;  %v3952_v0 = vld [vmem:[%s6973_s3 + $0x318] sm:$0xff]  ;;  %v3937_v20 = vld [vmem:[%s6973_s3 + $0x2a0] sm:$0xff]  ;;  %v5003_v26 = vpack.c.bf16 %v3968_v16, %v3967_v28 }
 0x217   :  { %3760 = vst.msk [vmem:[#allocation2 + $0x36] ss:$8 sm:$0x3] %vm6528_vm1, %v3757_v19  ;;  %v3938_v11 = vld [vmem:[%s6973_s3 + $0x2a8] sm:$0xff]  ;;  %v4973_v19 = vpack.c.bf16 %v3920_v14, %v3919_v17  ;;  %v3959_v17 = vld [vmem:[%s6973_s3 + $0x350] sm:$0xff]  ;;  %v4989_v14 = vpack.c.bf16 %v3928_v60, %v3927_v61  ;;  %v3977_v28 = vld [vmem:[%s6973_s3 + $0x3e0] sm:$0xff] }
 0x218   :  { %v3169_v23 = vpop.f32.mrb[60].mxu1  ;;  %v3946_v4 = vld [vmem:[%s6973_s3 + $0x2e8] sm:$0xff]  ;;  %v4007_v61 = vld [vmem:[%s6973_s3 + $0x4d0] sm:$0xff]  ;;  %v4008_v60 = vld [vmem:[%s6973_s3 + $0x4d8] sm:$0xff] }
 0x219   :  { %v3300_v27 = vmax.f32 %v6513_v57, %v3169_v23  ;;  %v3171_v56 = vpop.f32.mrb[61].mxu1  ;;  %v3969_v23 = vld [vmem:[%s6973_s3 + $0x3a0] sm:$0xff]  ;;  %v3978_v16 = vld [vmem:[%s6973_s3 + $0x3e8] sm:$0xff] }
 0x21a   :  { %v3301_v34 = vmax.f32 %v6519_v7, %v3171_v56  ;;  %v3173_v3 = vpop.f32.mrb[62].mxu1 }
 0x21b   :  { %v3322_v35 = vadd.f32 %v6508_v37, %v3300_v27  ;;  %v3174_v36 = vpop.f32.mrb[63].mxu1  ;;  %v3970_v27 = vld [vmem:[%s6973_s3 + $0x3a8] sm:$0xff]  ;;  %v3921_v3 = vld [vmem:[%s6973_s3 + $0x220] sm:$0xff] }
 0x21c   :  { %v3323_v62 = vadd.f32 %v6508_v37, %v3301_v34  ;;  %v4975_v34 = vpack.c.bf16 %v3938_v11, %v3937_v20  ;;  %v5005_v36 = vpack.c.bf16 %v3952_v0, %v3951_v9  ;;  %v3930_v9 = vld [vmem:[%s6973_s3 + $0x268] sm:$0xff]  ;;  %v3948_v0 = vld [vmem:[%s6973_s3 + $0x2f8] sm:$0xff]  ;;  %v5023_v20 = vpack.c.bf16 %v3978_v16, %v3977_v28  ;;  %v3961_v11 = vld [vmem:[%s6973_s3 + $0x360] sm:$0xff] }
 0x21d   :  { %v3338_v38 = vmax.f32 %v3322_v35, 0.0  ;;  %v3922_v35 = vld [vmem:[%s6973_s3 + $0x228] sm:$0xff]  ;;  %v3993_v16 = vld [vmem:[%s6973_s3 + $0x460] sm:$0xff] }
 0x21e   :  { %v3339_v41 = vmax.f32 %v3323_v62, 0.0  ;;  %v3939_v62 = vld [vmem:[%s6973_s3 + $0x2b0] sm:$0xff] }
 0x220   :  { %v3659_v55 = vcombine.low %v3338_v38, %v3339_v41  ;;  %v3700_v47 = vcombine.high %v3338_v38, %v3339_v41  ;;  %v3940_v38 = vld [vmem:[%s6973_s3 + $0x2b8] sm:$0xff]  ;;  %v5007_v41 = vpack.c.bf16 %v3970_v27, %v3969_v23  ;;  %v3931_v23 = vld [vmem:[%s6973_s3 + $0x270] sm:$0xff] }
 0x221   :  { %v3932_v27 = vld [vmem:[%s6973_s3 + $0x278] sm:$0xff] }
 0x222   :  { %v3666_v49 = vrot.slane %v3659_v55, %v6524_v12  ;;  %v3707_v53 = vrot.slane %v3700_v47, %v6524_v12  ;;  %v3953_v55 = vld [vmem:[%s6973_s3 + $0x320] sm:$0xff]  ;;  %v3954_v47 = vld [vmem:[%s6973_s3 + $0x328] sm:$0xff] }
 0x224   :  { %v3673_v39 = vrot.slane %v3666_v49, %v6524_v12  ;;  %v3678_v57 = vcombine.high %v3666_v49, %v3666_v49  ;;  %v3714_v54 = vrot.slane %v3707_v53, %v6524_v12  ;;  %v4977_v49 = vpack.c.bf16 %v3922_v35, %v3921_v3  ;;  %v3971_v53 = vld [vmem:[%s6973_s3 + $0x3b0] sm:$0xff]  ;;  %v3998_v3 = vld [vmem:[%s6973_s3 + $0x488] sm:$0xff] }
 0x226   :  { %3676 = vst.msk [vmem:[#allocation2 + $0x5] ss:$8 sm:$0x3] %vm6528_vm1, %v3673_v39  ;;  %v3685_v7 = vrot.slane %v3678_v57, %v6524_v12  ;;  %v3690_v59 = vcombine.high %v3673_v39, %v3673_v39  ;;  %3717 = vst.msk [vmem:[#allocation2 + $0x45] ss:$8 sm:$0x3] %vm6528_vm1, %v3714_v54  ;;  %v4979_v57 = vpack.c.bf16 %v3940_v38, %v3939_v62 }
 0x227   :  { %v3972_v39 = vld [vmem:[%s6973_s3 + $0x3b8] sm:$0xff]  ;;  %v3923_v54 = vld [vmem:[%s6973_s3 + $0x230] sm:$0xff]  ;;  %v4997_v38 = vpack.c.bf16 %v3932_v27, %v3931_v23 }
 0x228   :  { %3688 = vst.msk [vmem:[#allocation2 + $0x15] ss:$8 sm:$0x3] %vm6528_vm1, %v3685_v7  ;;  %3693 = vst.msk [vmem:[#allocation2 + $0x25] ss:$8 sm:$0x3] %vm6528_vm1, %v3690_v59  ;;  %v3695_v29 = vcombine.high %v3685_v7, %v3685_v7  ;;  %v5009_v59 = vpack.c.bf16 %v3954_v47, %v3953_v55 }
 0x229   :  { %v3924_v7 = vld [vmem:[%s6973_s3 + $0x238] sm:$0xff]  ;;  %v3981_v55 = vld [vmem:[%s6973_s3 + $0x400] sm:$0xff]  ;;  %v3982_v47 = vld [vmem:[%s6973_s3 + $0x408] sm:$0xff] }
 0x22a   :  { %3698 = vst.msk [vmem:[#allocation2 + $0x35] ss:$8 sm:$0x3] %vm6528_vm1, %v3695_v29  ;;  %v3941_v29 = vld [vmem:[%s6973_s3 + $0x2c0] sm:$0xff]  ;;  %v3964_v62 = vld [vmem:[%s6973_s3 + $0x378] sm:$0xff] }
 0x22c   :  { %v3251_v44 = vpop.f32.mrb[64].mxu1 }
 0x22d   :  { %v3304_v31 = vmax.f32 %v6548_v52, %v3251_v44  ;;  %v3253_v51 = vpop.f32.mrb[65].mxu1  ;;  %v3942_v44 = vld [vmem:[%s6973_s3 + $0x2c8] sm:$0xff] }
 0x22e   :  { %v3305_v30 = vmax.f32 %v6554_v42, %v3253_v51  ;;  %v3255_v2 = vpop.f32.mrb[66].mxu1  ;;  %v3955_v51 = vld [vmem:[%s6973_s3 + $0x330] sm:$0xff] }
 0x22f   :  { %v3326_v63 = vadd.f32 %v6508_v37, %v3304_v31  ;;  %v3256_v22 = vpop.f32.mrb[67].mxu1  ;;  %v5011_v31 = vpack.c.bf16 %v3972_v39, %v3971_v53  ;;  %v4981_v2 = vpack.c.bf16 %v3924_v7, %v3923_v54  ;;  %v3999_v53 = vld [vmem:[%s6973_s3 + $0x490] sm:$0xff]  ;;  %v4000_v39 = vld [vmem:[%s6973_s3 + $0x498] sm:$0xff] }
 0x230   :  { %v3327_v48 = vadd.f32 %v6508_v37, %v3305_v30  ;;  %v3956_v30 = vld [vmem:[%s6973_s3 + $0x338] sm:$0xff]  ;;  %v3974_v22 = vld [vmem:[%s6973_s3 + $0x3c8] sm:$0xff]  ;;  %v5035_v54 = vpack.c.bf16 %v4000_v39, %v3999_v53  ;;  %v3983_v7 = vld [vmem:[%s6973_s3 + $0x410] sm:$0xff] }
 0x231   :  { %v3342_v33 = vmax.f32 %v3326_v63, 0.0  ;;  %v3973_v63 = vld [vmem:[%s6973_s3 + $0x3c0] sm:$0xff] }
 0x232   :  { %v3343_v43 = vmax.f32 %v3327_v48, 0.0  ;;  %v4983_v48 = vpack.c.bf16 %v3942_v44, %v3941_v29  ;;  %v4001_v44 = vld [vmem:[%s6973_s3 + $0x4a0] sm:$0xff] }
 0x234   :  { %v3783_v45 = vcombine.low %v3342_v33, %v3343_v43  ;;  %v3824_v25 = vcombine.high %v3342_v33, %v3343_v43  ;;  %v3925_v33 = vld [vmem:[%s6973_s3 + $0x240] sm:$0xff]  ;;  %v3926_v43 = vld [vmem:[%s6973_s3 + $0x248] sm:$0xff] }
 0x236   :  { %v3790_v40 = vrot.slane %v3783_v45, %v6524_v12  ;;  %v3831_v58 = vrot.slane %v3824_v25, %v6524_v12  ;;  %v5013_v45 = vpack.c.bf16 %v3956_v30, %v3955_v51  ;;  %v3943_v25 = vld [vmem:[%s6973_s3 + $0x2d0] sm:$0xff] }
 0x238   :  { %v3797_v1 = vrot.slane %v3790_v40, %v6524_v12  ;;  %v3802_v52 = vcombine.high %v3790_v40, %v3790_v40  ;;  %v3838_v5 = vrot.slane %v3831_v58, %v6524_v12  ;;  %v3944_v40 = vld [vmem:[%s6973_s3 + $0x2d8] sm:$0xff]  ;;  %v5015_v58 = vpack.c.bf16 %v3974_v22, %v3973_v63  ;;  %v3985_v22 = vld [vmem:[%s6973_s3 + $0x420] sm:$0xff] }
 0x23a   :  { %3800 = vst.msk [vmem:[#allocation2 + $0x7] ss:$8 sm:$0x3] %vm6528_vm1, %v3797_v1  ;;  %v3809_v42 = vrot.slane %v3802_v52, %v6524_v12  ;;  %v3814_v32 = vcombine.high %v3797_v1, %v3797_v1  ;;  %3841 = vst.msk [vmem:[#allocation2 + $0x47] ss:$8 sm:$0x3] %vm6528_vm1, %v3838_v5  ;;  %v4985_v5 = vpack.c.bf16 %v3926_v43, %v3925_v33 }
 0x23b   :  { %v3949_v12 = vld [vmem:[%s6973_s3 + $0x300] sm:$0xff]  ;;  %v3958_v52 = vld [vmem:[%s6973_s3 + $0x348] sm:$0xff]  ;;  %v4003_v33 = vld [vmem:[%s6973_s3 + $0x4b0] sm:$0xff] }
 0x23c   :  { %3812 = vst.msk [vmem:[#allocation2 + $0x17] ss:$8 sm:$0x3] %vm6528_vm1, %v3809_v42  ;;  %3817 = vst.msk [vmem:[#allocation2 + $0x27] ss:$8 sm:$0x3] %vm6528_vm1, %v3814_v32  ;;  %v3819_v37 = vcombine.high %v3809_v42, %v3809_v42  ;;  %v5001_v18 = vpack.c.bf16 %v3950_v21, %v3949_v12 }
 0x23d   :  { %v3957_v1 = vld [vmem:[%s6973_s3 + $0x340] sm:$0xff]  ;;  %v3975_v42 = vld [vmem:[%s6973_s3 + $0x3d0] sm:$0xff]  ;;  %v3976_v32 = vld [vmem:[%s6973_s3 + $0x3d8] sm:$0xff] }
 0x23e   :  { %3822 = vst.msk [vmem:[#allocation2 + $0x37] ss:$8 sm:$0x3] %vm6528_vm1, %v3819_v37  ;;  %v4987_v37 = vpack.c.bf16 %v3944_v40, %v3943_v25  ;;  %v5017_v12 = vpack.c.bf16 %v3958_v52, %v3957_v1  ;;  %v3945_v21 = vld [vmem:[%s6973_s3 + $0x2e0] sm:$0xff]  ;;  %v5019_v10 = vpack.c.bf16 %v3976_v32, %v3975_v42  ;;  %v4004_v43 = vld [vmem:[%s6973_s3 + $0x4b8] sm:$0xff]  ;;  %v3987_v40 = vld [vmem:[%s6973_s3 + $0x430] sm:$0xff] }
 0x23f   :  { %v5043_v25 = vpack.c.bf16 %v4004_v43, %v4003_v33  ;;  %v4005_v1 = vld [vmem:[%s6973_s3 + $0x4c0] sm:$0xff]  ;;  %v4006_v52 = vld [vmem:[%s6973_s3 + $0x4c8] sm:$0xff] }
 0x240   :  { %v5047_v42 = vpack.c.bf16 %v4006_v52, %v4005_v1  ;;  %v3989_v32 = vld [vmem:[%s6973_s3 + $0x440] sm:$0xff] }
 0x241   :  { %v3844_v15 = vld [vmem:[#allocation2 + $0x8] sm:$0xff]  ;;  %v3843_v8 = vld [vmem:[#allocation2] sm:$0xff] }
 0x242   :  { %4084 = vmatprep.mubr.f32.mxu0 %v3844_v15  ;;  %v4991_v15 = vpack.c.bf16 %v3946_v4, %v3945_v21  ;;  %v3852_v51 = vld [vmem:[#allocation2 + $0x48] sm:$0xff]  ;;  %v5051_v21 = vpack.c.bf16 %v4008_v60, %v4007_v61  ;;  %v3991_v4 = vld [vmem:[%s6973_s3 + $0x450] sm:$0xff] }
 0x243   :  { %4085 = vmatmul.mubr.f32.vlgmr.msra.gmra.mrb[60].mxu0 %v3843_v8  ;;  %v3846_v6 = vld [vmem:[#allocation2 + $0x18] sm:$0xff]  ;;  %v3848_v13 = vld [vmem:[#allocation2 + $0x28] sm:$0xff]  ;;  %v3845_v46 = vld [vmem:[#allocation2 + $0x10] sm:$0xff] }
 0x244   :  { %4970 = vmatpush3.bf16.msra.mxu0 %v4969_v50  ;;  %4154 = vmatprep.mubr.f32.mxu1 %v3846_v6  ;;  %v3960_v50 = vld [vmem:[%s6973_s3 + $0x358] sm:$0xff]  ;;  %v3929_v8 = vld [vmem:[%s6973_s3 + $0x260] sm:$0xff]  ;;  %v3962_v6 = vld [vmem:[%s6973_s3 + $0x368] sm:$0xff] }
 0x245   :  { %4224 = vmatprep.mubr.f32.mxu0 %v3848_v13  ;;  %4155 = vmatmul.mubr.f32.vlgmr.msra.gmra.mrb[68].mxu1 %v3845_v46  ;;  %v3850_v56 = vld [vmem:[#allocation2 + $0x38] sm:$0xff]  ;;  %v4993_v13 = vpack.c.bf16 %v3930_v9, %v3929_v8  ;;  %v3979_v46 = vld [vmem:[%s6973_s3 + $0x3f0] sm:$0xff]  ;;  %v3847_v29 = vld [vmem:[#allocation2 + $0x20] sm:$0xff] }
 0x246   :  { %5002 = vmatpush3.bf16.msra.mxu1 %v5001_v18  ;;  %4972 = vmatprep.subr.bf16.mxu0 %v4971_v24  ;;  %v5021_v18 = vpack.c.bf16 %v3960_v50, %v3959_v17  ;;  %v3947_v24 = vld [vmem:[%s6973_s3 + $0x2f0] sm:$0xff]  ;;  %v4009_v17 = vld [vmem:[%s6973_s3 + $0x4e0] sm:$0xff]  ;;  %v4010_v50 = vld [vmem:[%s6973_s3 + $0x4e8] sm:$0xff] }
 0x247   :  { %4294 = vmatprep.mubr.f32.mxu1 %v3850_v56  ;;  %5004 = vmatprep.subr.bf16.mxu1 %v5003_v26  ;;  %v3980_v26 = vld [vmem:[%s6973_s3 + $0x3f8] sm:$0xff]  ;;  %v5025_v56 = vpack.c.bf16 %v3962_v6, %v3961_v11  ;;  %v3849_v30 = vld [vmem:[#allocation2 + $0x30] sm:$0xff]  ;;  %v5055_v28 = vpack.c.bf16 %v4010_v50, %v4009_v17  ;;  %v3851_v6 = vld [vmem:[#allocation2 + $0x40] sm:$0xff] }
 0x248   :  { %4974 = vmatpush3.bf16.msra.mxu0 %v4973_v19  ;;  %v4995_v19 = vpack.c.bf16 %v3948_v0, %v3947_v24  ;;  %v5027_v35 = vpack.c.bf16 %v3980_v26, %v3979_v46  ;;  %v4011_v8 = vld [vmem:[%s6973_s3 + $0x4f0] sm:$0xff]  ;;  %v4012_v9 = vld [vmem:[%s6973_s3 + $0x4f8] sm:$0xff]  ;;  %v4727_v46 = vld [vmem:[%s6974_s4] ss:$0 sm:$0xff] }
 0x249   :  { %4976 = vmatprep.subr.bf16.mxu0 %v4975_v34  ;;  %v3997_v34 = vld [vmem:[%s6973_s3 + $0x480] sm:$0xff]  ;;  %v5059_v24 = vpack.c.bf16 %v4012_v9, %v4011_v8  ;;  %v3995_v0 = vld [vmem:[%s6973_s3 + $0x470] sm:$0xff] }
 0x24a   :  { %5006 = vmatpush3.bf16.msra.mxu1 %v5005_v36  ;;  %v3963_v36 = vld [vmem:[%s6973_s3 + $0x370] sm:$0xff] }
 0x24b   :  { %5008 = vmatprep.subr.bf16.mxu1 %v5007_v41  ;;  %v5031_v41 = vpack.c.bf16 %v3998_v3, %v3997_v34 }
 0x24c   :  { %4978 = vmatpush3.bf16.msra.mxu0 %v4977_v49  ;;  %v5029_v49 = vpack.c.bf16 %v3964_v62, %v3963_v36 }
 0x24d   :  { %4980 = vmatprep.subr.bf16.mxu0 %v4979_v57  ;;  %v5033_v57 = vpack.c.bf16 %v3982_v47, %v3981_v55 }
 0x24e   :  { %5010 = vmatpush3.bf16.msra.mxu1 %v5009_v59  ;;  %v3984_v59 = vld [vmem:[%s6973_s3 + $0x418] sm:$0xff] }
 0x24f   :  { %5012 = vmatprep.subr.bf16.mxu1 %v5011_v31  ;;  %v4002_v31 = vld [vmem:[%s6973_s3 + $0x4a8] sm:$0xff] }
 0x250   :  { %4982 = vmatpush3.bf16.msra.mxu0 %v4981_v2  ;;  %v5037_v2 = vpack.c.bf16 %v3984_v59, %v3983_v7  ;;  %v5039_v63 = vpack.c.bf16 %v4002_v31, %v4001_v44 }
 0x251   :  { %4984 = vmatprep.subr.bf16.mxu0 %v4983_v48  ;;  %v3986_v48 = vld [vmem:[%s6973_s3 + $0x428] sm:$0xff] }
 0x252   :  { %5014 = vmatpush3.bf16.msra.mxu1 %v5013_v45  ;;  %v5041_v45 = vpack.c.bf16 %v3986_v48, %v3985_v22 }
 0x253   :  { %5016 = vmatprep.subr.bf16.mxu1 %v5015_v58  ;;  %v3988_v58 = vld [vmem:[%s6973_s3 + $0x438] sm:$0xff] }
 0x254   :  { %4986 = vmatpush3.bf16.msra.mxu0 %v4985_v5  ;;  %v5045_v5 = vpack.c.bf16 %v3988_v58, %v3987_v40 }
 0x255   :  { %4988 = vmatprep.subr.bf16.mxu0 %v4987_v37  ;;  %v3990_v37 = vld [vmem:[%s6973_s3 + $0x448] sm:$0xff] }
 0x256   :  { %5018 = vmatpush3.bf16.msra.mxu1 %v5017_v12  ;;  %v5049_v12 = vpack.c.bf16 %v3990_v37, %v3989_v32 }
 0x257   :  { %5020 = vmatprep.subr.bf16.mxu1 %v5019_v10  ;;  %v3992_v10 = vld [vmem:[%s6973_s3 + $0x458] sm:$0xff] }
 0x258   :  { %4990 = vmatpush3.bf16.msra.mxu0 %v4989_v14  ;;  %v5053_v14 = vpack.c.bf16 %v3992_v10, %v3991_v4 }
 0x259   :  { %4992 = vmatprep.subr.bf16.mxu0 %v4991_v15  ;;  %v3994_v15 = vld [vmem:[%s6973_s3 + $0x468] sm:$0xff] }
 0x25a   :  { %5022 = vmatpush3.bf16.msra.mxu1 %v5021_v18  ;;  %v5057_v18 = vpack.c.bf16 %v3994_v15, %v3993_v16 }
 0x25b   :  { %5024 = vmatprep.subr.bf16.mxu1 %v5023_v20  ;;  %v3996_v20 = vld [vmem:[%s6973_s3 + $0x478] sm:$0xff] }
 0x25c   :  { %4994 = vmatpush3.bf16.msra.mxu0 %v4993_v13  ;;  %v5061_v11 = vpack.c.bf16 %v3996_v20, %v3995_v0 }
 0x25d   :  { %4996 = vmatprep.subr.bf16.mxu0 %v4995_v19 }
 0x25e   :  { %5026 = vmatpush3.bf16.msra.mxu1 %v5025_v56 }
 0x25f   :  { %5028 = vmatprep.subr.bf16.mxu1 %v5027_v35 }
 0x260   :  { %4998 = vmatpush3.bf16.msra.mxu0 %v4997_v38 }
 0x261   :  { %5032 = vmatprep.subr.bf16.mxu0 %v5031_v41 }
 0x262   :  { %5030 = vmatpush3.bf16.msra.mxu1 %v5029_v49 }
 0x263   :  { %4225 = vmatmul.mubr.f32.vlgmr.msra.gmra.mrb[62].mxu0 %v3847_v29 }
 0x264   :  { %5034 = vmatpush3.bf16.msra.mxu0 %v5033_v57  ;;  %4364 = vmatprep.mubr.f32.mxu0 %v3852_v51 }
 0x265   :  { %4295 = vmatmul.mubr.f32.vlgmr.msra.gmra.mrb[70].mxu1 %v3849_v30  ;;  %5036 = vmatprep.subr.bf16.mxu0 %v5035_v54 }
 0x268   :  { %5038 = vmatpush3.bf16.msra.mxu0 %v5037_v2 }
 0x269   :  { %5040 = vmatprep.subr.bf16.mxu0 %v5039_v63 }
 0x26c   :  { %5042 = vmatpush3.bf16.msra.mxu0 %v5041_v45 }
 0x26d   :  { %5044 = vmatprep.subr.bf16.mxu0 %v5043_v25 }
 0x270   :  { %5046 = vmatpush3.bf16.msra.mxu0 %v5045_v5 }
 0x271   :  { %5048 = vmatprep.subr.bf16.mxu0 %v5047_v42 }
 0x274   :  { %5050 = vmatpush3.bf16.msra.mxu0 %v5049_v12 }
 0x275   :  { %5052 = vmatprep.subr.bf16.mxu0 %v5051_v21 }
 0x278   :  { %5054 = vmatpush3.bf16.msra.mxu0 %v5053_v14 }
 0x279   :  { %5056 = vmatprep.subr.bf16.mxu0 %v5055_v28 }
 0x27c   :  { %5058 = vmatpush3.bf16.msra.mxu0 %v5057_v18 }
 0x27d   :  { %5060 = vmatprep.subr.bf16.mxu0 %v5059_v24 }
 0x280   :  { %5062 = vmatpush3.bf16.msra.mxu0 %v5061_v11 }
 0x283   :  { %4365 = vmatmul.mubr.f32.vlgmr.msra.gmra.mrb[64].mxu0 %v3851_v6 }
 0x316   :  { %v4760_v13 = vpop.f32.mrb[60].mxu0 }
 0x317   :  { %v4761_v26 = vpop.f32.mrb[61].mxu0 }
 0x318   :  { %v4762_v19 = vadd.f32 %v4761_v26, %v4760_v13  ;;  %v4795_v23 = vpop.f32.mrb[68].mxu1 }
 0x319   :  { %v4796_v27 = vpop.f32.mrb[69].mxu1 }
 0x31a   :  { %v4087_v56 = vadd.f32 %v4762_v19, %v4727_v46  ;;  %v4797_v34 = vadd.f32 %v4796_v27, %v4795_v23 }
 0x31c   :  { %v4157_v3 = vadd.f32 %v4797_v34, %v4087_v56 }
 0x336   :  { %v4830_v35 = vpop.f32.mrb[62].mxu0 }
 0x337   :  { %v4831_v36 = vpop.f32.mrb[63].mxu0 }
 0x338   :  { %v4832_v62 = vadd.f32 %v4831_v36, %v4830_v35  ;;  %v4865_v38 = vpop.f32.mrb[70].mxu1 }
 0x339   :  { %v4866_v41 = vpop.f32.mrb[71].mxu1 }
 0x33a   :  { %v4227_v55 = vadd.f32 %v4832_v62, %v4157_v3  ;;  %v4867_v47 = vadd.f32 %v4866_v41, %v4865_v38 }
 0x33c   :  { %v4297_v49 = vadd.f32 %v4867_v47, %v4227_v55 }
 0x356   :  { %v4900_v53 = vpop.f32.mrb[64].mxu0 }
 0x357   :  { %v4901_v39 = vpop.f32.mrb[65].mxu0 }
 0x358   :  { %v4902_v57 = vadd.f32 %v4901_v39, %v4900_v53 }
 0x35a   :  { %v4367_v54 = vadd.f32 %v4902_v57, %v4297_v49 }
 0x35c   :  { %4370 = vst [vmem:[%s6975_s5] sm:$0xff] %v4367_v54 }

</bundles_post_ra>
